<compile_context>
chip_gen: v6e
topology: v6e:2x2x1
jax: 0.10.0
libtpu: 0.0.40
codegen_flags: <defaults>
</compile_context>

<pallas_src>
import functools

import jax
import jax.numpy as jnp
from jax.experimental import pallas as pl
from jax.experimental.pallas import tpu as pltpu


def _masknet_kernel(feat_ref, w1_ref, b1_ref,
                    wlin_ref, blin_ref, wproj_ref, wconv_ref,
                    w2_ref, b2_ref, out_ref, *, layers, lorder, ew_dtype):
    BB, T, indim = feat_ref.shape
    H = w1_ref.shape[1]
    M = BB * T
    f32 = jnp.float32
    bf16 = jnp.bfloat16

    # Fold batch into the matmul M dimension (layout-preserving: T % 8 == 0).
    x = feat_ref[...].reshape(M, indim)                              # bf16 already

    # linear1 + relu (bf16 MXU, f32 accumulate / elementwise).
    h = jnp.dot(x, w1_ref[...], preferred_element_type=f32) + b1_ref[...]
    h = jnp.maximum(h, 0.0)                                          # [M, H] f32

    # Hoisted zero block for the causal left padding (reused by every layer).
    zpad = jnp.zeros((BB, lorder - 1, H), ew_dtype)

    def layer_body(l, h):
        wlin = wlin_ref[l]                                           # [H, H2] bf16
        blin = blin_ref[l]                                           # [1, H2] f32
        wproj = wproj_ref[l]                                         # [H2, H] bf16
        wconv = wconv_ref[l].astype(ew_dtype)                        # [lorder, H]

        f1 = jnp.dot(h.astype(bf16), wlin, preferred_element_type=f32) + blin
        f1 = jnp.maximum(f1, 0.0)                                    # [M, H2]
        p1 = jnp.dot(f1.astype(bf16), wproj, preferred_element_type=f32)  # [M, H]

        # Causal depthwise conv along time, on the (BB, T, H) view:
        #   conv[t] = sum_k pad[t + k] * wconv[k],  pad = zeros(lorder-1) ++ p1
        # The k = lorder-1 tap multiplies p1 itself, so it is folded together
        # with the "+ p1" of the residual: acc = p1*(1 + w_last) + other taps.
        p1e = p1.astype(ew_dtype).reshape(BB, T, H)
        pad = jnp.concatenate([zpad, p1e], axis=1)                   # [BB, T+lorder-1, H]
        acc = p1e * (1.0 + wconv[lorder - 1])
        for k in range(lorder - 1):
            acc = acc + pad[:, k:k + T, :] * wconv[k]
        return h + acc.reshape(M, H).astype(f32)                     # residual

    if layers <= 4:
        for l in range(layers):                                      # static indices
            h = layer_body(l, h)
    else:
        h = jax.lax.fori_loop(0, layers, layer_body, h, unroll=2)

    # linear2 + Sigmoid (crm=False path); output lane dim is padded to 128*k.
    y = jnp.dot(h.astype(bf16), w2_ref[...], preferred_element_type=f32) + b2_ref[...]
    out_ref[...] = jax.nn.sigmoid(y).reshape(out_ref.shape).astype(out_ref.dtype)


def masknet_forward(feat, params, *, layers, lorder, block_b=None,
                    ew_dtype=jnp.float32, out_dtype=None):
    """Run the MaskNet forward pass with the Pallas kernel.

    ew_dtype: dtype of the FSMN conv / residual elementwise chain.  f32 is safe
      on every chip; bf16 roughly halves the VALU-bound inner loop on v6e/v7x
      (do NOT use bf16 on v5e — its VPU has no bf16).
    out_dtype: output dtype (default: feat.dtype); bf16 halves output DMA if
      the downstream consumer tolerates it.
    """
    if out_dtype is None:
        out_dtype = feat.dtype
    B, T, indim = feat.shape
    hidden = params["w1"].shape[1]
    hidden2 = params["wlin"].shape[2]
    outdim = params["w2"].shape[1]

    # Pad T to a sublane multiple so the (BB,T,F)->(BB*T,F) fold is
    # layout-preserving; the conv is causal so the padded tail never affects
    # valid time steps.
    Tp = pl.cdiv(T, 8) * 8
    if Tp != T:
        feat = jnp.pad(feat, ((0, 0), (0, Tp - T), (0, 0)))

    # Batch tile: target M = BB*T ~ 2048 to amortize per-step overhead and MXU
    # weight pushes, but keep >= 2 grid steps when possible (v7x: 2 TensorCores
    # share the "parallel" grid axis).
    if block_b is None:
        target_m = 2048
        bb = max(1, target_m // Tp)
        if B >= 2:
            bb = min(bb, pl.cdiv(B, 2))
        block_b = max(1, min(B, bb))
    BB = block_b
    Bp = pl.cdiv(B, BB) * BB
    if Bp != B:
        feat = jnp.pad(feat, ((0, Bp - B), (0, 0), (0, 0)))

    # Lane-dense output: pad outdim up to a multiple of 128 (zero weight cols),
    # strip the padding outside the kernel.
    outdim_p = pl.cdiv(outdim, 128) * 128
    w2 = params["w2"]
    b2 = params["b2"]
    if outdim_p != outdim:
        w2 = jnp.pad(w2, ((0, 0), (0, outdim_p - outdim)))
        b2 = jnp.pad(b2, ((0, 0), (0, outdim_p - outdim)))

    # Ship the input and matmul weights in bf16 (half DMA / VMEM); biases and
    # conv taps stay f32.  All matmuls accumulate in f32 inside the kernel.
    bf = jnp.bfloat16
    feat_bf = feat.astype(bf)
    w1 = params["w1"].astype(bf)
    wlin = params["wlin"].astype(bf)
    wproj = params["wproj"].astype(bf)
    w2 = w2.astype(bf)
    b1, blin, wconv = params["b1"], params["blin"], params["wconv"]

    kernel = functools.partial(_masknet_kernel, layers=layers, lorder=lorder,
                               ew_dtype=ew_dtype)

    def full(arr):
        nd = arr.ndim
        return pl.BlockSpec(arr.shape, lambda i, nd=nd: (0,) * nd)

    flops = 2 * Bp * Tp * (indim * hidden
                           + layers * (hidden * hidden2 + hidden2 * hidden + lorder * hidden)
                           + hidden * outdim_p)
    weight_bytes = sum(int(a.size) * a.dtype.itemsize
                       for a in (w1, b1, wlin, blin, wproj, wconv, w2, b2))
    bytes_accessed = (int(feat_bf.size) * feat_bf.dtype.itemsize
                      + weight_bytes
                      + Bp * Tp * outdim_p * jnp.dtype(out_dtype).itemsize)
    cost = pl.CostEstimate(flops=int(flops),
                           transcendentals=int(Bp * Tp * outdim_p),
                           bytes_accessed=int(bytes_accessed))

    out = pl.pallas_call(
        kernel,
        out_shape=jax.ShapeDtypeStruct((Bp, Tp, outdim_p), out_dtype),
        grid=(Bp // BB,),
        in_specs=[
            pl.BlockSpec((BB, Tp, indim), lambda i: (i, 0, 0)),
            full(w1), full(b1),
            full(wlin), full(blin), full(wproj), full(wconv),
            full(w2), full(b2),
        ],
        out_specs=pl.BlockSpec((BB, Tp, outdim_p), lambda i: (i, 0, 0)),
        compiler_params=pltpu.CompilerParams(
            dimension_semantics=("parallel",),
            vmem_limit_bytes=48 * 1024 * 1024),
        cost_estimate=cost,
    )(feat_bf, w1, b1, wlin, blin, wproj, wconv, w2, b2)

    return out[:B, :T, :outdim]


def masknet_ref_mixed(feat, params, *, layers, lorder):
    """Pure-JAX reference with the same bf16-at-MXU mixed precision as the kernel."""
    bf = jnp.bfloat16
    h = jnp.maximum(
        jnp.einsum("bti,ih->bth", feat.astype(bf), params["w1"].astype(bf),
                   preferred_element_type=jnp.float32) + params["b1"], 0.0)
    T = h.shape[1]
    for l in range(layers):
        f1 = jnp.maximum(
            jnp.einsum("bth,hf->btf", h.astype(bf), params["wlin"][l].astype(bf),
                       preferred_element_type=jnp.float32) + params["blin"][l], 0.0)
        p1 = jnp.einsum("btf,fh->bth", f1.astype(bf), params["wproj"][l].astype(bf),
                        preferred_element_type=jnp.float32)
        pad = jnp.pad(p1, ((0, 0), (lorder - 1, 0), (0, 0)))
        conv = jnp.zeros_like(p1)
        for k in range(lorder):
            conv = conv + pad[:, k:k + T, :] * params["wconv"][l, k][None, None, :]
        h = h + p1 + conv
    y = jnp.einsum("bth,ho->bto", h.astype(bf), params["w2"].astype(bf),
                   preferred_element_type=jnp.float32) + params["b2"]
    return jax.nn.sigmoid(y)


def masknet_ref_f32(feat, params, *, layers, lorder):
    """Pure-f32 reference mirroring the PyTorch forward exactly."""
    h = jnp.maximum(jnp.einsum("bti,ih->bth", feat, params["w1"]) + params["b1"], 0.0)
    T = h.shape[1]
    for l in range(layers):
        f1 = jnp.maximum(jnp.einsum("bth,hf->btf", h, params["wlin"][l]) + params["blin"][l], 0.0)
        p1 = jnp.einsum("btf,fh->bth", f1, params["wproj"][l])
        pad = jnp.pad(p1, ((0, 0), (lorder - 1, 0), (0, 0)))
        conv = jnp.zeros_like(p1)
        for k in range(lorder):
            conv = conv + pad[:, k:k + T, :] * params["wconv"][l, k][None, None, :]
        h = h + p1 + conv
    return jax.nn.sigmoid(jnp.einsum("bth,ho->bto", h, params["w2"]) + params["b2"])


def init_params(key, indim, hidden, hidden2, outdim, layers, lorder):
    ks = jax.random.split(key, 8)
    s = lambda n: 1.0 / jnp.sqrt(jnp.float32(n))
    return {
        "w1":    jax.random.normal(ks[0], (indim, hidden), jnp.float32) * s(indim),
        "b1":    jax.random.normal(ks[1], (1, hidden), jnp.float32) * 0.1,
        "wlin":  jax.random.normal(ks[2], (layers, hidden, hidden2), jnp.float32) * s(hidden),
        "blin":  jax.random.normal(ks[3], (layers, 1, hidden2), jnp.float32) * 0.1,
        "wproj": jax.random.normal(ks[4], (layers, hidden2, hidden), jnp.float32) * s(hidden2),
        # depthwise Conv2d weight (out_dim, 1, lorder, 1) stored as [layers, lorder, hidden]
        "wconv": jax.random.normal(ks[5], (layers, lorder, hidden), jnp.float32) * s(lorder),
        "w2":    jax.random.normal(ks[6], (hidden, outdim), jnp.float32) * s(hidden),
        "b2":    jax.random.normal(ks[7], (1, outdim), jnp.float32) * 0.1,
    }


if __name__ == "__main__":
    # Small shapes consistent with the module (hidden_dim defaults to 128).
    B, T = 16, 32
    indim, hidden, outdim = 64, 128, 64
    hidden2 = hidden            # hidden_dim2=None -> hidden_dim
    layers, lorder = 3, 5

    key = jax.random.PRNGKey(0)
    kf, kp, kf2 = jax.random.split(key, 3)
    feat = jax.random.normal(kf, (B, T, indim), jnp.float32)
    params = init_params(kp, indim, hidden, hidden2, outdim, layers, lorder)

    out = jax.block_until_ready(
        masknet_forward(feat, params, layers=layers, lorder=lorder))
    assert out.shape == (B, T, outdim)

    # Tight check against a reference with the same bf16-at-MXU policy.
    ref_mx = jax.block_until_ready(
        masknet_ref_mixed(feat, params, layers=layers, lorder=lorder))
    err_mx = float(jnp.max(jnp.abs(out - ref_mx)))
    assert err_mx < 5e-3, f"mismatch vs mixed-precision ref: {err_mx}"

    # Loose sanity check against the exact f32 module semantics (bf16 MXU error only).
    ref32 = jax.block_until_ready(
        masknet_ref_f32(feat, params, layers=layers, lorder=lorder))
    err32 = float(jnp.max(jnp.abs(out - ref32)))
    assert err32 < 0.1, f"mismatch vs f32 reference: {err32}"

    # Exercise the padding paths: batch not a multiple of the batch tile and
    # T not a multiple of 8 (causal conv => padded tail is inert).
    B2, T2 = 3, 30
    feat2 = jax.random.normal(kf2, (B2, T2, indim), jnp.float32)
    out2 = jax.block_until_ready(
        masknet_forward(feat2, params, layers=layers, lorder=lorder))
    ref2 = jax.block_until_ready(
        masknet_ref_mixed(feat2, params, layers=layers, lorder=lorder))
    err2 = float(jnp.max(jnp.abs(out2 - ref2)))
    assert out2.shape == (B2, T2, outdim)
    assert err2 < 5e-3, f"padded-path mismatch vs mixed-precision ref: {err2}"

    print("KERNEL_OK")
</pallas_src>

<mosaic_0001>
module attributes {stable_mosaic.version = 11 : i64} {
  func.func @_masknet_kernel(%arg0: i32, %arg1: memref<8x32x64xbf16, #tpu.memory_space<vmem>>, %arg2: memref<64x128xbf16, #tpu.memory_space<vmem>>, %arg3: memref<1x128xf32, #tpu.memory_space<vmem>>, %arg4: memref<3x128x128xbf16, #tpu.memory_space<vmem>>, %arg5: memref<3x1x128xf32, #tpu.memory_space<vmem>>, %arg6: memref<3x128x128xbf16, #tpu.memory_space<vmem>>, %arg7: memref<3x5x128xf32, #tpu.memory_space<vmem>>, %arg8: memref<128x128xbf16, #tpu.memory_space<vmem>>, %arg9: memref<1x128xf32, #tpu.memory_space<vmem>>, %arg10: memref<8x32x128xf32, #tpu.memory_space<vmem>>) attributes {dimension_semantics = [#tpu.dimension_semantics<parallel>], iteration_bounds = array<i64: 2>, scalar_prefetch = 0 : i64, scratch_operands = 0 : i64, tpu.core_type = #tpu.core_type<tc>, window_params = [{transform_indices = @transform_0, window_bounds = array<i64: 8, 32, 64>}, {pipeline_mode = #tpu.pipeline_mode<synchronous>, transform_indices = @transform_1, window_bounds = array<i64: 64, 128>}, {pipeline_mode = #tpu.pipeline_mode<synchronous>, transform_indices = @transform_2, window_bounds = array<i64: 1, 128>}, {pipeline_mode = #tpu.pipeline_mode<synchronous>, transform_indices = @transform_3, window_bounds = array<i64: 3, 128, 128>}, {pipeline_mode = #tpu.pipeline_mode<synchronous>, transform_indices = @transform_4, window_bounds = array<i64: 3, 1, 128>}, {pipeline_mode = #tpu.pipeline_mode<synchronous>, transform_indices = @transform_5, window_bounds = array<i64: 3, 128, 128>}, {pipeline_mode = #tpu.pipeline_mode<synchronous>, transform_indices = @transform_6, window_bounds = array<i64: 3, 5, 128>}, {pipeline_mode = #tpu.pipeline_mode<synchronous>, transform_indices = @transform_7, window_bounds = array<i64: 128, 128>}, {pipeline_mode = #tpu.pipeline_mode<synchronous>, transform_indices = @transform_8, window_bounds = array<i64: 1, 128>}, {transform_indices = @transform_9, window_bounds = array<i64: 8, 32, 128>}]} {
    %c0 = arith.constant 0 : index
    %c0_0 = arith.constant 0 : index
    %c0_1 = arith.constant 0 : index
    %0 = vector.load %arg1[%c0, %c0_0, %c0_1] : memref<8x32x64xbf16, #tpu.memory_space<vmem>>, vector<8x32x64xbf16>
    %1 = vector.shape_cast %0 : vector<8x32x64xbf16> to vector<256x64xbf16>
    %c0_2 = arith.constant 0 : index
    %c0_3 = arith.constant 0 : index
    %2 = vector.load %arg2[%c0_2, %c0_3] : memref<64x128xbf16, #tpu.memory_space<vmem>>, vector<64x128xbf16>
    %cst = arith.constant dense<0.000000e+00> : vector<256x128xf32>
    %3 = tpu.matmul %1, %2, %cst {dimension_numbers = #tpu.dot_dimension_numbers<[1], [0], [0], [1], [0, 0, 1, 1], [], []>} : vector<256x64xbf16>, vector<64x128xbf16>, vector<256x128xf32> -> vector<256x128xf32>
    %c0_4 = arith.constant 0 : index
    %c0_5 = arith.constant 0 : index
    %4 = vector.load %arg3[%c0_4, %c0_5] : memref<1x128xf32, #tpu.memory_space<vmem>>, vector<1x128xf32>
    %5 = vector.broadcast %4 : vector<1x128xf32> to vector<256x128xf32>
    %6 = arith.addf %3, %5 : vector<256x128xf32>
    %cst_6 = arith.constant 0.000000e+00 : f32
    %7 = vector.broadcast %cst_6 : f32 to vector<256x128xf32>
    %8 = arith.maximumf %6, %7 : vector<256x128xf32>
    %cst_7 = arith.constant 0.000000e+00 : f32
    %9 = vector.broadcast %cst_7 : f32 to vector<8x4x128xf32>
    %c0_8 = arith.constant 0 : index
    %c0_9 = arith.constant 0 : index
    %c0_10 = arith.constant 0 : index
    %10 = vector.load %arg4[%c0_8, %c0_9, %c0_10] : memref<3x128x128xbf16, #tpu.memory_space<vmem>>, vector<1x128x128xbf16>
    %11 = vector.shape_cast %10 : vector<1x128x128xbf16> to vector<128x128xbf16>
    %c0_11 = arith.constant 0 : index
    %c0_12 = arith.constant 0 : index
    %c0_13 = arith.constant 0 : index
    %12 = vector.load %arg5[%c0_11, %c0_12, %c0_13] : memref<3x1x128xf32, #tpu.memory_space<vmem>>, vector<1x1x128xf32>
    %13 = vector.shape_cast %12 : vector<1x1x128xf32> to vector<1x128xf32>
    %c0_14 = arith.constant 0 : index
    %c0_15 = arith.constant 0 : index
    %c0_16 = arith.constant 0 : index
    %14 = vector.load %arg6[%c0_14, %c0_15, %c0_16] : memref<3x128x128xbf16, #tpu.memory_space<vmem>>, vector<1x128x128xbf16>
    %15 = vector.shape_cast %14 : vector<1x128x128xbf16> to vector<128x128xbf16>
    %c0_17 = arith.constant 0 : index
    %c0_18 = arith.constant 0 : index
    %c0_19 = arith.constant 0 : index
    %16 = vector.load %arg7[%c0_17, %c0_18, %c0_19] : memref<3x5x128xf32, #tpu.memory_space<vmem>>, vector<1x5x128xf32>
    %17 = vector.shape_cast %16 : vector<1x5x128xf32> to vector<5x128xf32>
    %18 = arith.truncf %8 : vector<256x128xf32> to vector<256x128xbf16>
    %cst_20 = arith.constant dense<0.000000e+00> : vector<256x128xf32>
    %19 = tpu.matmul %18, %11, %cst_20 {dimension_numbers = #tpu.dot_dimension_numbers<[1], [0], [0], [1], [0, 0, 1, 1], [], []>} : vector<256x128xbf16>, vector<128x128xbf16>, vector<256x128xf32> -> vector<256x128xf32>
    %20 = vector.broadcast %13 : vector<1x128xf32> to vector<256x128xf32>
    %21 = arith.addf %19, %20 : vector<256x128xf32>
    %cst_21 = arith.constant 0.000000e+00 : f32
    %22 = vector.broadcast %cst_21 : f32 to vector<256x128xf32>
    %23 = arith.maximumf %21, %22 : vector<256x128xf32>
    %24 = arith.truncf %23 : vector<256x128xf32> to vector<256x128xbf16>
    %cst_22 = arith.constant dense<0.000000e+00> : vector<256x128xf32>
    %25 = tpu.matmul %24, %15, %cst_22 {dimension_numbers = #tpu.dot_dimension_numbers<[1], [0], [0], [1], [0, 0, 1, 1], [], []>} : vector<256x128xbf16>, vector<128x128xbf16>, vector<256x128xf32> -> vector<256x128xf32>
    %26 = vector.shape_cast %25 : vector<256x128xf32> to vector<8x32x128xf32>
    %27 = tpu.concatenate %9, %26 in 1 : vector<8x4x128xf32>, vector<8x32x128xf32> -> vector<8x36x128xf32>
    %28 = vector.extract_strided_slice %17 {offsets = [4, 0], sizes = [1, 128], strides = [1, 1]} : vector<5x128xf32> to vector<1x128xf32>
    %29 = vector.shape_cast %28 : vector<1x128xf32> to vector<128xf32>
    %cst_23 = arith.constant 1.000000e+00 : f32
    %30 = vector.broadcast %cst_23 : f32 to vector<128xf32>
    %31 = arith.addf %30, %29 : vector<128xf32>
    %32 = vector.shape_cast %31 : vector<128xf32> to vector<1x1x128xf32>
    %33 = vector.broadcast %32 : vector<1x1x128xf32> to vector<8x32x128xf32>
    %34 = arith.mulf %26, %33 : vector<8x32x128xf32>
    %35 = vector.extract_strided_slice %27 {offsets = [0, 0, 0], sizes = [8, 32, 128], strides = [1, 1, 1]} : vector<8x36x128xf32> to vector<8x32x128xf32>
    %36 = vector.extract_strided_slice %17 {offsets = [0, 0], sizes = [1, 128], strides = [1, 1]} : vector<5x128xf32> to vector<1x128xf32>
    %37 = vector.shape_cast %36 : vector<1x128xf32> to vector<128xf32>
    %38 = vector.shape_cast %37 : vector<128xf32> to vector<1x1x128xf32>
    %39 = vector.broadcast %38 : vector<1x1x128xf32> to vector<8x32x128xf32>
    %40 = arith.mulf %35, %39 : vector<8x32x128xf32>
    %41 = arith.addf %34, %40 : vector<8x32x128xf32>
    %42 = vector.extract_strided_slice %27 {offsets = [0, 1, 0], sizes = [8, 32, 128], strides = [1, 1, 1]} : vector<8x36x128xf32> to vector<8x32x128xf32>
    %43 = vector.extract_strided_slice %17 {offsets = [1, 0], sizes = [1, 128], strides = [1, 1]} : vector<5x128xf32> to vector<1x128xf32>
    %44 = vector.shape_cast %43 : vector<1x128xf32> to vector<128xf32>
    %45 = vector.shape_cast %44 : vector<128xf32> to vector<1x1x128xf32>
    %46 = vector.broadcast %45 : vector<1x1x128xf32> to vector<8x32x128xf32>
    %47 = arith.mulf %42, %46 : vector<8x32x128xf32>
    %48 = arith.addf %41, %47 : vector<8x32x128xf32>
    %49 = vector.extract_strided_slice %27 {offsets = [0, 2, 0], sizes = [8, 32, 128], strides = [1, 1, 1]} : vector<8x36x128xf32> to vector<8x32x128xf32>
    %50 = vector.extract_strided_slice %17 {offsets = [2, 0], sizes = [1, 128], strides = [1, 1]} : vector<5x128xf32> to vector<1x128xf32>
    %51 = vector.shape_cast %50 : vector<1x128xf32> to vector<128xf32>
    %52 = vector.shape_cast %51 : vector<128xf32> to vector<1x1x128xf32>
    %53 = vector.broadcast %52 : vector<1x1x128xf32> to vector<8x32x128xf32>
    %54 = arith.mulf %49, %53 : vector<8x32x128xf32>
    %55 = arith.addf %48, %54 : vector<8x32x128xf32>
    %56 = vector.extract_strided_slice %27 {offsets = [0, 3, 0], sizes = [8, 32, 128], strides = [1, 1, 1]} : vector<8x36x128xf32> to vector<8x32x128xf32>
    %57 = vector.extract_strided_slice %17 {offsets = [3, 0], sizes = [1, 128], strides = [1, 1]} : vector<5x128xf32> to vector<1x128xf32>
    %58 = vector.shape_cast %57 : vector<1x128xf32> to vector<128xf32>
    %59 = vector.shape_cast %58 : vector<128xf32> to vector<1x1x128xf32>
    %60 = vector.broadcast %59 : vector<1x1x128xf32> to vector<8x32x128xf32>
    %61 = arith.mulf %56, %60 : vector<8x32x128xf32>
    %62 = arith.addf %55, %61 : vector<8x32x128xf32>
    %63 = vector.shape_cast %62 : vector<8x32x128xf32> to vector<256x128xf32>
    %64 = arith.addf %8, %63 : vector<256x128xf32>
    %c1 = arith.constant 1 : index
    %c0_24 = arith.constant 0 : index
    %c0_25 = arith.constant 0 : index
    %65 = vector.load %arg4[%c1, %c0_24, %c0_25] : memref<3x128x128xbf16, #tpu.memory_space<vmem>>, vector<1x128x128xbf16>
    %66 = vector.shape_cast %65 : vector<1x128x128xbf16> to vector<128x128xbf16>
    %c1_26 = arith.constant 1 : index
    %c0_27 = arith.constant 0 : index
    %c0_28 = arith.constant 0 : index
    %67 = vector.load %arg5[%c1_26, %c0_27, %c0_28] : memref<3x1x128xf32, #tpu.memory_space<vmem>>, vector<1x1x128xf32>
    %68 = vector.shape_cast %67 : vector<1x1x128xf32> to vector<1x128xf32>
    %c1_29 = arith.constant 1 : index
    %c0_30 = arith.constant 0 : index
    %c0_31 = arith.constant 0 : index
    %69 = vector.load %arg6[%c1_29, %c0_30, %c0_31] : memref<3x128x128xbf16, #tpu.memory_space<vmem>>, vector<1x128x128xbf16>
    %70 = vector.shape_cast %69 : vector<1x128x128xbf16> to vector<128x128xbf16>
    %c1_32 = arith.constant 1 : index
    %c0_33 = arith.constant 0 : index
    %c0_34 = arith.constant 0 : index
    %71 = vector.load %arg7[%c1_32, %c0_33, %c0_34] : memref<3x5x128xf32, #tpu.memory_space<vmem>>, vector<1x5x128xf32>
    %72 = vector.shape_cast %71 : vector<1x5x128xf32> to vector<5x128xf32>
    %73 = arith.truncf %64 : vector<256x128xf32> to vector<256x128xbf16>
    %cst_35 = arith.constant dense<0.000000e+00> : vector<256x128xf32>
    %74 = tpu.matmul %73, %66, %cst_35 {dimension_numbers = #tpu.dot_dimension_numbers<[1], [0], [0], [1], [0, 0, 1, 1], [], []>} : vector<256x128xbf16>, vector<128x128xbf16>, vector<256x128xf32> -> vector<256x128xf32>
    %75 = vector.broadcast %68 : vector<1x128xf32> to vector<256x128xf32>
    %76 = arith.addf %74, %75 : vector<256x128xf32>
    %cst_36 = arith.constant 0.000000e+00 : f32
    %77 = vector.broadcast %cst_36 : f32 to vector<256x128xf32>
    %78 = arith.maximumf %76, %77 : vector<256x128xf32>
    %79 = arith.truncf %78 : vector<256x128xf32> to vector<256x128xbf16>
    %cst_37 = arith.constant dense<0.000000e+00> : vector<256x128xf32>
    %80 = tpu.matmul %79, %70, %cst_37 {dimension_numbers = #tpu.dot_dimension_numbers<[1], [0], [0], [1], [0, 0, 1, 1], [], []>} : vector<256x128xbf16>, vector<128x128xbf16>, vector<256x128xf32> -> vector<256x128xf32>
    %81 = vector.shape_cast %80 : vector<256x128xf32> to vector<8x32x128xf32>
    %82 = tpu.concatenate %9, %81 in 1 : vector<8x4x128xf32>, vector<8x32x128xf32> -> vector<8x36x128xf32>
    %83 = vector.extract_strided_slice %72 {offsets = [4, 0], sizes = [1, 128], strides = [1, 1]} : vector<5x128xf32> to vector<1x128xf32>
    %84 = vector.shape_cast %83 : vector<1x128xf32> to vector<128xf32>
    %cst_38 = arith.constant 1.000000e+00 : f32
    %85 = vector.broadcast %cst_38 : f32 to vector<128xf32>
    %86 = arith.addf %85, %84 : vector<128xf32>
    %87 = vector.shape_cast %86 : vector<128xf32> to vector<1x1x128xf32>
    %88 = vector.broadcast %87 : vector<1x1x128xf32> to vector<8x32x128xf32>
    %89 = arith.mulf %81, %88 : vector<8x32x128xf32>
    %90 = vector.extract_strided_slice %82 {offsets = [0, 0, 0], sizes = [8, 32, 128], strides = [1, 1, 1]} : vector<8x36x128xf32> to vector<8x32x128xf32>
    %91 = vector.extract_strided_slice %72 {offsets = [0, 0], sizes = [1, 128], strides = [1, 1]} : vector<5x128xf32> to vector<1x128xf32>
    %92 = vector.shape_cast %91 : vector<1x128xf32> to vector<128xf32>
    %93 = vector.shape_cast %92 : vector<128xf32> to vector<1x1x128xf32>
    %94 = vector.broadcast %93 : vector<1x1x128xf32> to vector<8x32x128xf32>
    %95 = arith.mulf %90, %94 : vector<8x32x128xf32>
    %96 = arith.addf %89, %95 : vector<8x32x128xf32>
    %97 = vector.extract_strided_slice %82 {offsets = [0, 1, 0], sizes = [8, 32, 128], strides = [1, 1, 1]} : vector<8x36x128xf32> to vector<8x32x128xf32>
    %98 = vector.extract_strided_slice %72 {offsets = [1, 0], sizes = [1, 128], strides = [1, 1]} : vector<5x128xf32> to vector<1x128xf32>
    %99 = vector.shape_cast %98 : vector<1x128xf32> to vector<128xf32>
    %100 = vector.shape_cast %99 : vector<128xf32> to vector<1x1x128xf32>
    %101 = vector.broadcast %100 : vector<1x1x128xf32> to vector<8x32x128xf32>
    %102 = arith.mulf %97, %101 : vector<8x32x128xf32>
    %103 = arith.addf %96, %102 : vector<8x32x128xf32>
    %104 = vector.extract_strided_slice %82 {offsets = [0, 2, 0], sizes = [8, 32, 128], strides = [1, 1, 1]} : vector<8x36x128xf32> to vector<8x32x128xf32>
    %105 = vector.extract_strided_slice %72 {offsets = [2, 0], sizes = [1, 128], strides = [1, 1]} : vector<5x128xf32> to vector<1x128xf32>
    %106 = vector.shape_cast %105 : vector<1x128xf32> to vector<128xf32>
    %107 = vector.shape_cast %106 : vector<128xf32> to vector<1x1x128xf32>
    %108 = vector.broadcast %107 : vector<1x1x128xf32> to vector<8x32x128xf32>
    %109 = arith.mulf %104, %108 : vector<8x32x128xf32>
    %110 = arith.addf %103, %109 : vector<8x32x128xf32>
    %111 = vector.extract_strided_slice %82 {offsets = [0, 3, 0], sizes = [8, 32, 128], strides = [1, 1, 1]} : vector<8x36x128xf32> to vector<8x32x128xf32>
    %112 = vector.extract_strided_slice %72 {offsets = [3, 0], sizes = [1, 128], strides = [1, 1]} : vector<5x128xf32> to vector<1x128xf32>
    %113 = vector.shape_cast %112 : vector<1x128xf32> to vector<128xf32>
    %114 = vector.shape_cast %113 : vector<128xf32> to vector<1x1x128xf32>
    %115 = vector.broadcast %114 : vector<1x1x128xf32> to vector<8x32x128xf32>
    %116 = arith.mulf %111, %115 : vector<8x32x128xf32>
    %117 = arith.addf %110, %116 : vector<8x32x128xf32>
    %118 = vector.shape_cast %117 : vector<8x32x128xf32> to vector<256x128xf32>
    %119 = arith.addf %64, %118 : vector<256x128xf32>
    %c2 = arith.constant 2 : index
    %c0_39 = arith.constant 0 : index
    %c0_40 = arith.constant 0 : index
    %120 = vector.load %arg4[%c2, %c0_39, %c0_40] : memref<3x128x128xbf16, #tpu.memory_space<vmem>>, vector<1x128x128xbf16>
    %121 = vector.shape_cast %120 : vector<1x128x128xbf16> to vector<128x128xbf16>
    %c2_41 = arith.constant 2 : index
    %c0_42 = arith.constant 0 : index
    %c0_43 = arith.constant 0 : index
    %122 = vector.load %arg5[%c2_41, %c0_42, %c0_43] : memref<3x1x128xf32, #tpu.memory_space<vmem>>, vector<1x1x128xf32>
    %123 = vector.shape_cast %122 : vector<1x1x128xf32> to vector<1x128xf32>
    %c2_44 = arith.constant 2 : index
    %c0_45 = arith.constant 0 : index
    %c0_46 = arith.constant 0 : index
    %124 = vector.load %arg6[%c2_44, %c0_45, %c0_46] : memref<3x128x128xbf16, #tpu.memory_space<vmem>>, vector<1x128x128xbf16>
    %125 = vector.shape_cast %124 : vector<1x128x128xbf16> to vector<128x128xbf16>
    %c2_47 = arith.constant 2 : index
    %c0_48 = arith.constant 0 : index
    %c0_49 = arith.constant 0 : index
    %126 = vector.load %arg7[%c2_47, %c0_48, %c0_49] : memref<3x5x128xf32, #tpu.memory_space<vmem>>, vector<1x5x128xf32>
    %127 = vector.shape_cast %126 : vector<1x5x128xf32> to vector<5x128xf32>
    %128 = arith.truncf %119 : vector<256x128xf32> to vector<256x128xbf16>
    %cst_50 = arith.constant dense<0.000000e+00> : vector<256x128xf32>
    %129 = tpu.matmul %128, %121, %cst_50 {dimension_numbers = #tpu.dot_dimension_numbers<[1], [0], [0], [1], [0, 0, 1, 1], [], []>} : vector<256x128xbf16>, vector<128x128xbf16>, vector<256x128xf32> -> vector<256x128xf32>
    %130 = vector.broadcast %123 : vector<1x128xf32> to vector<256x128xf32>
    %131 = arith.addf %129, %130 : vector<256x128xf32>
    %cst_51 = arith.constant 0.000000e+00 : f32
    %132 = vector.broadcast %cst_51 : f32 to vector<256x128xf32>
    %133 = arith.maximumf %131, %132 : vector<256x128xf32>
    %134 = arith.truncf %133 : vector<256x128xf32> to vector<256x128xbf16>
    %cst_52 = arith.constant dense<0.000000e+00> : vector<256x128xf32>
    %135 = tpu.matmul %134, %125, %cst_52 {dimension_numbers = #tpu.dot_dimension_numbers<[1], [0], [0], [1], [0, 0, 1, 1], [], []>} : vector<256x128xbf16>, vector<128x128xbf16>, vector<256x128xf32> -> vector<256x128xf32>
    %136 = vector.shape_cast %135 : vector<256x128xf32> to vector<8x32x128xf32>
    %137 = tpu.concatenate %9, %136 in 1 : vector<8x4x128xf32>, vector<8x32x128xf32> -> vector<8x36x128xf32>
    %138 = vector.extract_strided_slice %127 {offsets = [4, 0], sizes = [1, 128], strides = [1, 1]} : vector<5x128xf32> to vector<1x128xf32>
    %139 = vector.shape_cast %138 : vector<1x128xf32> to vector<128xf32>
    %cst_53 = arith.constant 1.000000e+00 : f32
    %140 = vector.broadcast %cst_53 : f32 to vector<128xf32>
    %141 = arith.addf %140, %139 : vector<128xf32>
    %142 = vector.shape_cast %141 : vector<128xf32> to vector<1x1x128xf32>
    %143 = vector.broadcast %142 : vector<1x1x128xf32> to vector<8x32x128xf32>
    %144 = arith.mulf %136, %143 : vector<8x32x128xf32>
    %145 = vector.extract_strided_slice %137 {offsets = [0, 0, 0], sizes = [8, 32, 128], strides = [1, 1, 1]} : vector<8x36x128xf32> to vector<8x32x128xf32>
    %146 = vector.extract_strided_slice %127 {offsets = [0, 0], sizes = [1, 128], strides = [1, 1]} : vector<5x128xf32> to vector<1x128xf32>
    %147 = vector.shape_cast %146 : vector<1x128xf32> to vector<128xf32>
    %148 = vector.shape_cast %147 : vector<128xf32> to vector<1x1x128xf32>
    %149 = vector.broadcast %148 : vector<1x1x128xf32> to vector<8x32x128xf32>
    %150 = arith.mulf %145, %149 : vector<8x32x128xf32>
    %151 = arith.addf %144, %150 : vector<8x32x128xf32>
    %152 = vector.extract_strided_slice %137 {offsets = [0, 1, 0], sizes = [8, 32, 128], strides = [1, 1, 1]} : vector<8x36x128xf32> to vector<8x32x128xf32>
    %153 = vector.extract_strided_slice %127 {offsets = [1, 0], sizes = [1, 128], strides = [1, 1]} : vector<5x128xf32> to vector<1x128xf32>
    %154 = vector.shape_cast %153 : vector<1x128xf32> to vector<128xf32>
    %155 = vector.shape_cast %154 : vector<128xf32> to vector<1x1x128xf32>
    %156 = vector.broadcast %155 : vector<1x1x128xf32> to vector<8x32x128xf32>
    %157 = arith.mulf %152, %156 : vector<8x32x128xf32>
    %158 = arith.addf %151, %157 : vector<8x32x128xf32>
    %159 = vector.extract_strided_slice %137 {offsets = [0, 2, 0], sizes = [8, 32, 128], strides = [1, 1, 1]} : vector<8x36x128xf32> to vector<8x32x128xf32>
    %160 = vector.extract_strided_slice %127 {offsets = [2, 0], sizes = [1, 128], strides = [1, 1]} : vector<5x128xf32> to vector<1x128xf32>
    %161 = vector.shape_cast %160 : vector<1x128xf32> to vector<128xf32>
    %162 = vector.shape_cast %161 : vector<128xf32> to vector<1x1x128xf32>
    %163 = vector.broadcast %162 : vector<1x1x128xf32> to vector<8x32x128xf32>
    %164 = arith.mulf %159, %163 : vector<8x32x128xf32>
    %165 = arith.addf %158, %164 : vector<8x32x128xf32>
    %166 = vector.extract_strided_slice %137 {offsets = [0, 3, 0], sizes = [8, 32, 128], strides = [1, 1, 1]} : vector<8x36x128xf32> to vector<8x32x128xf32>
    %167 = vector.extract_strided_slice %127 {offsets = [3, 0], sizes = [1, 128], strides = [1, 1]} : vector<5x128xf32> to vector<1x128xf32>
    %168 = vector.shape_cast %167 : vector<1x128xf32> to vector<128xf32>
    %169 = vector.shape_cast %168 : vector<128xf32> to vector<1x1x128xf32>
    %170 = vector.broadcast %169 : vector<1x1x128xf32> to vector<8x32x128xf32>
    %171 = arith.mulf %166, %170 : vector<8x32x128xf32>
    %172 = arith.addf %165, %171 : vector<8x32x128xf32>
    %173 = vector.shape_cast %172 : vector<8x32x128xf32> to vector<256x128xf32>
    %174 = arith.addf %119, %173 : vector<256x128xf32>
    %175 = arith.truncf %174 : vector<256x128xf32> to vector<256x128xbf16>
    %c0_54 = arith.constant 0 : index
    %c0_55 = arith.constant 0 : index
    %176 = vector.load %arg8[%c0_54, %c0_55] : memref<128x128xbf16, #tpu.memory_space<vmem>>, vector<128x128xbf16>
    %cst_56 = arith.constant dense<0.000000e+00> : vector<256x128xf32>
    %177 = tpu.matmul %175, %176, %cst_56 {dimension_numbers = #tpu.dot_dimension_numbers<[1], [0], [0], [1], [0, 0, 1, 1], [], []>} : vector<256x128xbf16>, vector<128x128xbf16>, vector<256x128xf32> -> vector<256x128xf32>
    %c0_57 = arith.constant 0 : index
    %c0_58 = arith.constant 0 : index
    %178 = vector.load %arg9[%c0_57, %c0_58] : memref<1x128xf32, #tpu.memory_space<vmem>>, vector<1x128xf32>
    %179 = vector.broadcast %178 : vector<1x128xf32> to vector<256x128xf32>
    %180 = arith.addf %177, %179 : vector<256x128xf32>
    %181 = arith.negf %180 : vector<256x128xf32>
    %182 = math.exp %181 : vector<256x128xf32>
    %cst_59 = arith.constant 1.000000e+00 : f32
    %183 = vector.broadcast %cst_59 : f32 to vector<256x128xf32>
    %184 = arith.addf %183, %182 : vector<256x128xf32>
    %185 = arith.divf %183, %184 : vector<256x128xf32>
    %186 = vector.shape_cast %185 : vector<256x128xf32> to vector<8x32x128xf32>
    %c0_60 = arith.constant 0 : index
    %c0_61 = arith.constant 0 : index
    %c0_62 = arith.constant 0 : index
    %187 = vector.load %arg10[%c0_60, %c0_61, %c0_62] : memref<8x32x128xf32, #tpu.memory_space<vmem>>, vector<8x32x128xf32>
    tpu.vector_store %arg10[%c0_60, %c0_61, %c0_62], %186 {strides = array<i32>} : memref<8x32x128xf32, #tpu.memory_space<vmem>>, vector<8x32x128xf32>,
    return
  }
  func.func @transform_0(%arg0: i32) -> (i32, i32, i32) {
    %c0_i32 = arith.constant 0 : i32
    %c0_i32_0 = arith.constant 0 : i32
    %c0_i32_1 = arith.constant 0 : i32
    return %arg0, %c0_i32, %c0_i32_0 : i32, i32, i32
  }
  func.func @transform_1(%arg0: i32) -> (i32, i32) {
    %c0_i32 = arith.constant 0 : i32
    %c0_i32_0 = arith.constant 0 : i32
    %c0_i32_1 = arith.constant 0 : i32
    return %c0_i32, %c0_i32_0 : i32, i32
  }
  func.func @transform_2(%arg0: i32) -> (i32, i32) {
    %c0_i32 = arith.constant 0 : i32
    %c0_i32_0 = arith.constant 0 : i32
    %c0_i32_1 = arith.constant 0 : i32
    return %c0_i32, %c0_i32_0 : i32, i32
  }
  func.func @transform_3(%arg0: i32) -> (i32, i32, i32) {
    %c0_i32 = arith.constant 0 : i32
    %c0_i32_0 = arith.constant 0 : i32
    %c0_i32_1 = arith.constant 0 : i32
    %c0_i32_2 = arith.constant 0 : i32
    return %c0_i32, %c0_i32_0, %c0_i32_1 : i32, i32, i32
  }
  func.func @transform_4(%arg0: i32) -> (i32, i32, i32) {
    %c0_i32 = arith.constant 0 : i32
    %c0_i32_0 = arith.constant 0 : i32
    %c0_i32_1 = arith.constant 0 : i32
    %c0_i32_2 = arith.constant 0 : i32
    return %c0_i32, %c0_i32_0, %c0_i32_1 : i32, i32, i32
  }
  func.func @transform_5(%arg0: i32) -> (i32, i32, i32) {
    %c0_i32 = arith.constant 0 : i32
    %c0_i32_0 = arith.constant 0 : i32
    %c0_i32_1 = arith.constant 0 : i32
    %c0_i32_2 = arith.constant 0 : i32
    return %c0_i32, %c0_i32_0, %c0_i32_1 : i32, i32, i32
  }
  func.func @transform_6(%arg0: i32) -> (i32, i32, i32) {
    %c0_i32 = arith.constant 0 : i32
    %c0_i32_0 = arith.constant 0 : i32
    %c0_i32_1 = arith.constant 0 : i32
    %c0_i32_2 = arith.constant 0 : i32
    return %c0_i32, %c0_i32_0, %c0_i32_1 : i32, i32, i32
  }
  func.func @transform_7(%arg0: i32) -> (i32, i32) {
    %c0_i32 = arith.constant 0 : i32
    %c0_i32_0 = arith.constant 0 : i32
    %c0_i32_1 = arith.constant 0 : i32
    return %c0_i32, %c0_i32_0 : i32, i32
  }
  func.func @transform_8(%arg0: i32) -> (i32, i32) {
    %c0_i32 = arith.constant 0 : i32
    %c0_i32_0 = arith.constant 0 : i32
    %c0_i32_1 = arith.constant 0 : i32
    return %c0_i32, %c0_i32_0 : i32, i32
  }
  func.func @transform_9(%arg0: i32) -> (i32, i32, i32) {
    %c0_i32 = arith.constant 0 : i32
    %c0_i32_0 = arith.constant 0 : i32
    %c0_i32_1 = arith.constant 0 : i32
    return %arg0, %c0_i32, %c0_i32_0 : i32, i32, i32
  }
}

</mosaic_0001>

<bundles_post_ra>
// kernel: tpu_custom_call.1
= control target key start
LH: loop header
LB: loop body
LE: loop exit
PB: predicated region body
PF: predicated region fallthrough
CT: control target
= control target key end

     0   :  { %s10387_s0 = inlined_call_operand.hbm [shape: bf16[16,32,64], index: 0, kind: input, shape index: {}]   ;;  %s10388_s1 = inlined_call_operand.vmem [shape: bf16[64,128], index: 1, kind: input, shape index: {}]   ;;  %s10389_s2 = inlined_call_operand.vmem [shape: f32[1,128], index: 2, kind: input, shape index: {}]   ;;  %s10390_s3 = inlined_call_operand.hbm [shape: bf16[3,128,128], index: 3, kind: input, shape index: {}]   ;;  %s10391_s4 = inlined_call_operand.vmem [shape: f32[3,1,128], index: 4, kind: input, shape index: {}]   ;;  %s10392_s5 = inlined_call_operand.hbm [shape: bf16[3,128,128], index: 5, kind: input, shape index: {}]   ;;  %s10393_s6 = inlined_call_operand.vmem [shape: f32[3,5,128], index: 6, kind: input, shape index: {}]   ;;  %s10394_s7 = inlined_call_operand.hbm [shape: bf16[128,128], index: 7, kind: input, shape index: {}]   ;;  %s10395_s8 = inlined_call_operand.vmem [shape: f32[1,128], index: 8, kind: input, shape index: {}]   ;;  %s10396_s9 = inlined_call_operand.hbm [shape: f32[16,32,128], index: 9, kind: output, shape index: {}]  }
   0x1   :  { %10588 = sst [smem:[#allocation64_spill]] %s10390_s3 }
   0x2   :  { %10589 = sst [smem:[#allocation65_spill]] %s10392_s5 }
   0x3   :  { %10590 = sst [smem:[#allocation66_spill]] %s10394_s7 }
   0x4   :  { %14 = vsyncpa [#allocation3], 0 }
   0x5   :  { %16 = vsyncpa [#allocation3 + $0x1], 0 }
   0x6   :  { %17 = vsyncpa [#allocation6], 0 }
   0x7   :  { %18 = vsyncpa [#allocation9], 0 }
   0x8   :  { %19 = vsyncpa [#allocation4], 0 }
   0x9   :  { %21 = vsyncpa [#allocation4 + $0x1], 0  ;;  %s7021_s30 = smov 0   ;;  %s7023_s10 = smov 0  }
   0xa   :  { %s7025_s11 = smov 0   ;;  %s7027_s12 = smov 0  }
   0xb LB: > { %s7042_s13 = sadd.s32 4294967295, %s6960_s12   ;;  %s5758_s14 = sadd.s32 4294967294, %s6960_s12   ;;  %s6960_s12 = sphi %s7027_s12, %s11073_s12   ;;  %s6956_s11 = sphi %s7025_s11, %s11072_s11   ;;  %s6952_s10 = sphi %s7023_s10, %s11071_s10   ;;  %s6948_s30 = sphi %s7021_s30, %s11070_s30  }
   0xc   : > { %p47_p0 = scmp.ne.s32.totalorder %s6952_s10, %s6948_s30  ;;  %p10397_p1 = scmp.eq.s32.totalorder %s7042_s13, 0 }
   0xd   : > { %p239_p2 = scmp.eq.s32.totalorder %s7042_s13, 1  ;;  %p245_p3 = scmp.eq.s32.totalorder %s5758_s14, 1 }
   0xe   : > { %p7051_p4 = por %p10397_p1, %p47_p0  ;;  %p5759_p5 = scmp.ge.s32.totalorder %s6960_s12, 1 }
   0xf   : > { %p7056_p6 = por %p245_p3, %p47_p0  ;;  %p252_p7 = scmp.lt.s32.totalorder %s6960_s12, 3 }
  0x10   : > { %s10591_s15 = scalar_select %p7051_p4, 1, 0 }
  0x11   : > { %s10592_s16 = scalar_select %p7056_p6, 1, 0 }
  0x12   : > { %p7061_p8 = pnand %p5759_p5, %p252_p7  ;;  %s6962_s18 = smov [#allocation5]  }
  0x13   : > { %s270_s19 = sshll.u32 %s6962_s18, 4  ;;  %s6963_s21 = smov [#allocation7]   ;;  %s271_s19 = int_to_ptr.vmem [resolvable:$true] %s270_s19 }
  0x14   : > { %s10593_s17 = scalar_select %p7061_p8, 1, 0 }
  0x15   : > { %p6513_p9 = pneg %p7061_p8  ;;  %s286_s22 = sshll.u32 %s6963_s21, 4  ;;  %s287_s22 = int_to_ptr.vmem [resolvable:$true] %s286_s22 }
  0x16   : > { %s6964_s23 = smov [#allocation8]   ;;  %s6793_s25 = scalar_lea.vmem %s271_s19, 3072 }
  0x17   : > { %p7070_p11 = pnand %p6513_p9, %p10397_p1  ;;  %s302_s24 = sshll.u32 %s6964_s23, 4  ;;  %s303_s24 = int_to_ptr.vmem [resolvable:$true] %s302_s24 }
  0x18   : > { %p6794_p13 = scmp.ne.s32.totalorder %s271_s19, %s6793_s25  ;;  %p6801_p5 = scmp.lt.s32.totalorder %s271_s19, %s271_s19 }
  0x19   : > { %p6784_p12 = pneg %p7070_p11  ;;  %p6802_p7 = scmp.lt.s32.totalorder %s6793_s25, %s6793_s25 }
  0x1b   : > { %p6796_p0 = pnand %p6794_p13, %p6784_p12  ;;  %p6803_p9 = por %p6802_p7, %p6801_p5 }
  0x1d   : > { %p6797_p3 = pneg %p6796_p0 }
  0x1f   : > { %p6804_p10 = pnand %p6803_p9, %p6797_p3 }
  0x21   : > { %6807 = shalt.err (!%p6804_p10)
}
  0x22   : > { %s10398_s26 = smov 64   ;;  %s10399_s27 = smov 4  }
  0x23   : > { %s10595_s3 = sld [smem:[#allocation64_spill]]  ;;  %s6819_s14 = scalar_lea.vmem %s287_s22, 3072 }
  0x24   : > { %p6820_p13 = scmp.ne.s32.totalorder %s287_s22, %s6819_s14  ;;  %p6827_p3 = scmp.lt.s32.totalorder %s287_s22, %s287_s22 }
  0x25   : > { %p6828_p10 = scmp.lt.s32.totalorder %s6819_s14, %s6819_s14 }
  0x26   : > { %p6822_p0 = pnand %p6820_p13, %p6784_p12 }
  0x27   : > { %p6829_p7 = por %p6828_p10, %p6827_p3 }
  0x28   : > { %p6823_p5 = pneg %p6822_p0 }
  0x29   : > { %6516 = dma.hbm_to_vmem [thread:$0]  (!%p7070_p11), %s10595_s3, 3072, %s271_s19, [#allocation6], %s10398_s26, %s10398_s26, %s10399_s27  }
  0x2a   : > { %p6830_p9 = pnand %p6829_p7, %p6823_p5 }
  0x2c   : > { %6833 = shalt.err (!%p6830_p9)
}
  0x2d   : > { %s10596_s5 = sld [smem:[#allocation65_spill]]  ;;  %s6845_s19 = scalar_lea.vmem %s303_s24, 1024 }
  0x2e   : > { %p6846_p1 = scmp.ne.s32.totalorder %s303_s24, %s6845_s19  ;;  %p6853_p3 = scmp.lt.s32.totalorder %s303_s24, %s303_s24 }
  0x2f   : > { %p6854_p5 = scmp.lt.s32.totalorder %s6845_s19, %s6845_s19 }
  0x30   : > { %p6848_p13 = pnand %p6846_p1, %p6784_p12 }
  0x31   : > { %p6855_p10 = por %p6854_p5, %p6853_p3 }
  0x32   : > { %p6849_p0 = pneg %p6848_p13 }
  0x33   : > { %6519 = dma.hbm_to_vmem [thread:$0]  (!%p7070_p11), %s10596_s5, 3072, %s287_s22, [#allocation6], %s10398_s26, %s10398_s26, %s10399_s27  }
  0x34   : > { %p6856_p7 = pnand %p6855_p10, %p6849_p0 }
  0x36   : > { %6859 = shalt.err (!%p6856_p7)
}
  0x37   : > { %s10597_s7 = sld [smem:[#allocation66_spill]]  ;;  %s7110_s22 = sadd.s32 1, %s6960_s12  }
  0x38   : > { %s31_s20 = ssub.s32 %s6960_s12, %s7110_s22  ;;  %s34_s28 = sadd.s32 1, %s6956_s11 }
  0x39   : > { %p32_p1 = scmp.eq.s32.totalorder %s31_s20, 0  ;;  %p41_p12 = scmp.ne.s32.totalorder %s6956_s11, %s6952_s10 }
  0x3a   : > { %p42_p9 = scmp.eq.s32.totalorder %s6960_s12, 0  ;;  %p6534_p13 = scmp.lt.s32.totalorder %s6960_s12, 2 }
  0x3b   : > { %s7120_s29 = scalar_select %p32_p1, %s6956_s11, %s34_s28  }
  0x3c   : > { %p43_p0 = por %p42_p9, %p41_p12  ;;  %p7124_p3 = por %p239_p2, %p41_p12 }
  0x3d   : > { %6522 = dma.hbm_to_vmem [thread:$0]  (!%p7070_p11), %s10597_s7, 1024, %s303_s24, [#allocation9], %s10398_s26, %s10398_s26, %s10399_s27  }
  0x3e   : > { %s10598_s14 = scalar_select %p7124_p3, 1, 0 }
  0x3f   : > { %s319_s18 = sand.u32 1, %s6956_s11   ;;  %s5914_s21 = sshll.u32 %s6960_s12, 11 }
  0x40   : > { %s5764_s24 = sshll.u32 %s319_s18, 7  ;;  %s7133_s25 = scalar_lea.hbm %s10387_s0, %s5914_s21 }
  0x41   : > { %s323_s20 = scalar_lea.vmem [#allocation2], %s5764_s24  ;;  %p7135_p11 = pnand %p6534_p13, %p43_p0 }
  0x42   : > { %s331_s28 = sshll.u32 %s323_s20, 4  ;;  %s7141_s27 = scalar_lea.sflag [#allocation3], %s319_s18  ;;  %s7139_s28 = int_to_ptr.vmem [resolvable:$true] %s331_s28 }
  0x43   : > { %s6860_s3 = scalar_lea.hbm %s7133_s25, 2048  ;;  %p6862_p5 = pneg %p7135_p11 }
  0x44   : > { %p6861_p2 = scmp.ne.s32.totalorder %s7133_s25, %s6860_s3  ;;  %s6865_s24 = scalar_lea.hbm %s10387_s0, 4096 }
  0x45   : > { %p6866_p1 = scmp.lt.s32.totalorder %s7133_s25, %s10387_s0  ;;  %p6867_p12 = scmp.lt.s32.totalorder %s6865_s24, %s6860_s3 }
  0x46   : > { %p6863_p10 = pnand %p6862_p5, %p6861_p2 }
  0x47   : > { %p6868_p9 = por %p6867_p12, %p6866_p1 }
  0x48   : > { %p6864_p7 = pneg %p6863_p10 }
  0x4a   : > { %p6869_p13 = pnand %p6868_p9, %p6864_p7 }
  0x4c   : > { %6872 = shalt.err (!%p6869_p13)
}
  0x4d   : > { %s6873_s18 = scalar_lea.vmem %s7139_s28, 2048  ;;  %s6967_s5 = smov [#allocation2]  }
  0x4e   : > { %p6874_p0 = scmp.ne.s32.totalorder %s7139_s28, %s6873_s18  ;;  %s6878_s7 = sshll.u32 %s6967_s5, 4  ;;  %s6879_s7 = int_to_ptr.vmem [resolvable:$false] %s6878_s7 }
  0x4f   : > { %s6880_s21 = scalar_lea.vmem %s6879_s7, 4096  ;;  %p6881_p10 = scmp.lt.s32.totalorder %s7139_s28, %s6879_s7 }
  0x50   : > { %p6876_p6 = pnand %p6874_p0, %p6862_p5  ;;  %p6882_p3 = scmp.lt.s32.totalorder %s6880_s21, %s6873_s18 }
  0x52   : > { %p6877_p2 = pneg %p6876_p6  ;;  %p6883_p4 = por %p6882_p3, %p6881_p10 }
  0x54   : > { %p6884_p8 = pnand %p6883_p4, %p6877_p2 }
  0x56   : > { %6887 = shalt.err (!%p6884_p8)
}
  0x57   : > { %s10600_s3 = smov 4   ;;  %s10601_s19 = smov 64  }
  0x58   : > { %6526 = dma.hbm_to_vmem [thread:$0]  (!%p7135_p11), %s7133_s25, 2048, %s7139_s28, %s7141_s27, %s10601_s19, %s10601_s19, %s10600_s3  }
  0x59   : > { %p10602_p6 = scmp.ne.s32.totalorder %s10593_s17, 0 }
  0x5b   : > { %343 = sbr.rel (%p10602_p6) target bundleno = 2099 (0x833), region = 56 }
  0x60   : > { %s7168_s5 = sand.u32 1, %s6952_s10   ;;  %p10603_p4 = scmp.ne.s32.totalorder %s10591_s15, 0 }
  0x61   : > { %s5769_s7 = sshll.u32 %s7168_s5, 7  ;;  %s346_s24 = scalar_lea.sflag [#allocation3], %s7168_s5 }
  0x62   : > { %s7172_s23 = scalar_lea.vmem [#allocation2], %s5769_s7 }
  0x63   : > { %6931 = dma.done.wait (%p10603_p4), %s346_s24, 2048  }
  0x64   : > { %6933 = vsyncadd (%p10603_p4), %s346_s24, 4294965248  ;;  %p10604_p8 = scmp.eq.s32.totalorder %s7042_s13, 0 }
  0x66   : > { %6935 = dma.done.wait (%p10604_p8), [#allocation6], 6144   ;;  %p10605_p3 = pmov %p10604_p8 }
  0x68   : > { %6937 = vsyncadd (%p10605_p3), [#allocation6], 4294961152  ;;  %p10606_p11 = pmov %p10605_p3 }
  0x69   : > { %p10607_p5 = pmov %p10605_p3 }
  0x6a   : > { %6939 = dma.done.wait (%p10606_p11), [#allocation9], 1024  }
  0x6b   : > { %6941 = vsyncadd (%p10607_p5), [#allocation9], 4294966272  ;;  %v6578_v0 = vld [vmem:[%s10388_s1 + $0x18] sm:$0xff]   ;;  %v6579_v1 = vld [vmem:[%s10388_s1 + $0x10] sm:$0xff]   ;;  %vm550_vm0 = vcmask 523264   ;;  %vm1346_vm1 = vcmask 1043456  }
  0x6c   : > { %6105 = vmatprep.subr.bf16.mxu0 %v6578_v0  ;;  %v6580_v2 = vld [vmem:[%s10388_s1 + $0x8] sm:$0xff]   ;;  %v6582_v3 = vld [vmem:[%s7172_s23] sm:$0xff]   ;;  %v6584_v6 = vld [vmem:[%s7172_s23 + $0x10] sm:$0xff]   ;;  %vm1640_vm2 = vcmask 1046528   ;;  %vm1861_vm3 = vcmask 1045504   ;;  %vm2082_vm4 = vcmask 1044480  }
  0x6d   : > { %6106 = vmatpush3.bf16.msra.mxu0 %v6578_v0  ;;  %6113 = vmatprep.mubr.msk.bf16.mxu0 %vm550_vm0, %v6582_v3  ;;  %v6581_v4 = vld [vmem:[%s10388_s1] sm:$0xff]   ;;  %v6583_v5 = vld [vmem:[%s7172_s23 + $0x8] sm:$0xff]   ;;  %v6598_v7 = vld [vmem:[#allocation5 + $0x38] sm:$0xff]   ;;  %s5773_s19 = sshll.u32 %s7168_s5, 8  ;;  %s5916_s24 = sshll.u32 %s7042_s13, 12 }
  0x6e   : > { %6107 = vmatprep.subr.bf16.mxu0 %v6579_v1  ;;  %v6599_v8 = vld [vmem:[#allocation5 + $0x30] sm:$0xff]   ;;  %v6585_v9 = vld [vmem:[%s7172_s23 + $0x18] sm:$0xff]   ;;  %6145 = vmatprep.subr.bf16.mxu1 %v6598_v7  ;;  %v6586_v10 = vld [vmem:[%s7172_s23 + $0x20] sm:$0xff]   ;;  %s10276_s7 = scalar_lea.vmem [#allocation10], %s5773_s19  ;;  %s10340_s15 = scalar_lea.hbm %s10396_s9, %s5916_s24 }
  0x6f   : > { %6146 = vmatpush3.bf16.msra.mxu1 %v6598_v7  ;;  %v6600_v11 = vld [vmem:[#allocation5 + $0x28] sm:$0xff]   ;;  %v6601_v12 = vld [vmem:[#allocation5 + $0x20] sm:$0xff]   ;;  %v6588_v14 = vld [vmem:[%s7172_s23 + $0x30] sm:$0xff]   ;;  %s5642_s27 = scalar_lea.sflag [#allocation4], %s7168_s5  ;;  %p11067_p1 = scmp.ne.s32.totalorder %s10598_s14, 0 }
  0x70   : > { %6147 = vmatprep.subr.bf16.mxu1 %v6599_v8  ;;  %v6587_v13 = vld [vmem:[%s7172_s23 + $0x28] sm:$0xff]   ;;  %v6602_v15 = vld [vmem:[#allocation5 + $0x18] sm:$0xff]   ;;  %v6590_v17 = vld [vmem:[%s7172_s23 + $0x40] sm:$0xff]   ;;  %s6968_s13 = smov [#allocation10]  }
  0x71   : > { %6108 = vmatpush3.bf16.msra.mxu0 %v6579_v1  ;;  %v6589_v16 = vld [vmem:[%s7172_s23 + $0x38] sm:$0xff]   ;;  %v6591_v18 = vld [vmem:[%s7172_s23 + $0x48] sm:$0xff]   ;;  %v6592_v19 = vld [vmem:[%s7172_s23 + $0x50] sm:$0xff]   ;;  %s6892_s28 = sshll.u32 %s6968_s13, 4  ;;  %s6893_s28 = int_to_ptr.vmem [resolvable:$false] %s6892_s28 }
  0x72   : > { %6109 = vmatprep.subr.bf16.mxu0 %v6580_v2  ;;  %v6593_v20 = vld [vmem:[%s7172_s23 + $0x58] sm:$0xff]   ;;  %v6594_v21 = vld [vmem:[%s7172_s23 + $0x60] sm:$0xff]   ;;  %v6595_v22 = vld [vmem:[%s7172_s23 + $0x68] sm:$0xff]   ;;  %s6894_s20 = scalar_lea.vmem %s6893_s28, 8192 }
  0x73   : > { %6148 = vmatpush3.bf16.msra.mxu1 %v6599_v8  ;;  %v6596_v23 = vld [vmem:[%s7172_s23 + $0x70] sm:$0xff]   ;;  %v6597_v24 = vld [vmem:[%s7172_s23 + $0x78] sm:$0xff]   ;;  %v6604_v26 = vld [vmem:[#allocation5 + $0x8] sm:$0xff]   ;;  %s5656_s23 = sshll.u32 %s10276_s7, 4  ;;  %s10342_s23 = int_to_ptr.vmem [resolvable:$true] %s5656_s23 }
  0x74   : > { %6149 = vmatprep.subr.bf16.mxu1 %v6600_v11  ;;  %v6603_v25 = vld [vmem:[#allocation5 + $0x10] sm:$0xff]   ;;  %v6605_v27 = vld [vmem:[#allocation5] sm:$0xff]   ;;  %v6606_v28 = vld [vmem:[#allocation7 + $0x38] sm:$0xff]   ;;  %s6888_s25 = scalar_lea.vmem %s10342_s23, 4096  ;;  %p6895_p13 = scmp.lt.s32.totalorder %s10342_s23, %s6893_s28 }
  0x75   : > { %6110 = vmatpush3.bf16.msra.mxu0 %v6580_v2  ;;  %v6607_v29 = vld [vmem:[#allocation7 + $0x30] sm:$0xff]   ;;  %v6608_v30 = vld [vmem:[#allocation7 + $0x28] sm:$0xff]   ;;  %v6609_v31 = vld [vmem:[#allocation7 + $0x20] sm:$0xff]   ;;  %p6889_p7 = scmp.ne.s32.totalorder %s10342_s23, %s6888_s25  ;;  %p6896_p0 = scmp.lt.s32.totalorder %s6894_s20, %s6888_s25 }
  0x76   : > { %6111 = vmatprep.subr.bf16.mxu0 %v6581_v4  ;;  %v6610_v32 = vld [vmem:[#allocation7 + $0x18] sm:$0xff]   ;;  %v6611_v33 = vld [vmem:[#allocation7 + $0x10] sm:$0xff]   ;;  %v6612_v34 = vld [vmem:[#allocation7 + $0x8] sm:$0xff]  }
  0x77   : > { %6150 = vmatpush3.bf16.msra.mxu1 %v6600_v11  ;;  %v7233_v37 = vld [vmem:[%s10389_s2] ss:$0 sm:$0xff]  ;;  %p6890_p12 = pnand %p6889_p7, %p11067_p1  ;;  %p6897_p2 = por %p6896_p0, %p6895_p13 }
  0x78   : > { %6151 = vmatprep.subr.bf16.mxu1 %v6601_v12 }
  0x79   : > { %6112 = vmatpush3.bf16.msra.mxu0 %v6581_v4  ;;  %p6891_p9 = pneg %p6890_p12 }
  0x7a   : > { %6193 = vmatprep.subr.bf16.mxu0 %v6606_v28 }
  0x7b   : > { %6152 = vmatpush3.bf16.msra.mxu1 %v6601_v12  ;;  %p6898_p10 = pnand %p6897_p2, %p6891_p9 }
  0x7c   : > { %6114 = vmatmul.mubr.msk.bf16.vlgmr.msra.gmra.mxu0 %vm550_vm0, %v6583_v5  ;;  %6153 = vmatprep.subr.bf16.mxu1 %v6602_v15 }
  0x7d   : > { %6117 = vmatprep.mubr.msk.bf16.mxu0 %vm550_vm0, %v6584_v6  ;;  %6194 = vmatpush3.bf16.msra.mxu0 %v6606_v28 }
  0x7e   : > { %6195 = vmatprep.subr.bf16.mxu0 %v6607_v29 }
  0x7f   : > { %6154 = vmatpush3.bf16.msra.mxu1 %v6602_v15 }
  0x80   : > { %6155 = vmatprep.subr.bf16.mxu1 %v6603_v25 }
  0x81   : > { %6196 = vmatpush3.bf16.msra.mxu0 %v6607_v29 }
  0x82   : > { %6197 = vmatprep.subr.bf16.mxu0 %v6608_v30 }
  0x83   : > { %6156 = vmatpush3.bf16.msra.mxu1 %v6603_v25 }
  0x84   : > { %6118 = vmatmul.mubr.msk.bf16.gmra.mxu0 %vm550_vm0, %v6585_v9  ;;  %6157 = vmatprep.subr.bf16.mxu1 %v6604_v26 }
  0x85   : > { %6121 = vmatprep.mubr.msk.bf16.mxu0 %vm550_vm0, %v6586_v10  ;;  %6198 = vmatpush3.bf16.msra.mxu0 %v6608_v30 }
  0x86   : > { %6199 = vmatprep.subr.bf16.mxu0 %v6609_v31 }
  0x87   : > { %6158 = vmatpush3.bf16.msra.mxu1 %v6604_v26 }
  0x88   : > { %6159 = vmatprep.subr.bf16.mxu1 %v6605_v27 }
  0x89   : > { %6200 = vmatpush3.bf16.msra.mxu0 %v6609_v31 }
  0x8a   : > { %6201 = vmatprep.subr.bf16.mxu0 %v6610_v32 }
  0x8b   : > { %6160 = vmatpush3.bf16.msra.mxu1 %v6605_v27 }
  0x8c   : > { %6122 = vmatmul.mubr.msk.bf16.gmra.mxu0 %vm550_vm0, %v6587_v13 }
  0x8d   : > { %6125 = vmatprep.mubr.msk.bf16.mxu0 %vm550_vm0, %v6588_v14  ;;  %6202 = vmatpush3.bf16.msra.mxu0 %v6610_v32 }
  0x8e   : > { %6203 = vmatprep.subr.bf16.mxu0 %v6611_v33 }
  0x91   : > { %6204 = vmatpush3.bf16.msra.mxu0 %v6611_v33 }
  0x92   : > { %6205 = vmatprep.subr.bf16.mxu0 %v6612_v34 }
  0x94   : > { %6126 = vmatmul.mubr.msk.bf16.gmra.mxu0 %vm550_vm0, %v6589_v16 }
  0x95   : > { %6129 = vmatprep.mubr.msk.bf16.mxu0 %vm550_vm0, %v6590_v17  ;;  %6206 = vmatpush3.bf16.msra.mxu0 %v6612_v34 }
  0x9c   : > { %6130 = vmatmul.mubr.msk.bf16.gmra.mxu0 %vm550_vm0, %v6591_v18 }
  0x9d   : > { %6133 = vmatprep.mubr.msk.bf16.mxu0 %vm550_vm0, %v6592_v19 }
  0xa4   : > { %6134 = vmatmul.mubr.msk.bf16.gmra.mxu0 %vm550_vm0, %v6593_v20 }
  0xa5   : > { %6137 = vmatprep.mubr.msk.bf16.mxu0 %vm550_vm0, %v6594_v21 }
  0xac   : > { %6138 = vmatmul.mubr.msk.bf16.gmra.mxu0 %vm550_vm0, %v6595_v22 }
  0xad   : > { %6141 = vmatprep.mubr.msk.bf16.mxu0 %vm550_vm0, %v6596_v23 }
  0xb4   : > { %6142 = vmatmul.mubr.msk.bf16.gmra.mxu0 %vm550_vm0, %v6597_v24 }
 0x13c   : > { %v6115_v35 = vpop.f32.mrf.mxu0 }
 0x13d   : > { %v7242_v41 = vadd.f32 %v6115_v35, %v7233_v37 }
 0x13e   : > { %v633_v36 = vpop.f32.mrf.mxu0 }
 0x13f   : > { %v7236_v39 = vadd.f32 %v7233_v37, %v633_v36  ;;  %v10432_v48 = vmax.f32 %v7242_v41, 0.0 }
 0x140   : > { %v6116_v38 = vpop.f32.mrf.mxu0 }
 0x141   : > { %v7239_v40 = vadd.f32 %v6116_v38, %v7233_v37  ;;  %v10431_v46 = vmax.f32 %v7236_v39, 0.0 }
 0x142   : > { %v636_v42 = vpop.f32.mrf.mxu0 }
 0x143   : > { %v7245_v43 = vadd.f32 %v7233_v37, %v636_v42  ;;  %v10434_v44 = vmax.f32 %v7239_v40, 0.0 }
 0x144   : > { %v6119_v45 = vpop.f32.mrf.mxu0 }
 0x145   : > { %v10433_v47 = vmax.f32 %v7245_v43, 0.0  ;;  %v827_v51 = vpack.c.bf16 %v10434_v44, %v10432_v48  ;;  %v7266_v55 = vadd.f32 %v6119_v45, %v7233_v37 }
 0x146   : > { %v649_v49 = vpop.f32.mrf.mxu0 }
 0x147   : > { %v826_v50 = vpack.c.bf16 %v10433_v47, %v10431_v46  ;;  %v7260_v53 = vadd.f32 %v7233_v37, %v649_v49  ;;  %10609 = vst [vmem:[#allocation16_spill] sm:$0xff] %v7266_v55  ;;  %v10428_v62 = vmax.f32 %v7266_v55, 0.0 }
 0x148   : > { %v6120_v52 = vpop.f32.mrf.mxu0 }
 0x149   : > { %v7263_v54 = vadd.f32 %v6120_v52, %v7233_v37  ;;  %6161 = vmatprep.mubr.bf16.mxu1 %v826_v50  ;;  %v10429_v60 = vmax.f32 %v7260_v53, 0.0 }
 0x14a   : > { %v652_v56 = vpop.f32.mrf.mxu0  ;;  %6162 = vmatmul.mubr.bf16.vlgmr.msra.gmra.mxu1 %v827_v51 }
 0x14b   : > { %10608 = vst [vmem:[#allocation15_spill] sm:$0xff] %v7263_v54  ;;  %v7269_v57 = vadd.f32 %v7233_v37, %v652_v56  ;;  %v10427_v58 = vmax.f32 %v7263_v54, 0.0 }
 0x14c   : > { %v6123_v59 = vpop.f32.mrf.mxu0 }
 0x14d   : > { %v10430_v61 = vmax.f32 %v7269_v57, 0.0  ;;  %v829_v1 = vpack.c.bf16 %v10427_v58, %v10428_v62  ;;  %v7290_v5 = vadd.f32 %v6123_v59, %v7233_v37 }
 0x14e   : > { %v665_v63 = vpop.f32.mrf.mxu0 }
 0x14f   : > { %v828_v0 = vpack.c.bf16 %v10430_v61, %v10429_v60  ;;  %v7284_v3 = vadd.f32 %v7233_v37, %v665_v63  ;;  %10612 = vst [vmem:[#allocation19_spill] sm:$0xff] %v7290_v5  ;;  %v10424_v12 = vmax.f32 %v7290_v5, 0.0 }
 0x150   : > { %v6124_v2 = vpop.f32.mrf.mxu0 }
 0x151   : > { %10610 = vst [vmem:[#allocation17_spill] sm:$0xff] %v7284_v3  ;;  %v7287_v4 = vadd.f32 %v6124_v2, %v7233_v37  ;;  %6165 = vmatprep.mubr.bf16.mxu1 %v828_v0  ;;  %v10425_v10 = vmax.f32 %v7284_v3, 0.0 }
 0x152   : > { %v668_v6 = vpop.f32.mrf.mxu0  ;;  %6166 = vmatmul.mubr.bf16.gmra.mxu1 %v829_v1 }
 0x153   : > { %10611 = vst [vmem:[#allocation18_spill] sm:$0xff] %v7287_v4  ;;  %v7293_v7 = vadd.f32 %v7233_v37, %v668_v6  ;;  %v10423_v8 = vmax.f32 %v7287_v4, 0.0 }
 0x154   : > { %v6127_v9 = vpop.f32.mrf.mxu0 }
 0x155   : > { %10613 = vst [vmem:[#allocation20_spill] sm:$0xff] %v7293_v7  ;;  %v10426_v11 = vmax.f32 %v7293_v7, 0.0  ;;  %v831_v15 = vpack.c.bf16 %v10423_v8, %v10424_v12  ;;  %v7314_v19 = vadd.f32 %v6127_v9, %v7233_v37 }
 0x156   : > { %v681_v13 = vpop.f32.mrf.mxu0 }
 0x157   : > { %v830_v14 = vpack.c.bf16 %v10426_v11, %v10425_v10  ;;  %v7308_v17 = vadd.f32 %v7233_v37, %v681_v13  ;;  %10616 = vst [vmem:[#allocation23_spill] sm:$0xff] %v7314_v19  ;;  %v10420_v26 = vmax.f32 %v7314_v19, 0.0 }
 0x158   : > { %v6128_v16 = vpop.f32.mrf.mxu0 }
 0x159   : > { %10614 = vst [vmem:[#allocation21_spill] sm:$0xff] %v7308_v17  ;;  %v7311_v18 = vadd.f32 %v6128_v16, %v7233_v37  ;;  %6169 = vmatprep.mubr.bf16.mxu1 %v830_v14  ;;  %v10421_v24 = vmax.f32 %v7308_v17, 0.0 }
 0x15a   : > { %v684_v20 = vpop.f32.mrf.mxu0  ;;  %6170 = vmatmul.mubr.bf16.gmra.mxu1 %v831_v15 }
 0x15b   : > { %10615 = vst [vmem:[#allocation22_spill] sm:$0xff] %v7311_v18  ;;  %v7317_v21 = vadd.f32 %v7233_v37, %v684_v20  ;;  %v10419_v22 = vmax.f32 %v7311_v18, 0.0 }
 0x15c   : > { %v6131_v23 = vpop.f32.mrf.mxu0 }
 0x15d   : > { %10617 = vst [vmem:[#allocation24_spill] sm:$0xff] %v7317_v21  ;;  %v10422_v25 = vmax.f32 %v7317_v21, 0.0  ;;  %v833_v29 = vpack.c.bf16 %v10419_v22, %v10420_v26  ;;  %v7338_v33 = vadd.f32 %v6131_v23, %v7233_v37 }
 0x15e   : > { %v697_v27 = vpop.f32.mrf.mxu0 }
 0x15f   : > { %v832_v28 = vpack.c.bf16 %v10422_v25, %v10421_v24  ;;  %v7332_v31 = vadd.f32 %v7233_v37, %v697_v27  ;;  %10620 = vst [vmem:[#allocation27_spill] sm:$0xff] %v7338_v33  ;;  %v10416_v49 = vmax.f32 %v7338_v33, 0.0 }
 0x160   : > { %v6132_v30 = vpop.f32.mrf.mxu0 }
 0x161   : > { %10618 = vst [vmem:[#allocation25_spill] sm:$0xff] %v7332_v31  ;;  %v7335_v32 = vadd.f32 %v6132_v30, %v7233_v37  ;;  %6173 = vmatprep.mubr.bf16.mxu1 %v832_v28  ;;  %v10417_v42 = vmax.f32 %v7332_v31, 0.0 }
 0x162   : > { %v700_v34 = vpop.f32.mrf.mxu0  ;;  %6174 = vmatmul.mubr.bf16.gmra.mxu1 %v833_v29 }
 0x163   : > { %10619 = vst [vmem:[#allocation26_spill] sm:$0xff] %v7335_v32  ;;  %v7341_v35 = vadd.f32 %v7233_v37, %v700_v34  ;;  %v10415_v36 = vmax.f32 %v7335_v32, 0.0 }
 0x164   : > { %v6135_v38 = vpop.f32.mrf.mxu0 }
 0x165   : > { %10621 = vst [vmem:[#allocation28_spill] sm:$0xff] %v7341_v35  ;;  %v10418_v45 = vmax.f32 %v7341_v35, 0.0  ;;  %v835_v52 = vpack.c.bf16 %v10415_v36, %v10416_v49  ;;  %v7362_v0 = vadd.f32 %v6135_v38, %v7233_v37 }
 0x166   : > { %v713_v50 = vpop.f32.mrf.mxu0 }
 0x167   : > { %v834_v51 = vpack.c.bf16 %v10418_v45, %v10417_v42  ;;  %v7356_v59 = vadd.f32 %v7233_v37, %v713_v50  ;;  %10624 = vst [vmem:[#allocation31_spill] sm:$0xff] %v7362_v0  ;;  %v10403_v15 = vmax.f32 %v7362_v0, 0.0 }
 0x168   : > { %v6136_v56 = vpop.f32.mrf.mxu0 }
 0x169   : > { %10622 = vst [vmem:[#allocation29_spill] sm:$0xff] %v7356_v59  ;;  %v7359_v63 = vadd.f32 %v6136_v56, %v7233_v37  ;;  %6177 = vmatprep.mubr.bf16.mxu1 %v834_v51  ;;  %v10414_v13 = vmax.f32 %v7356_v59, 0.0 }
 0x16a   : > { %v716_v1 = vpop.f32.mrf.mxu0  ;;  %6178 = vmatmul.mubr.bf16.gmra.mxu1 %v835_v52 }
 0x16b   : > { %10623 = vst [vmem:[#allocation30_spill] sm:$0xff] %v7359_v63  ;;  %v7365_v2 = vadd.f32 %v7233_v37, %v716_v1  ;;  %v10404_v6 = vmax.f32 %v7359_v63, 0.0 }
 0x16c   : > { %v6139_v9 = vpop.f32.mrf.mxu0 }
 0x16d   : > { %10625 = vst [vmem:[#allocation32_spill] sm:$0xff] %v7365_v2  ;;  %v10409_v14 = vmax.f32 %v7365_v2, 0.0  ;;  %v837_v23 = vpack.c.bf16 %v10404_v6, %v10403_v15  ;;  %v7386_v30 = vadd.f32 %v6139_v9, %v7233_v37 }
 0x16e   : > { %v729_v16 = vpop.f32.mrf.mxu0 }
 0x16f   : > { %v836_v20 = vpack.c.bf16 %v10409_v14, %v10414_v13  ;;  %v7380_v28 = vadd.f32 %v7233_v37, %v729_v16  ;;  %10628 = vst [vmem:[#allocation35_spill] sm:$0xff] %v7386_v30  ;;  %v10408_v1 = vmax.f32 %v7386_v30, 0.0  ;;  %v6617_v14 = vld [vmem:[#allocation5 + $0x60] sm:$0xff]  }
 0x170   : > { %v6140_v27 = vpop.f32.mrf.mxu0 }
 0x171   : > { %10626 = vst [vmem:[#allocation33_spill] sm:$0xff] %v7380_v28  ;;  %v7383_v29 = vadd.f32 %v6140_v27, %v7233_v37  ;;  %6181 = vmatprep.mubr.bf16.mxu1 %v836_v20  ;;  %v10405_v52 = vmax.f32 %v7380_v28, 0.0 }
 0x172   : > { %v732_v34 = vpop.f32.mrf.mxu0  ;;  %6182 = vmatmul.mubr.bf16.gmra.mxu1 %v837_v23 }
 0x173   : > { %10627 = vst [vmem:[#allocation34_spill] sm:$0xff] %v7383_v29  ;;  %v7389_v38 = vadd.f32 %v7233_v37, %v732_v34  ;;  %v10407_v50 = vmax.f32 %v7383_v29, 0.0 }
 0x174   : > { %v6143_v51 = vpop.f32.mrf.mxu0 }
 0x175   : > { %10629 = vst [vmem:[#allocation36_spill] sm:$0xff] %v7389_v38  ;;  %v10406_v56 = vmax.f32 %v7389_v38, 0.0  ;;  %v839_v20 = vpack.c.bf16 %v10407_v50, %v10408_v1  ;;  %v7410_v15 = vadd.f32 %v6143_v51, %v7233_v37 }
 0x176   : > { %v745_v16 = vpop.f32.mrf.mxu0 }
 0x177   : > { %v838_v9 = vpack.c.bf16 %v10406_v56, %v10405_v52  ;;  %v7404_v27 = vadd.f32 %v7233_v37, %v745_v16  ;;  %10632 = vst [vmem:[#allocation39_spill] sm:$0xff] %v7410_v15  ;;  %v10412_v16 = vmax.f32 %v7410_v15, 0.0 }
 0x178   : > { %v6144_v23 = vpop.f32.mrf.mxu0 }
 0x179   : > { %10630 = vst [vmem:[#allocation37_spill] sm:$0xff] %v7404_v27  ;;  %v7407_v34 = vadd.f32 %v6144_v23, %v7233_v37  ;;  %6185 = vmatprep.mubr.bf16.mxu1 %v838_v9  ;;  %v10410_v50 = vmax.f32 %v7404_v27, 0.0  ;;  %v6616_v23 = vld [vmem:[#allocation5 + $0x68] sm:$0xff]  }
 0x17a   : > { %v748_v6 = vpop.f32.mrf.mxu0  ;;  %6186 = vmatmul.mubr.bf16.gmra.mxu1 %v839_v20  ;;  %v6615_v20 = vld [vmem:[#allocation5 + $0x70] sm:$0xff]  }
 0x17b   : > { %10631 = vst [vmem:[#allocation38_spill] sm:$0xff] %v7407_v34  ;;  %v7413_v52 = vadd.f32 %v7233_v37, %v748_v6  ;;  %v10411_v56 = vmax.f32 %v7407_v34, 0.0  ;;  %v6613_v37 = vld [vmem:[#allocation7] sm:$0xff]   ;;  %v6614_v6 = vld [vmem:[#allocation5 + $0x78] sm:$0xff]  }
 0x17c   : > { %6207 = vmatprep.subr.bf16.mxu0 %v6613_v37  ;;  %6241 = vmatprep.subr.bf16.mxu1 %v6614_v6 }
 0x17d   : > { %10633 = vst [vmem:[#allocation40_spill] sm:$0xff] %v7413_v52  ;;  %v10413_v1 = vmax.f32 %v7413_v52, 0.0  ;;  %v841_v51 = vpack.c.bf16 %v10411_v56, %v10412_v16  ;;  %6208 = vmatpush3.bf16.msra.mxu0 %v6613_v37  ;;  %6242 = vmatpush3.bf16.msra.mxu1 %v6614_v6  ;;  %v7430_v37 = vld [vmem:[%s10391_s4] ss:$0 sm:$0xff] }
 0x17e   : > { %6243 = vmatprep.subr.bf16.mxu1 %v6615_v20 }
 0x17f   : > { %v840_v9 = vpack.c.bf16 %v10413_v1, %v10410_v50  ;;  %v6618_v50 = vld [vmem:[#allocation5 + $0x58] sm:$0xff]  }
 0x181   : > { %6189 = vmatprep.mubr.bf16.mxu1 %v840_v9  ;;  %6244 = vmatpush3.bf16.msra.mxu1 %v6615_v20 }
 0x182   : > { %6190 = vmatmul.mubr.bf16.gmra.mxu1 %v841_v51  ;;  %6245 = vmatprep.subr.bf16.mxu1 %v6616_v23 }
 0x185   : > { %6246 = vmatpush3.bf16.msra.mxu1 %v6616_v23 }
 0x186   : > { %6247 = vmatprep.subr.bf16.mxu1 %v6617_v14 }
 0x189   : > { %6248 = vmatpush3.bf16.msra.mxu1 %v6617_v14 }
 0x18a   : > { %6249 = vmatprep.subr.bf16.mxu1 %v6618_v50 }
 0x18d   : > { %6250 = vmatpush3.bf16.msra.mxu1 %v6618_v50 }
 0x20a   : > { %v6163_v9 = vpop.f32.mrf.mxu1 }
 0x20b   : > { %v939_v16 = vadd.f32 %v6163_v9, %v7430_v37 }
 0x20c   : > { %v930_v51 = vpop.f32.mrf.mxu1 }
 0x20d   : > { %v931_v6 = vadd.f32 %v7430_v37, %v930_v51  ;;  %v1059_v49 = vmax.f32 %v939_v16, 0.0 }
 0x20e   : > { %v6164_v56 = vpop.f32.mrf.mxu1 }
 0x20f   : > { %v942_v20 = vadd.f32 %v6164_v56, %v7430_v37  ;;  %v1057_v50 = vmax.f32 %v931_v6, 0.0 }
 0x210   : > { %v933_v23 = vpop.f32.mrf.mxu1 }
 0x211   : > { %v934_v1 = vadd.f32 %v7430_v37, %v933_v23  ;;  %v1060_v14 = vmax.f32 %v942_v20, 0.0 }
 0x212   : > { %v6167_v13 = vpop.f32.mrf.mxu1 }
 0x213   : > { %v1058_v36 = vmax.f32 %v934_v1, 0.0  ;;  %v1090_v22 = vpack.c.bf16 %v1060_v14, %v1059_v49  ;;  %v955_v56 = vadd.f32 %v6167_v13, %v7430_v37 }
 0x214   : > { %v946_v42 = vpop.f32.mrf.mxu1 }
 0x215   : > { %v1089_v45 = vpack.c.bf16 %v1058_v36, %v1057_v50  ;;  %v947_v24 = vadd.f32 %v7430_v37, %v946_v42  ;;  %v1063_v16 = vmax.f32 %v955_v56, 0.0 }
 0x216   : > { %v6168_v26 = vpop.f32.mrf.mxu1 }
 0x217   : > { %v958_v51 = vadd.f32 %v6168_v26, %v7430_v37  ;;  %6209 = vmatprep.mubr.bf16.mxu0 %v1089_v45  ;;  %v1061_v6 = vmax.f32 %v947_v24, 0.0 }
 0x218   : > { %v949_v9 = vpop.f32.mrf.mxu1  ;;  %6210 = vmatmul.mubr.bf16.vlgmr.msra.gmra.mxu0 %v1090_v22 }
 0x219   : > { %v950_v23 = vadd.f32 %v7430_v37, %v949_v9  ;;  %v1064_v20 = vmax.f32 %v958_v51, 0.0 }
 0x21a   : > { %v6171_v25 = vpop.f32.mrf.mxu1 }
 0x21b   : > { %v1062_v1 = vmax.f32 %v950_v23, 0.0  ;;  %v1092_v49 = vpack.c.bf16 %v1064_v20, %v1063_v16  ;;  %v971_v45 = vadd.f32 %v6171_v25, %v7430_v37 }
 0x21c   : > { %v962_v8 = vpop.f32.mrf.mxu1 }
 0x21d   : > { %v1091_v36 = vpack.c.bf16 %v1062_v1, %v1061_v6  ;;  %v963_v42 = vadd.f32 %v7430_v37, %v962_v8  ;;  %v1067_v56 = vmax.f32 %v971_v45, 0.0 }
 0x21e   : > { %v6172_v14 = vpop.f32.mrf.mxu1 }
 0x21f   : > { %v974_v26 = vadd.f32 %v6172_v14, %v7430_v37  ;;  %6213 = vmatprep.mubr.bf16.mxu0 %v1091_v36  ;;  %v1065_v24 = vmax.f32 %v963_v42, 0.0 }
 0x220   : > { %v965_v13 = vpop.f32.mrf.mxu1  ;;  %6214 = vmatmul.mubr.bf16.gmra.mxu0 %v1092_v49 }
 0x221   : > { %v966_v22 = vadd.f32 %v7430_v37, %v965_v13  ;;  %v1068_v50 = vmax.f32 %v974_v26, 0.0 }
 0x222   : > { %v6175_v51 = vpop.f32.mrf.mxu1 }
 0x223   : > { %v1066_v9 = vmax.f32 %v966_v22, 0.0  ;;  %v1094_v20 = vpack.c.bf16 %v1068_v50, %v1067_v56  ;;  %v987_v25 = vadd.f32 %v6175_v51, %v7430_v37 }
 0x224   : > { %v978_v23 = vpop.f32.mrf.mxu1 }
 0x225   : > { %v1093_v6 = vpack.c.bf16 %v1066_v9, %v1065_v24  ;;  %v979_v8 = vadd.f32 %v7430_v37, %v978_v23  ;;  %v1071_v45 = vmax.f32 %v987_v25, 0.0 }
 0x226   : > { %v6176_v1 = vpop.f32.mrf.mxu1 }
 0x227   : > { %v990_v16 = vadd.f32 %v6176_v1, %v7430_v37  ;;  %6217 = vmatprep.mubr.bf16.mxu0 %v1093_v6  ;;  %v1069_v42 = vmax.f32 %v979_v8, 0.0 }
 0x228   : > { %v981_v36 = vpop.f32.mrf.mxu1  ;;  %6218 = vmatmul.mubr.bf16.gmra.mxu0 %v1094_v20 }
 0x229   : > { %v982_v49 = vadd.f32 %v7430_v37, %v981_v36  ;;  %v1072_v14 = vmax.f32 %v990_v16, 0.0 }
 0x22a   : > { %v6179_v26 = vpop.f32.mrf.mxu1 }
 0x22b   : > { %v1070_v13 = vmax.f32 %v982_v49, 0.0  ;;  %v1096_v50 = vpack.c.bf16 %v1072_v14, %v1071_v45  ;;  %v1003_v51 = vadd.f32 %v6179_v26, %v7430_v37 }
 0x22c   : > { %v994_v22 = vpop.f32.mrf.mxu1 }
 0x22d   : > { %v1095_v24 = vpack.c.bf16 %v1070_v13, %v1069_v42  ;;  %v995_v56 = vadd.f32 %v7430_v37, %v994_v22  ;;  %v1075_v25 = vmax.f32 %v1003_v51, 0.0 }
 0x22e   : > { %v6180_v9 = vpop.f32.mrf.mxu1 }
 0x22f   : > { %v1006_v23 = vadd.f32 %v6180_v9, %v7430_v37  ;;  %6221 = vmatprep.mubr.bf16.mxu0 %v1095_v24  ;;  %v1073_v8 = vmax.f32 %v995_v56, 0.0 }
 0x230   : > { %v997_v6 = vpop.f32.mrf.mxu1  ;;  %6222 = vmatmul.mubr.bf16.gmra.mxu0 %v1096_v50 }
 0x231   : > { %v998_v20 = vadd.f32 %v7430_v37, %v997_v6  ;;  %v1076_v1 = vmax.f32 %v1006_v23, 0.0 }
 0x232   : > { %v6183_v16 = vpop.f32.mrf.mxu1 }
 0x233   : > { %v1074_v36 = vmax.f32 %v998_v20, 0.0  ;;  %v1098_v14 = vpack.c.bf16 %v1076_v1, %v1075_v25  ;;  %v1019_v26 = vadd.f32 %v6183_v16, %v7430_v37 }
 0x234   : > { %v1010_v49 = vpop.f32.mrf.mxu1 }
 0x235   : > { %v1097_v42 = vpack.c.bf16 %v1074_v36, %v1073_v8  ;;  %v1011_v45 = vadd.f32 %v7430_v37, %v1010_v49  ;;  %v1079_v51 = vmax.f32 %v1019_v26, 0.0 }
 0x236   : > { %v6184_v13 = vpop.f32.mrf.mxu1 }
 0x237   : > { %v1022_v22 = vadd.f32 %v6184_v13, %v7430_v37  ;;  %6225 = vmatprep.mubr.bf16.mxu0 %v1097_v42  ;;  %v1077_v56 = vmax.f32 %v1011_v45, 0.0 }
 0x238   : > { %v1013_v24 = vpop.f32.mrf.mxu1  ;;  %6226 = vmatmul.mubr.bf16.gmra.mxu0 %v1098_v14 }
 0x239   : > { %v1014_v50 = vadd.f32 %v7430_v37, %v1013_v24  ;;  %v1080_v9 = vmax.f32 %v1022_v22, 0.0 }
 0x23a   : > { %v6187_v23 = vpop.f32.mrf.mxu1 }
 0x23b   : > { %v1078_v6 = vmax.f32 %v1014_v50, 0.0  ;;  %v1100_v1 = vpack.c.bf16 %v1080_v9, %v1079_v51  ;;  %v1035_v16 = vadd.f32 %v6187_v23, %v7430_v37 }
 0x23c   : > { %v1026_v20 = vpop.f32.mrf.mxu1 }
 0x23d   : > { %v1099_v8 = vpack.c.bf16 %v1078_v6, %v1077_v56  ;;  %v1027_v25 = vadd.f32 %v7430_v37, %v1026_v20  ;;  %v1083_v26 = vmax.f32 %v1035_v16, 0.0 }
 0x23e   : > { %v6188_v36 = vpop.f32.mrf.mxu1 }
 0x23f   : > { %v1038_v49 = vadd.f32 %v6188_v36, %v7430_v37  ;;  %6229 = vmatprep.mubr.bf16.mxu0 %v1099_v8  ;;  %v1081_v45 = vmax.f32 %v1027_v25, 0.0 }
 0x240   : > { %v1029_v42 = vpop.f32.mrf.mxu1  ;;  %6230 = vmatmul.mubr.bf16.gmra.mxu0 %v1100_v1 }
 0x241   : > { %v1030_v14 = vadd.f32 %v7430_v37, %v1029_v42  ;;  %v1084_v13 = vmax.f32 %v1038_v49, 0.0 }
 0x242   : > { %v6191_v22 = vpop.f32.mrf.mxu1 }
 0x243   : > { %v1082_v24 = vmax.f32 %v1030_v14, 0.0  ;;  %v1102_v9 = vpack.c.bf16 %v1084_v13, %v1083_v26  ;;  %v1051_v23 = vadd.f32 %v6191_v22, %v7430_v37  ;;  %v6619_v13 = vld [vmem:[#allocation5 + $0x50] sm:$0xff]   ;;  %v1452_v22 = vlaneseq }
 0x244   : > { %v1042_v50 = vpop.f32.mrf.mxu1  ;;  %6251 = vmatprep.subr.bf16.mxu1 %v6619_v13 }
 0x245   : > { %v1101_v56 = vpack.c.bf16 %v1082_v24, %v1081_v45  ;;  %v1043_v51 = vadd.f32 %v7430_v37, %v1042_v50  ;;  %v1087_v42 = vmax.f32 %v1051_v23, 0.0  ;;  %6252 = vmatpush3.bf16.msra.mxu1 %v6619_v13  ;;  %v6620_v45 = vld [vmem:[#allocation5 + $0x48] sm:$0xff]   ;;  %v6621_v24 = vld [vmem:[#allocation5 + $0x40] sm:$0xff]   ;;  %v1453_v26 = vshrl.u32 %v1452_v22, 7 }
 0x246   : > { %v6192_v6 = vpop.f32.mrf.mxu1  ;;  %6253 = vmatprep.subr.bf16.mxu1 %v6620_v45 }
 0x247   : > { %v1054_v20 = vadd.f32 %v6192_v6, %v7430_v37  ;;  %6233 = vmatprep.mubr.bf16.mxu0 %v1101_v56  ;;  %v1085_v49 = vmax.f32 %v1043_v51, 0.0  ;;  %v7467_v56 = vsub.s32 4, %v1453_v26  ;;  %v7471_v6 = vsub.s32 1, %v1453_v26 }
 0x248   : > { %v1045_v8 = vpop.f32.mrf.mxu1  ;;  %6234 = vmatmul.mubr.bf16.gmra.mxu0 %v1102_v9  ;;  %v7469_v9 = vsub.s32 0, %v1453_v26  ;;  %v7473_v51 = vsub.s32 2, %v1453_v26 }
 0x249   : > { %v1046_v1 = vadd.f32 %v7430_v37, %v1045_v8  ;;  %v1088_v36 = vmax.f32 %v1054_v20, 0.0  ;;  %6254 = vmatpush3.bf16.msra.mxu1 %v6620_v45  ;;  %v825_v37 = vld [vmem:[%s10393_s6] sm:$0x1f]  ;;  %10634 = vst [vmem:[#allocation41_spill] sm:$0xff] %v7467_v56  ;;  %10636 = vst [vmem:[#allocation43_spill] sm:$0xff] %v7471_v6  ;;  %v7475_v20 = vsub.s32 3, %v1453_v26 }
 0x24a   : > { %6255 = vmatprep.subr.bf16.mxu1 %v6621_v24  ;;  %v1451_v50 = vadd.f32 1.0, %v825_v37  ;;  %10635 = vst [vmem:[#allocation42_spill] sm:$0xff] %v7469_v9  ;;  %10637 = vst [vmem:[#allocation44_spill] sm:$0xff] %v7473_v51 }
 0x24b   : > { %v1086_v25 = vmax.f32 %v1046_v1, 0.0  ;;  %v1104_v14 = vpack.c.bf16 %v1088_v36, %v1087_v42  ;;  %10638 = vst [vmem:[#allocation45_spill] sm:$0xff] %v7475_v20  ;;  %v7481_v36 = vrot.slane %v825_v37, %v7469_v9  ;;  %v7490_v42 = vrot.slane %v825_v37, %v7475_v20 }
 0x24c   : > { %v7478_v8 = vrot.slane %v1451_v50, %v7467_v56 }
 0x24d   : > { %v1103_v16 = vpack.c.bf16 %v1086_v25, %v1085_v49  ;;  %6256 = vmatpush3.bf16.msra.mxu1 %v6621_v24  ;;  %v7484_v49 = vrot.slane %v825_v37, %v7471_v6  ;;  %v7487_v25 = vrot.slane %v825_v37, %v7473_v51 }
 0x24f   : > { %6237 = vmatprep.mubr.bf16.mxu0 %v1103_v16 }
 0x250   : > { %6238 = vmatmul.mubr.bf16.gmra.mxu0 %v1104_v14 }
 0x2d8   : > { %v6211_v23 = vpop.f32.mrf.mxu0 }
 0x2d9   : > { %v1350_v14 = vrot.slane %v6211_v23, 4  ;;  %v1458_v45 = vmul.f32 %v6211_v23, %v7478_v8 }
 0x2da   : > { %v1187_v1 = vpop.f32.mrf.mxu0 }
 0x2db   : > { %v1347_v16 = vrot.slane %v1187_v1, 4  ;;  %v1456_v22 = vmul.f32 %v7478_v8, %v1187_v1 }
 0x2dc   : > { %v6212_v13 = vpop.f32.mrf.mxu0 }
 0x2dd   : > { %v1443_v24 = vsel %vm1346_vm1, 0.0, %v1347_v16  ;;  %v1352_v26 = vrot.slane %v6212_v13, 4  ;;  %v1459_v48 = vmul.f32 %v6212_v13, %v7478_v8 }
 0x2de   : > { %v1492_v50 = vmul.f32 %v7481_v36, %v1443_v24  ;;  %v7497_v12 = vmul.f32 %v7484_v49, %v1443_v24  ;;  %v7500_v37 = vmul.f32 %v7487_v25, %v1443_v24  ;;  %v7503_v10 = vmul.f32 %v7490_v42, %v1443_v24  ;;  %v1190_v11 = vpop.f32.mrf.mxu0 }
 0x2df   : > { %v1353_v23 = vsel %vm1346_vm1, %v1350_v14, %v1352_v26  ;;  %v1564_v58 = vmul.f32 %v7484_v49, %v1352_v26  ;;  %v1785_v1 = vmul.f32 %v7487_v25, %v1352_v26  ;;  %v2006_v62 = vmul.f32 %v7490_v42, %v1352_v26 }
 0x2e0   : > { %v7509_v60 = vadd.f32 %v1492_v50, %v1456_v22  ;;  %v7514_v24 = vpop.f32.mrf.mxu0  ;;  %v1495_v47 = vmul.f32 %v7481_v36, %v1353_v23  ;;  %v1563_v44 = vmul.f32 %v7484_v49, %v1353_v23  ;;  %v1784_v9 = vmul.f32 %v7487_v25, %v1353_v23 }
 0x2e1   : > { %v1648_v20 = vrot.slane %v1564_v58, 1  ;;  %v1869_v26 = vrot.slane %v1785_v1, 2  ;;  %v2005_v22 = vmul.f32 %v7490_v42, %v1353_v23  ;;  %v1348_v50 = vrot.slane %v1190_v11, 4 }
 0x2e2   : > { %v7521_v61 = vpop.f32.mrf.mxu0  ;;  %v1527_v46 = vadd.f32 %v1495_v47, %v1459_v48  ;;  %v1646_v6 = vrot.slane %v1563_v44, 1  ;;  %v1867_v13 = vrot.slane %v1784_v9, 2  ;;  %v2090_v56 = vrot.slane %v2006_v62, 3 }
 0x2e3   : > { %v2088_v34 = vrot.slane %v2005_v22, 3  ;;  %v1349_v15 = vsel %vm1346_vm1, %v1347_v16, %v1348_v50  ;;  %v1351_v27 = vsel %vm1346_vm1, %v1348_v50, %v1350_v14  ;;  %v1457_v58 = vmul.f32 %v7478_v8, %v1190_v11 }
 0x2e4   : > { %v1649_v52 = vsel %vm1640_vm2, %v1646_v6, %v1648_v20  ;;  %v1493_v1 = vmul.f32 %v7481_v36, %v1349_v15  ;;  %v1494_v23 = vmul.f32 %v7481_v36, %v1351_v27  ;;  %v6216_v29 = vpop.f32.mrf.mxu0  ;;  %v1870_v44 = vsel %vm1861_vm3, %v1867_v13, %v1869_v26 }
 0x2e5   : > { %v1748_v47 = vadd.f32 %v1649_v52, %v1527_v46  ;;  %v7532_v48 = vmul.f32 %v7484_v49, %v1349_v15  ;;  %v1562_v62 = vmul.f32 %v7484_v49, %v1351_v27  ;;  %v7536_v11 = vmul.f32 %v7487_v25, %v1349_v15 }
 0x2e6   : > { %v1525_v9 = vadd.f32 %v1493_v1, %v1457_v58  ;;  %v1526_v16 = vadd.f32 %v1494_v23, %v1458_v45  ;;  %v1783_v20 = vmul.f32 %v7487_v25, %v1351_v27  ;;  %v7541_v46 = vmul.f32 %v7490_v42, %v1349_v15  ;;  %v1206_v45 = vpop.f32.mrf.mxu0 }
 0x2e7   : > { %v1969_v14 = vadd.f32 %v1870_v44, %v1748_v47  ;;  %v10450_v22 = vrot.slane %v7532_v48, 1  ;;  %v1644_v50 = vrot.slane %v1562_v62, 1  ;;  %v2091_v52 = vsel %vm2082_vm4, %v2088_v34, %v2090_v56 }
 0x2e8   : > { %v10452_v26 = vrot.slane %v7536_v11, 2  ;;  %v1865_v51 = vrot.slane %v1783_v20, 2  ;;  %v7546_v58 = vmul.f32 %v7490_v42, %v1351_v27  ;;  %v1462_v15 = vmul.f32 %v7514_v24, %v7478_v8 }
 0x2e9   : > { %v2190_v1 = vadd.f32 %v2091_v52, %v1969_v14  ;;  %v1645_v23 = vsel %vm1640_vm2, %v10450_v22, %v1644_v50  ;;  %v1647_v47 = vsel %vm1640_vm2, %v1644_v50, %v1646_v6  ;;  %v10639_v20 = vmax.f32 %v7239_v40, 0.0 }
 0x2ea   : > { %v1746_v44 = vadd.f32 %v1645_v23, %v1525_v9  ;;  %v1747_v62 = vadd.f32 %v1647_v47, %v1526_v16  ;;  %v1866_v56 = vsel %vm1861_vm3, %v10452_v26, %v1865_v51  ;;  %v1868_v52 = vsel %vm1861_vm3, %v1865_v51, %v1867_v13  ;;  %v7571_v47 = vpop.f32.mrf.mxu0 }
 0x2eb   : > { %v7560_v14 = vadd.f32 %v2190_v1, %v10639_v20  ;;  %v10451_v22 = vrot.slane %v7546_v58, 3  ;;  %v1354_v6 = vrot.slane %v7521_v61, 4  ;;  %v1460_v16 = vmul.f32 %v7478_v8, %v7521_v61 }
 0x2ec   : > { %v7565_v50 = vadd.f32 %v1866_v56, %v1746_v44  ;;  %v7567_v9 = vadd.f32 %v1868_v52, %v1747_v62  ;;  %v1359_v23 = vrot.slane %v6216_v29, 4  ;;  %v1463_v13 = vmul.f32 %v6216_v29, %v7478_v8 }
 0x2ed   : > { %10640 = vst [vmem:[#allocation46_spill] sm:$0xff] %v7560_v14  ;;  %v7576_v40 = vsel %vm2082_vm4, %v10451_v22, %v2088_v34  ;;  %v1444_v51 = vsel %vm1346_vm1, 0.0, %v1354_v6  ;;  %v1355_v1 = vrot.slane %v1206_v45, 4  ;;  %v10641_v20 = vrot.slane %v7514_v24, 4 }
 0x2ee   : > { %v1496_v44 = vmul.f32 %v7481_v36, %v1444_v51  ;;  %v7582_v62 = vmul.f32 %v7484_v49, %v1444_v51  ;;  %v7585_v61 = vmul.f32 %v7487_v25, %v1444_v51  ;;  %v7588_v56 = vmul.f32 %v7490_v42, %v1444_v51  ;;  %v7603_v51 = vpop.f32.mrf.mxu0 }
 0x2ef   : > { %v1360_v34 = vsel %vm1346_vm1, %v10641_v20, %v1359_v23  ;;  %v1569_v52 = vmul.f32 %v7484_v49, %v1359_v23  ;;  %v1790_v29 = vmul.f32 %v7487_v25, %v1359_v23  ;;  %v1461_v27 = vmul.f32 %v7478_v8, %v1206_v45 }
 0x2f0   : > { %v7596_v22 = vadd.f32 %v1496_v44, %v1460_v16  ;;  %v7601_v28 = vmul.f32 %v7490_v42, %v1359_v23  ;;  %v1499_v38 = vmul.f32 %v7481_v36, %v1360_v34  ;;  %v7607_v20 = vmul.f32 %v7484_v49, %v1360_v34 }
 0x2f1   : > { %v1657_v0 = vrot.slane %v1569_v52, 1  ;;  %v7610_v63 = vmul.f32 %v7487_v25, %v1360_v34  ;;  %v1878_v16 = vrot.slane %v1790_v29, 2  ;;  %v7614_v44 = vmul.f32 %v7490_v42, %v1360_v34 }
 0x2f2   : > { %v1356_v23 = vsel %vm1346_vm1, %v1354_v6, %v1355_v1  ;;  %v1531_v30 = vadd.f32 %v1499_v38, %v1463_v13  ;;  %v10465_v26 = vrot.slane %v7607_v20, 1  ;;  %v10642_v59 = vrot.slane %v7514_v24, 4  ;;  %v6220_v6 = vpop.f32.mrf.mxu0 }
 0x2f3   : > { %v10468_v2 = vrot.slane %v7610_v63, 2  ;;  %v1497_v32 = vmul.f32 %v7481_v36, %v1356_v23  ;;  %v7625_v29 = vmul.f32 %v7484_v49, %v1356_v23  ;;  %v7635_v24 = vmul.f32 %v7487_v25, %v1356_v23 }
 0x2f4   : > { %v1358_v52 = vsel %vm1346_vm1, %v1355_v1, %v10642_v59  ;;  %v1658_v38 = vsel %vm1640_vm2, %v10465_v26, %v1657_v0  ;;  %v7648_v26 = vmul.f32 %v7490_v42, %v1356_v23 }
 0x2f5   : > { %v1498_v33 = vmul.f32 %v7481_v36, %v1358_v52  ;;  %v7628_v34 = vmul.f32 %v7484_v49, %v1358_v52  ;;  %v7638_v59 = vmul.f32 %v7487_v25, %v1358_v52  ;;  %v1752_v1 = vadd.f32 %v1658_v38, %v1531_v30 }
 0x2f6   : > { %v1879_v45 = vsel %vm1861_vm3, %v10468_v2, %v1878_v16  ;;  %v1529_v31 = vadd.f32 %v1497_v32, %v1461_v27  ;;  %v10470_v35 = vrot.slane %v7625_v29, 1  ;;  %v10473_v0 = vrot.slane %v7635_v24, 2  ;;  %v1222_v27 = vpop.f32.mrf.mxu0 }
 0x2f7   : > { %v10469_v18 = vrot.slane %v7628_v34, 1  ;;  %v10472_v13 = vrot.slane %v7638_v59, 2  ;;  %v7650_v19 = vadd.f32 %v1879_v45, %v1752_v1  ;;  %v7652_v17 = vadd.f32 %v1498_v33, %v1462_v15 }
 0x2f8   : > { %v7655_v30 = vmul.f32 %v7490_v42, %v1358_v52  ;;  %v1364_v32 = vrot.slane %v7571_v47, 4  ;;  %v1466_v33 = vmul.f32 %v7571_v47, %v7478_v8  ;;  %v1361_v15 = vrot.slane %v7603_v51, 4 }
 0x2f9   : > { %10643 = vst [vmem:[#allocation47_spill] sm:$0xff] %v7650_v19  ;;  %v1654_v16 = vsel %vm1640_vm2, %v10470_v35, %v10469_v18  ;;  %v1875_v45 = vsel %vm1861_vm3, %v10473_v0, %v10472_v13  ;;  %v1366_v1 = vrot.slane %v6220_v6, 4  ;;  %v1464_v18 = vmul.f32 %v7478_v8, %v7603_v51 }
 0x2fa   : > { %v1750_v23 = vadd.f32 %v1654_v16, %v1529_v31  ;;  %v1445_v2 = vsel %vm1346_vm1, 0.0, %v1361_v15  ;;  %v1467_v35 = vmul.f32 %v6220_v6, %v7478_v8  ;;  %v1362_v21 = vrot.slane %v1222_v27, 4 }
 0x2fb   : > { %v1500_v13 = vmul.f32 %v7481_v36, %v1445_v2  ;;  %v7679_v47 = vmul.f32 %v7484_v49, %v1445_v2  ;;  %v7682_v31 = vmul.f32 %v7487_v25, %v1445_v2  ;;  %v1465_v16 = vmul.f32 %v7478_v8, %v1222_v27 }
 0x2fc   : > { %v7686_v52 = vmul.f32 %v7490_v42, %v1445_v2  ;;  %v1367_v38 = vsel %vm1346_vm1, %v1364_v32, %v1366_v1  ;;  %v1574_v51 = vmul.f32 %v7484_v49, %v1366_v1  ;;  %v1795_v6 = vmul.f32 %v7487_v25, %v1366_v1 }
 0x2fd   : > { %10644 = vst [vmem:[#allocation48_spill] sm:$0xff] %v7682_v31  ;;  %v7691_v0 = vadd.f32 %v1875_v45, %v1750_v23  ;;  %v7693_v4 = vadd.f32 %v1500_v13, %v1464_v18  ;;  %v1503_v3 = vmul.f32 %v7481_v36, %v1367_v38  ;;  %v7699_v27 = vmul.f32 %v7484_v49, %v1367_v38  ;;  %v7708_v13 = vpop.f32.mrf.mxu0 }
 0x2fe   : > { %10645 = vst [vmem:[#allocation49_spill] sm:$0xff] %v7686_v52  ;;  %v1666_v2 = vrot.slane %v1574_v51, 1  ;;  %v7702_v54 = vmul.f32 %v7487_v25, %v1367_v38  ;;  %v1887_v45 = vrot.slane %v1795_v6, 2  ;;  %v7706_v18 = vmul.f32 %v7490_v42, %v1366_v1 }
 0x2ff   : > { %10646 = vst [vmem:[#allocation50_spill] sm:$0xff] %v7693_v4  ;;  %v1535_v19 = vadd.f32 %v1503_v3, %v1467_v35  ;;  %v10482_v23 = vrot.slane %v7699_v27, 1  ;;  %v1363_v5 = vsel %vm1346_vm1, %v1361_v15, %v1362_v21  ;;  %v1365_v51 = vsel %vm1346_vm1, %v1362_v21, %v1364_v32  ;;  %v7736_v31 = vpop.f32.mrf.mxu0 }
 0x300   : > { %10647 = vst [vmem:[#allocation51_spill] sm:$0xff] %v7702_v54  ;;  %10648 = vst [vmem:[#allocation52_spill] sm:$0xff] %v7706_v18  ;;  %v10484_v7 = vrot.slane %v7702_v54, 2  ;;  %v7715_v4 = vmul.f32 %v7490_v42, %v1367_v38  ;;  %v1501_v55 = vmul.f32 %v7481_v36, %v1363_v5  ;;  %v1502_v3 = vmul.f32 %v7481_v36, %v1365_v51 }
 0x301   : > { %v7720_v35 = vmul.f32 %v7484_v49, %v1363_v5  ;;  %v1667_v1 = vsel %vm1640_vm2, %v10482_v23, %v1666_v2  ;;  %v7727_v15 = vmul.f32 %v7484_v49, %v1365_v51  ;;  %v7730_v21 = vmul.f32 %v7487_v25, %v1363_v5 }
 0x302   : > { %10649 = vst [vmem:[#allocation53_spill] sm:$0xff] %v7715_v4  ;;  %v1756_v32 = vadd.f32 %v1667_v1, %v1535_v19  ;;  %v1888_v38 = vsel %vm1861_vm3, %v10484_v7, %v1887_v45  ;;  %v1533_v4 = vadd.f32 %v1501_v55, %v1465_v16  ;;  %v7740_v6 = vmul.f32 %v7487_v25, %v1365_v51  ;;  %v6622_v45 = vld [vmem:[#allocation7 + $0x78] sm:$0xff]   ;;  %v6623_v7 = vld [vmem:[#allocation7 + $0x70] sm:$0xff]  }
 0x303   : > { %v10487_v52 = vrot.slane %v7720_v35, 1  ;;  %v10486_v2 = vrot.slane %v7727_v15, 1  ;;  %v7744_v18 = vmul.f32 %v7490_v42, %v1363_v5  ;;  %v7748_v1 = vadd.f32 %v1502_v3, %v1466_v33  ;;  %6289 = vmatprep.subr.bf16.mxu0 %v6622_v45 }
 0x304   : > { %v7746_v19 = vadd.f32 %v1888_v38, %v1756_v32  ;;  %v7751_v55 = vmul.f32 %v7490_v42, %v1365_v51  ;;  %v10488_v5 = vrot.slane %v7740_v6, 2  ;;  %v7762_v32 = vmul.f32 %v7708_v13, %v7478_v8  ;;  %6290 = vmatpush3.bf16.msra.mxu0 %v6622_v45 }
 0x305   : > { %10651 = vst [vmem:[#allocation55_spill] sm:$0xff] %v7748_v1  ;;  %v1663_v23 = vsel %vm1640_vm2, %v10487_v52, %v10486_v2  ;;  %v10652_v33 = vrot.slane %v7532_v48, 1  ;;  %v10653_v51 = vrot.slane %v7497_v12, 1  ;;  %v6224_v2 = vpop.f32.mrf.mxu0  ;;  %v10654_v52 = vrot.slane %v7730_v21, 2  ;;  %6291 = vmatprep.subr.bf16.mxu0 %v6623_v7 }
 0x306   : > { %10650 = vst [vmem:[#allocation54_spill] sm:$0xff] %v7746_v19  ;;  %v1754_v38 = vadd.f32 %v1663_v23, %v1533_v4  ;;  %v10655_v48 = vrot.slane %v7536_v11, 2  ;;  %v10656_v12 = vrot.slane %v7500_v37, 2  ;;  %v10657_v23 = vrot.slane %v7546_v58, 3  ;;  %v6624_v58 = vld [vmem:[#allocation7 + $0x68] sm:$0xff]  }
 0x307   : > { %v1643_v3 = vsel %vm1640_vm2, %v10653_v51, %v10652_v33  ;;  %v1884_v1 = vsel %vm1861_vm3, %v10654_v52, %v10488_v5  ;;  %v10658_v33 = vrot.slane %v7541_v46, 3  ;;  %v1368_v51 = vrot.slane %v7736_v31, 4 }
 0x308   : > { %v1745_v54 = vadd.f32 %v1643_v3, %v7509_v60  ;;  %v1864_v4 = vsel %vm1861_vm3, %v10656_v12, %v10655_v48  ;;  %v7788_v3 = vadd.f32 %v1884_v1, %v1754_v38  ;;  %v10660_v11 = vrot.slane %v7503_v10, 3  ;;  %6292 = vmatpush3.bf16.msra.mxu0 %v6623_v7 }
 0x309   : > { %v2087_v60 = vsel %vm2082_vm4, %v10658_v33, %v10657_v23  ;;  %v10659_v52 = vmov %v10658_v33  ;;  %v1446_v12 = vsel %vm1346_vm1, 0.0, %v1368_v51  ;;  %v1468_v23 = vmul.f32 %v7478_v8, %v7736_v31  ;;  %6293 = vmatprep.subr.bf16.mxu0 %v6624_v58 }
 0x30a   : > { %v1966_v19 = vadd.f32 %v1864_v4, %v1745_v54  ;;  %v2085_v37 = vsel %vm2082_vm4, %v10660_v11, %v10659_v52  ;;  %v2188_v48 = vadd.f32 %v2087_v60, %v7565_v50  ;;  %v2189_v1 = vadd.f32 %v7576_v40, %v7567_v9  ;;  %v1238_v4 = vpop.f32.mrf.mxu0 }
 0x30b   : > { %v1373_v45 = vrot.slane %v6224_v2, 4  ;;  %v10661_v46 = vmax.f32 %v7245_v43, 0.0  ;;  %v1504_v10 = vmul.f32 %v7481_v36, %v1446_v12  ;;  %v7807_v50 = vmul.f32 %v7484_v49, %v1446_v12 }
 0x30c   : > { %v2187_v54 = vadd.f32 %v2085_v37, %v1966_v19  ;;  %v7810_v33 = vmul.f32 %v7487_v25, %v1446_v12  ;;  %v7813_v31 = vmul.f32 %v7490_v42, %v1446_v12  ;;  %v10663_v9 = vmax.f32 %v7242_v41, 0.0  ;;  %v6625_v12 = vld [vmem:[#allocation7 + $0x60] sm:$0xff]   ;;  %6294 = vmatpush3.bf16.msra.mxu0 %v6624_v58 }
 0x30d   : > { %v7803_v38 = vadd.f32 %v2188_v48, %v10661_v46  ;;  %v10665_v43 = vrot.slane %v7708_v13, 4  ;;  %v10666_v60 = vmax.f32 %v7236_v39, 0.0  ;;  %v7826_v11 = vadd.f32 %v1504_v10, %v1468_v23  ;;  %v7844_v10 = vpop.f32.mrf.mxu0  ;;  %6295 = vmatprep.subr.bf16.mxu0 %v6625_v12 }
 0x30e   : > { %v7817_v40 = vadd.f32 %v2189_v1, %v10663_v9  ;;  %v1471_v37 = vmul.f32 %v6224_v2, %v7478_v8  ;;  %v1579_v2 = vmul.f32 %v7484_v49, %v1373_v45  ;;  %v7849_v1 = vmul.f32 %v7490_v42, %v1373_v45 }
 0x30f   : > { %10662 = vst [vmem:[#allocation56_spill] sm:$0xff] %v7803_v38  ;;  %v1374_v19 = vsel %vm1346_vm1, %v10665_v43, %v1373_v45  ;;  %v7824_v52 = vadd.f32 %v2187_v54, %v10666_v60  ;;  %v1800_v60 = vmul.f32 %v7487_v25, %v1373_v45  ;;  %v1369_v16 = vrot.slane %v1238_v4, 4 }
 0x310   : > { %10664 = vst [vmem:[#allocation57_spill] sm:$0xff] %v7817_v40  ;;  %v1507_v48 = vmul.f32 %v7481_v36, %v1374_v19  ;;  %v2290_v46 = vpack.c.bf16 %v7560_v14, %v7817_v40  ;;  %v7835_v7 = vmul.f32 %v7484_v49, %v1374_v19  ;;  %v7842_v54 = vmul.f32 %v7487_v25, %v1374_v19 }
 0x311   : > { %10667 = vst [vmem:[#allocation58_spill] sm:$0xff] %v7824_v52  ;;  %v2289_v39 = vpack.c.bf16 %v7803_v38, %v7824_v52  ;;  %v1675_v41 = vrot.slane %v1579_v2, 1  ;;  %v7853_v5 = vmul.f32 %v7490_v42, %v1374_v19  ;;  %v6626_v52 = vld [vmem:[#allocation7 + $0x58] sm:$0xff]   ;;  %v1469_v43 = vmul.f32 %v7478_v8, %v1238_v4  ;;  %6296 = vmatpush3.bf16.msra.mxu0 %v6625_v12 }
 0x312   : > { %v1539_v9 = vadd.f32 %v1507_v48, %v1471_v37  ;;  %v1896_v37 = vrot.slane %v1800_v60, 2  ;;  %v10668_v58 = vrot.slane %v7835_v7, 1  ;;  %v1370_v2 = vsel %vm1346_vm1, %v1368_v51, %v1369_v16  ;;  %6297 = vmatprep.subr.bf16.mxu0 %v6626_v52  ;;  %v6627_v51 = vld [vmem:[#allocation7 + $0x50] sm:$0xff]  }
 0x313   : > { %6257 = vmatprep.mubr.bf16.mxu1 %v2289_v39  ;;  %v10669_v19 = vrot.slane %v7708_v13, 4  ;;  %v10670_v40 = vrot.slane %v7625_v29, 1  ;;  %v10672_v4 = vrot.slane %v7842_v54, 2  ;;  %v1505_v38 = vmul.f32 %v7481_v36, %v1370_v2 }
 0x314   : > { %6258 = vmatmul.mubr.bf16.vlgmr.msra.gmra.mxu1 %v2290_v46  ;;  %v1676_v39 = vsel %vm1640_vm2, %v10668_v58, %v1675_v41  ;;  %v10671_v46 = vrot.slane %v7582_v62, 1  ;;  %v7876_v13 = vmul.f32 %v7484_v49, %v1370_v2  ;;  %v7882_v62 = vmul.f32 %v7487_v25, %v1370_v2  ;;  %v7896_v58 = vpop.f32.mrf.mxu0 }
 0x315   : > { %v1372_v23 = vsel %vm1346_vm1, %v1369_v16, %v10669_v19  ;;  %v1760_v48 = vadd.f32 %v1676_v39, %v1539_v9  ;;  %v1897_v45 = vsel %vm1861_vm3, %v10672_v4, %v1896_v37  ;;  %v1537_v9 = vadd.f32 %v1505_v38, %v1469_v43  ;;  %6298 = vmatpush3.bf16.msra.mxu0 %v6626_v52 }
 0x316   : > { %v1652_v60 = vsel %vm1640_vm2, %v10671_v46, %v10670_v40  ;;  %v1506_v41 = vmul.f32 %v7481_v36, %v1372_v23  ;;  %v7879_v16 = vmul.f32 %v7484_v49, %v1372_v23  ;;  %v7885_v29 = vmul.f32 %v7487_v25, %v1372_v23  ;;  %6299 = vmatprep.subr.bf16.mxu0 %v6627_v51 }
 0x317   : > { %v7887_v40 = vadd.f32 %v1897_v45, %v1760_v48  ;;  %v7890_v37 = vmul.f32 %v7490_v42, %v1370_v2  ;;  %v7894_v12 = vmul.f32 %v7844_v10, %v7478_v8  ;;  %v10493_v39 = vrot.slane %v7876_v13, 1 }
 0x318   : > { %v10492_v19 = vrot.slane %v7879_v16, 1  ;;  %v10496_v46 = vrot.slane %v7882_v62, 2  ;;  %v10495_v4 = vrot.slane %v7885_v29, 2  ;;  %v7903_v48 = vadd.f32 %v1506_v41, %v7762_v32 }
 0x319   : > { %10673 = vst [vmem:[#allocation59_spill] sm:$0xff] %v7887_v40  ;;  %v7906_v38 = vmul.f32 %v7490_v42, %v1372_v23  ;;  %v1749_v45 = vadd.f32 %v1652_v60, %v7596_v22  ;;  %v10674_v23 = vrot.slane %v7635_v24, 2  ;;  %v10675_v41 = vrot.slane %v7585_v61, 2  ;;  %6300 = vmatpush3.bf16.msra.mxu0 %v6627_v51 }
 0x31a   : > { %v1672_v2 = vsel %vm1640_vm2, %v10493_v39, %v10492_v19  ;;  %v1893_v32 = vsel %vm1861_vm3, %v10496_v46, %v10495_v4  ;;  %v10676_v22 = vrot.slane %v7655_v30, 3  ;;  %v10677_v52 = vrot.slane %v7648_v26, 3  ;;  %v6628_v19 = vld [vmem:[#allocation7 + $0x48] sm:$0xff]   ;;  %v6228_v46 = vpop.f32.mrf.mxu0 }
 0x31b   : > { %v1873_v43 = vsel %vm1861_vm3, %v10675_v41, %v10674_v23  ;;  %v1758_v39 = vadd.f32 %v1672_v2, %v1537_v9  ;;  %v10679_v4 = vrot.slane %v7588_v56, 3  ;;  %v1375_v41 = vrot.slane %v7896_v58, 4  ;;  %6301 = vmatprep.subr.bf16.mxu0 %v6628_v19 }
 0x31c   : > { %v2096_v60 = vsel %vm2082_vm4, %v10677_v52, %v10676_v22  ;;  %v1970_v14 = vadd.f32 %v1873_v43, %v1749_v45  ;;  %v10678_v40 = vmov %v10677_v52  ;;  %v1472_v22 = vmul.f32 %v7478_v8, %v7896_v58 }
 0x31d   : > { %v2094_v24 = vsel %vm2082_vm4, %v10679_v4, %v10678_v40  ;;  %v2192_v61 = vadd.f32 %v2096_v60, %v7691_v0  ;;  %v10680_v52 = vrot.slane %v7607_v20, 1  ;;  %v10681_v9 = vrot.slane %v7628_v34, 1  ;;  %6302 = vmatpush3.bf16.msra.mxu0 %v6628_v19 }
 0x31e   : > { %v2191_v43 = vadd.f32 %v2094_v24, %v1970_v14  ;;  %v10682_v56 = vmax.f32 %v7269_v57, 0.0  ;;  %v10684_v4 = vrot.slane %v7610_v63, 2  ;;  %v10685_v45 = vrot.slane %v7638_v59, 2  ;;  %v1254_v24 = vpop.f32.mrf.mxu0 }
 0x31f   : > { %v1656_v26 = vsel %vm1640_vm2, %v10681_v9, %v10680_v52  ;;  %v7955_v58 = vadd.f32 %v1893_v32, %v1758_v39  ;;  %v1447_v20 = vsel %vm1346_vm1, 0.0, %v1375_v41  ;;  %v2097_v34 = vrot.slane %v7614_v44, 3 }
 0x320   : > { %v7947_v40 = vadd.f32 %v2192_v61, %v10682_v56  ;;  %v1751_v0 = vadd.f32 %v1656_v26, %v7652_v17  ;;  %v1877_v2 = vsel %vm1861_vm3, %v10685_v45, %v10684_v4  ;;  %v1380_v14 = vrot.slane %v6228_v46, 4 }
 0x321   : > { %v10686_v57 = vmax.f32 %v7260_v53, 0.0  ;;  %v1508_v17 = vmul.f32 %v7481_v36, %v1447_v20  ;;  %v7965_v63 = vmul.f32 %v7484_v49, %v1447_v20  ;;  %v7968_v59 = vmul.f32 %v7487_v25, %v1447_v20 }
 0x322   : > { %10683 = vst [vmem:[#allocation60_spill] sm:$0xff] %v7947_v40  ;;  %v7971_v51 = vmul.f32 %v7490_v42, %v1447_v20  ;;  %v1972_v39 = vadd.f32 %v1877_v2, %v1751_v0  ;;  %v10688_v44 = vrot.slane %v7655_v30, 3  ;;  %v1475_v53 = vmul.f32 %v6228_v46, %v7478_v8  ;;  %v10690_v0 = vld [vmem:[#allocation47_spill] sm:$0xff] }
 0x323   : > { %v7961_v60 = vadd.f32 %v2191_v43, %v10686_v57  ;;  %v7979_v52 = vadd.f32 %v1508_v17, %v1472_v22  ;;  %v10689_v26 = vrot.slane %v7601_v28, 3  ;;  %v10691_v46 = vrot.slane %v7844_v10, 4 }
 0x324   : > { %v2098_v32 = vsel %vm2082_vm4, %v10688_v44, %v2097_v34  ;;  %v1584_v28 = vmul.f32 %v7484_v49, %v1380_v14 }
 0x325   : > { %10687 = vst [vmem:[#allocation61_spill] sm:$0xff] %v7961_v60  ;;  %v2291_v61 = vpack.c.bf16 %v7947_v40, %v7961_v60  ;;  %v2100_v43 = vsel %vm2082_vm4, %v2097_v34, %v10689_v26  ;;  %v2193_v30 = vadd.f32 %v2098_v32, %v1972_v39  ;;  %v1381_v45 = vsel %vm1346_vm1, %v10691_v46, %v1380_v14  ;;  %v10692_v34 = vld [vmem:[#allocation16_spill] sm:$0xff]  ;;  %v10695_v39 = vld [vmem:[#allocation15_spill] sm:$0xff]  ;;  %v8008_v26 = vpop.f32.mrf.mxu0 }
 0x326   : > { %v2194_v4 = vadd.f32 %v2100_v43, %v10690_v0  ;;  %v1511_v22 = vmul.f32 %v7481_v36, %v1381_v45  ;;  %v7992_v2 = vmul.f32 %v7484_v49, %v1381_v45  ;;  %v7996_v20 = vmul.f32 %v7487_v25, %v1381_v45 }
 0x327   : > { %6261 = vmatprep.mubr.bf16.mxu1 %v2291_v61  ;;  %v10693_v57 = vmax.f32 %v10692_v34, 0.0  ;;  %v10696_v44 = vmax.f32 %v10695_v39, 0.0  ;;  %v1805_v61 = vmul.f32 %v7487_v25, %v1380_v14  ;;  %v1684_v46 = vrot.slane %v1584_v28, 1  ;;  %v8056_v9 = vpop.f32.mrf.mxu0 }
 0x328   : > { %v1543_v43 = vadd.f32 %v1511_v22, %v1475_v53  ;;  %v10497_v0 = vrot.slane %v7992_v2, 1  ;;  %v10498_v56 = vrot.slane %v7996_v20, 2  ;;  %v8021_v39 = vmul.f32 %v7490_v42, %v1381_v45 }
 0x329   : > { %v8001_v17 = vadd.f32 %v2193_v30, %v10693_v57  ;;  %v8005_v32 = vadd.f32 %v2194_v4, %v10696_v44  ;;  %v1905_v34 = vrot.slane %v1805_v61, 2  ;;  %v8015_v30 = vmul.f32 %v7490_v42, %v1380_v14 }
 0x32a   : > { %v1376_v57 = vrot.slane %v1254_v24, 4  ;;  %v1685_v4 = vsel %vm1640_vm2, %v10497_v0, %v1684_v46  ;;  %10699 = vst [vmem:[#allocation62_spill] sm:$0xff] %v8021_v39  ;;  %v1473_v53 = vmul.f32 %v7478_v8, %v1254_v24  ;;  %v8031_v61 = vmul.f32 %v8008_v26, %v7478_v8 }
 0x32b   : > { %10694 = vst [vmem:[#allocation47_spill] sm:$0xff] %v8001_v17  ;;  %10697 = vst [vmem:[#allocation16_spill] sm:$0xff] %v8005_v32  ;;  %v2292_v19 = vpack.c.bf16 %v8005_v32, %v8001_v17  ;;  %v1764_v28 = vadd.f32 %v1685_v4, %v1543_v43  ;;  %v1906_v44 = vsel %vm1861_vm3, %v10498_v56, %v1905_v34  ;;  %v10700_v46 = vrot.slane %v7844_v10, 4 }
 0x32c   : > { %10698 = vst [vmem:[#allocation15_spill] sm:$0xff] %v8015_v30  ;;  %v1377_v14 = vsel %vm1346_vm1, %v1375_v41, %v1376_v57  ;;  %v10715_v60 = vrot.slane %v7751_v55, 3  ;;  %v10722_v40 = vrot.slane %v7740_v6, 2 }
 0x32d   : > { %6262 = vmatmul.mubr.bf16.gmra.mxu1 %v2292_v19  ;;  %v1379_v45 = vsel %vm1346_vm1, %v1376_v57, %v10700_v46  ;;  %v1509_v24 = vmul.f32 %v7481_v36, %v1377_v14  ;;  %v8038_v0 = vmul.f32 %v7484_v49, %v1377_v14  ;;  %v8041_v19 = vmul.f32 %v7487_v25, %v1377_v14 }
 0x32e   : > { %v1510_v41 = vmul.f32 %v7481_v36, %v1379_v45  ;;  %v8046_v34 = vmul.f32 %v7484_v49, %v1379_v45  ;;  %v8049_v4 = vmul.f32 %v7487_v25, %v1379_v45  ;;  %v8054_v56 = vmul.f32 %v7490_v42, %v1377_v14 }
 0x32f   : > { %v1541_v10 = vadd.f32 %v1509_v24, %v1473_v53  ;;  %v8058_v23 = vadd.f32 %v1906_v44, %v1764_v28  ;;  %v8063_v32 = vmul.f32 %v7490_v42, %v1379_v45  ;;  %v10702_v46 = vrot.slane %v7720_v35, 1  ;;  %v10705_v44 = vld [vmem:[#allocation48_spill] sm:$0xff]  ;;  %v10711_v24 = vld [vmem:[#allocation50_spill] sm:$0xff] }
 0x330   : > { %v8066_v53 = vadd.f32 %v1510_v41, %v7894_v12  ;;  %v10703_v14 = vrot.slane %v7679_v47, 1  ;;  %v10704_v28 = vrot.slane %v7730_v21, 2  ;;  %v10706_v43 = vrot.slane %v10705_v44, 2 }
 0x331   : > { %10701 = vst [vmem:[#allocation63_spill] sm:$0xff] %v8058_v23  ;;  %v10707_v45 = vrot.slane %v8046_v34, 1  ;;  %v10708_v17 = vrot.slane %v8038_v0, 1  ;;  %v10709_v41 = vrot.slane %v8049_v4, 2  ;;  %v10710_v35 = vrot.slane %v8041_v19, 2 }
 0x332   : > { %v1661_v57 = vsel %vm1640_vm2, %v10703_v14, %v10702_v46  ;;  %v1882_v22 = vsel %vm1861_vm3, %v10706_v43, %v10704_v28  ;;  %v10712_v21 = vrot.slane %v7744_v18, 3  ;;  %v10713_v14 = vld [vmem:[#allocation49_spill] sm:$0xff]  ;;  %v1382_v23 = vrot.slane %v8056_v9, 4  ;;  %v10719_v18 = vld [vmem:[#allocation55_spill] sm:$0xff] }
 0x333   : > { %v1681_v12 = vsel %vm1640_vm2, %v10708_v17, %v10707_v45  ;;  %v1902_v47 = vsel %vm1861_vm3, %v10710_v35, %v10709_v41  ;;  %v1753_v46 = vadd.f32 %v1661_v57, %v10711_v24  ;;  %v10714_v44 = vrot.slane %v10713_v14, 3  ;;  %v6232_v41 = vpop.f32.mrf.mxu0 }
 0x334   : > { %v1762_v28 = vadd.f32 %v1681_v12, %v1541_v10  ;;  %v10716_v17 = vmov %v10712_v21  ;;  %v1476_v24 = vmul.f32 %v7478_v8, %v8056_v9  ;;  %v10718_v10 = vrot.slane %v7727_v15, 1  ;;  %v10724_v9 = vld [vmem:[#allocation20_spill] sm:$0xff] }
 0x335   : > { %v2103_v43 = vsel %vm2082_vm4, %v10714_v44, %v10712_v21  ;;  %v2105_v45 = vsel %vm2082_vm4, %v10716_v17, %v10715_v60  ;;  %v1974_v35 = vadd.f32 %v1882_v22, %v1753_v46  ;;  %v10717_v21 = vrot.slane %v7699_v27, 1  ;;  %v10720_v60 = vld [vmem:[#allocation51_spill] sm:$0xff] }
 0x336   : > { %v2196_v57 = vadd.f32 %v2105_v45, %v7788_v3  ;;  %v1448_v14 = vsel %vm1346_vm1, 0.0, %v1382_v23  ;;  %v10721_v17 = vrot.slane %v10720_v60, 2  ;;  %v10723_v3 = vld [vmem:[#allocation53_spill] sm:$0xff]  ;;  %v10725_v30 = vmax.f32 %v10724_v9, 0.0 }
 0x337   : > { %v1665_v12 = vsel %vm1640_vm2, %v10718_v10, %v10717_v21  ;;  %v2106_v46 = vrot.slane %v10723_v3, 3  ;;  %v2195_v45 = vadd.f32 %v2103_v43, %v1974_v35  ;;  %v1512_v15 = vmul.f32 %v7481_v36, %v1448_v14  ;;  %v10727_v43 = vld [vmem:[#allocation17_spill] sm:$0xff] }
 0x338   : > { %v1755_v44 = vadd.f32 %v1665_v12, %v10719_v18  ;;  %v1886_v22 = vsel %vm1861_vm3, %v10722_v40, %v10721_v17  ;;  %v8120_v27 = vadd.f32 %v2196_v57, %v10725_v30  ;;  %v8124_v21 = vmul.f32 %v7484_v49, %v1448_v14  ;;  %v1270_v18 = vpop.f32.mrf.mxu0 }
 0x339   : > { %v8126_v10 = vadd.f32 %v1902_v47, %v1762_v28  ;;  %v8129_v12 = vmul.f32 %v7487_v25, %v1448_v14  ;;  %v8132_v6 = vmul.f32 %v7490_v42, %v1448_v14  ;;  %v10728_v35 = vmax.f32 %v10727_v43, 0.0  ;;  %v10731_v47 = vld [vmem:[#allocation52_spill] sm:$0xff]  ;;  %v10734_v43 = vld [vmem:[#allocation19_spill] sm:$0xff] }
 0x33a   : > { %10726 = vst [vmem:[#allocation48_spill] sm:$0xff] %v8120_v27  ;;  %v1976_v40 = vadd.f32 %v1886_v22, %v1755_v44  ;;  %v8138_v30 = vadd.f32 %v1512_v15, %v1476_v24  ;;  %v10730_v57 = vrot.slane %v7751_v55, 3  ;;  %v10732_v28 = vrot.slane %v10731_v47, 3  ;;  %v10733_v22 = vld [vmem:[#allocation54_spill] sm:$0xff] }
 0x33b   : > { %v8136_v60 = vadd.f32 %v2195_v45, %v10728_v35  ;;  %v1387_v15 = vrot.slane %v6232_v41, 4  ;;  %v1479_v55 = vmul.f32 %v6232_v41, %v7478_v8  ;;  %v10735_v35 = vmax.f32 %v10734_v43, 0.0 }
 0x33c   : > { %v2107_v17 = vsel %vm2082_vm4, %v10730_v57, %v2106_v46  ;;  %v2109_v3 = vsel %vm2082_vm4, %v2106_v46, %v10732_v28  ;;  %v10737_v46 = vld [vmem:[#allocation18_spill] sm:$0xff]  ;;  %v1383_v14 = vrot.slane %v1270_v18, 4 }
 0x33d   : > { %10729 = vst [vmem:[#allocation50_spill] sm:$0xff] %v8136_v60  ;;  %v2197_v44 = vadd.f32 %v2107_v17, %v1976_v40  ;;  %v2198_v39 = vadd.f32 %v2109_v3, %v10733_v22  ;;  %v2293_v45 = vpack.c.bf16 %v8120_v27, %v8136_v60  ;;  %v10738_v47 = vmax.f32 %v10737_v46, 0.0  ;;  %v8162_v17 = vpop.f32.mrf.mxu0 }
 0x33e   : > { %v1477_v40 = vmul.f32 %v7478_v8, %v1270_v18  ;;  %v10740_v3 = vrot.slane %v8008_v26, 4  ;;  %v1589_v41 = vmul.f32 %v7484_v49, %v1387_v15  ;;  %v1810_v43 = vmul.f32 %v7487_v25, %v1387_v15 }
 0x33f   : > { %v8155_v57 = vadd.f32 %v2197_v44, %v10735_v35  ;;  %v8159_v28 = vadd.f32 %v2198_v39, %v10738_v47  ;;  %6265 = vmatprep.mubr.bf16.mxu1 %v2293_v45  ;;  %v8170_v44 = vmul.f32 %v7490_v42, %v1387_v15  ;;  %v10743_v60 = vrot.slane %v8008_v26, 4 }
 0x340   : > { %v1388_v22 = vsel %vm1346_vm1, %v10740_v3, %v1387_v15  ;;  %v1693_v46 = vrot.slane %v1589_v41, 1  ;;  %v1914_v47 = vrot.slane %v1810_v43, 2 }
 0x341   : > { %10736 = vst [vmem:[#allocation49_spill] sm:$0xff] %v8155_v57  ;;  %10739 = vst [vmem:[#allocation55_spill] sm:$0xff] %v8159_v28  ;;  %v2294_v39 = vpack.c.bf16 %v8159_v28, %v8155_v57  ;;  %v1515_v35 = vmul.f32 %v7481_v36, %v1388_v22  ;;  %v8176_v18 = vmul.f32 %v7484_v49, %v1388_v22 }
 0x342   : > { %10741 = vst [vmem:[#allocation51_spill] sm:$0xff] %v8170_v44  ;;  %v8179_v45 = vmul.f32 %v7487_v25, %v1388_v22  ;;  %v8182_v3 = vmul.f32 %v7490_v42, %v1388_v22  ;;  %v1384_v57 = vsel %vm1346_vm1, %v1382_v23, %v1383_v14  ;;  %v1386_v27 = vsel %vm1346_vm1, %v1383_v14, %v10743_v60  ;;  %v8218_v44 = vpop.f32.mrf.mxu0 }
 0x343   : > { %6266 = vmatmul.mubr.bf16.gmra.mxu1 %v2294_v39  ;;  %v1547_v15 = vadd.f32 %v1515_v35, %v1479_v55  ;;  %v10508_v9 = vrot.slane %v8176_v18, 1  ;;  %v1513_v41 = vmul.f32 %v7481_v36, %v1384_v57  ;;  %v8193_v43 = vmul.f32 %v7484_v49, %v1384_v57 }
 0x344   : > { %10742 = vst [vmem:[#allocation53_spill] sm:$0xff] %v8182_v3  ;;  %v10510_v28 = vrot.slane %v8179_v45, 2  ;;  %v8196_v22 = vmul.f32 %v7487_v25, %v1384_v57  ;;  %v1514_v23 = vmul.f32 %v7481_v36, %v1386_v27  ;;  %v8204_v26 = vmul.f32 %v7484_v49, %v1386_v27 }
 0x345   : > { %v1694_v55 = vsel %vm1640_vm2, %v10508_v9, %v1693_v46  ;;  %v1545_v14 = vadd.f32 %v1513_v41, %v1477_v40  ;;  %v10512_v35 = vrot.slane %v8193_v43, 1  ;;  %v8208_v24 = vmul.f32 %v7487_v25, %v1386_v27 }
 0x346   : > { %v1768_v60 = vadd.f32 %v1694_v55, %v1547_v15  ;;  %v1915_v3 = vsel %vm1861_vm3, %v10510_v28, %v1914_v47  ;;  %v10511_v46 = vrot.slane %v8204_v26, 1  ;;  %v10514_v39 = vrot.slane %v8196_v22, 2 }
 0x347   : > { %v8216_v9 = vmul.f32 %v7490_v42, %v1384_v57  ;;  %v8223_v40 = vadd.f32 %v1514_v23, %v8031_v61  ;;  %v10513_v41 = vrot.slane %v8208_v24, 2  ;;  %v8227_v55 = vmul.f32 %v7490_v42, %v1386_v27 }
 0x348   : > { %v8220_v15 = vadd.f32 %v1915_v3, %v1768_v60  ;;  %v1690_v47 = vsel %vm1640_vm2, %v10512_v35, %v10511_v46  ;;  %v8237_v3 = vmul.f32 %v8162_v17, %v7478_v8  ;;  %v10745_v61 = vrot.slane %v7876_v13, 1 }
 0x349   : > { %v10746_v23 = vrot.slane %v7807_v50, 1  ;;  %v1766_v27 = vadd.f32 %v1690_v47, %v1545_v14  ;;  %v1911_v28 = vsel %vm1861_vm3, %v10514_v39, %v10513_v41  ;;  %v10747_v57 = vrot.slane %v7882_v62, 2 }
 0x34a   : > { %10744 = vst [vmem:[#allocation20_spill] sm:$0xff] %v8220_v15  ;;  %v10748_v35 = vrot.slane %v7810_v33, 2  ;;  %v10749_v50 = vrot.slane %v7890_v37, 3  ;;  %v10750_v14 = vrot.slane %v7813_v31, 3  ;;  %v1389_v62 = vrot.slane %v8218_v44, 4 }
 0x34b   : > { %v1670_v60 = vsel %vm1640_vm2, %v10746_v23, %v10745_v61  ;;  %v10751_v61 = vrot.slane %v7906_v38, 3  ;;  %v10753_v41 = vrot.slane %v7835_v7, 1  ;;  %v10754_v31 = vrot.slane %v7879_v16, 1 }
 0x34c   : > { %v1757_v46 = vadd.f32 %v1670_v60, %v7826_v11  ;;  %v1891_v15 = vsel %vm1861_vm3, %v10748_v35, %v10747_v57  ;;  %v2112_v47 = vsel %vm2082_vm4, %v10750_v14, %v10749_v50  ;;  %v10752_v23 = vmov %v10749_v50  ;;  %v6236_v60 = vpop.f32.mrf.mxu0 }
 0x34d   : > { %v2114_v11 = vsel %vm2082_vm4, %v10752_v23, %v10751_v61  ;;  %v1480_v57 = vmul.f32 %v7478_v8, %v8218_v44  ;;  %v1674_v50 = vsel %vm1640_vm2, %v10754_v31, %v10753_v41  ;;  %v1449_v14 = vsel %vm1346_vm1, 0.0, %v1389_v62  ;;  %v10757_v44 = vld [vmem:[#allocation24_spill] sm:$0xff] }
 0x34e   : > { %v1978_v33 = vadd.f32 %v1891_v15, %v1757_v46  ;;  %v2200_v35 = vadd.f32 %v2114_v11, %v7955_v58  ;;  %v1759_v37 = vadd.f32 %v1674_v50, %v7903_v48  ;;  %v10755_v61 = vrot.slane %v7842_v54, 2 }
 0x34f   : > { %v10756_v23 = vrot.slane %v7885_v29, 2  ;;  %v2115_v58 = vrot.slane %v7853_v5, 3  ;;  %v10758_v11 = vmax.f32 %v10757_v44, 0.0  ;;  %v1516_v16 = vmul.f32 %v7481_v36, %v1449_v14  ;;  %v1286_v5 = vpop.f32.mrf.mxu0 }
 0x350   : > { %v2199_v15 = vadd.f32 %v2112_v47, %v1978_v33  ;;  %v8289_v41 = vmul.f32 %v7484_v49, %v1449_v14  ;;  %v8291_v31 = vadd.f32 %v1911_v28, %v1766_v27  ;;  %v8294_v54 = vmul.f32 %v7487_v25, %v1449_v14  ;;  %v10760_v47 = vld [vmem:[#allocation21_spill] sm:$0xff] }
 0x351   : > { %v1895_v46 = vsel %vm1861_vm3, %v10756_v23, %v10755_v61  ;;  %v8285_v7 = vadd.f32 %v2200_v35, %v10758_v11  ;;  %v8297_v29 = vmul.f32 %v7490_v42, %v1449_v14  ;;  %v10761_v33 = vmax.f32 %v10760_v47, 0.0  ;;  %v10766_v47 = vld [vmem:[#allocation23_spill] sm:$0xff] }
 0x352   : > { %v1980_v48 = vadd.f32 %v1895_v46, %v1759_v37  ;;  %v8303_v35 = vadd.f32 %v1516_v16, %v1480_v57  ;;  %v10763_v61 = vrot.slane %v7906_v38, 3  ;;  %v10764_v28 = vrot.slane %v7849_v1, 3  ;;  %v10765_v46 = vld [vmem:[#allocation59_spill] sm:$0xff] }
 0x353   : > { %10759 = vst [vmem:[#allocation17_spill] sm:$0xff] %v8285_v7  ;;  %v8301_v50 = vadd.f32 %v2199_v15, %v10761_v33  ;;  %v1394_v16 = vrot.slane %v6236_v60, 4  ;;  %v1483_v38 = vmul.f32 %v6236_v60, %v7478_v8  ;;  %v10767_v33 = vmax.f32 %v10766_v47, 0.0 }
 0x354   : > { %v2116_v23 = vsel %vm2082_vm4, %v10763_v61, %v2115_v58  ;;  %v2118_v27 = vsel %vm2082_vm4, %v2115_v58, %v10764_v28  ;;  %v10769_v58 = vld [vmem:[#allocation22_spill] sm:$0xff]  ;;  %v1390_v14 = vrot.slane %v1286_v5, 4 }
 0x355   : > { %10762 = vst [vmem:[#allocation52_spill] sm:$0xff] %v8301_v50  ;;  %v2201_v37 = vadd.f32 %v2116_v23, %v1980_v48  ;;  %v2202_v11 = vadd.f32 %v2118_v27, %v10765_v46  ;;  %v2295_v15 = vpack.c.bf16 %v8285_v7, %v8301_v50  ;;  %v10770_v61 = vmax.f32 %v10769_v58, 0.0  ;;  %v8327_v23 = vpop.f32.mrf.mxu0 }
 0x356   : > { %v1481_v48 = vmul.f32 %v7478_v8, %v1286_v5  ;;  %v10772_v27 = vrot.slane %v8162_v17, 4  ;;  %v1594_v60 = vmul.f32 %v7484_v49, %v1394_v16  ;;  %v1815_v47 = vmul.f32 %v7487_v25, %v1394_v16 }
 0x357   : > { %v8320_v1 = vadd.f32 %v2201_v37, %v10767_v33  ;;  %v8324_v28 = vadd.f32 %v2202_v11, %v10770_v61  ;;  %6269 = vmatprep.mubr.bf16.mxu1 %v2295_v15  ;;  %v8335_v37 = vmul.f32 %v7490_v42, %v1394_v16  ;;  %v1391_v39 = vsel %vm1346_vm1, %v1389_v62, %v1390_v14 }
 0x358   : > { %v1395_v46 = vsel %vm1346_vm1, %v10772_v27, %v1394_v16  ;;  %v1702_v58 = vrot.slane %v1594_v60, 1  ;;  %v1923_v61 = vrot.slane %v1815_v47, 2  ;;  %v1517_v60 = vmul.f32 %v7481_v36, %v1391_v39 }
 0x359   : > { %10768 = vst [vmem:[#allocation54_spill] sm:$0xff] %v8320_v1  ;;  %10771 = vst [vmem:[#allocation19_spill] sm:$0xff] %v8324_v28  ;;  %v2296_v11 = vpack.c.bf16 %v8324_v28, %v8320_v1  ;;  %v1519_v33 = vmul.f32 %v7481_v36, %v1395_v46  ;;  %v8341_v5 = vmul.f32 %v7484_v49, %v1395_v46  ;;  %v10773_v28 = vrot.slane %v8162_v17, 4 }
 0x35a   : > { %v8344_v15 = vmul.f32 %v7487_v25, %v1395_v46  ;;  %v8347_v27 = vmul.f32 %v7490_v42, %v1395_v46  ;;  %v8358_v47 = vmul.f32 %v7484_v49, %v1391_v39  ;;  %v8361_v46 = vmul.f32 %v7487_v25, %v1391_v39 }
 0x35b   : > { %6270 = vmatmul.mubr.bf16.gmra.mxu1 %v2296_v11  ;;  %v1551_v16 = vadd.f32 %v1519_v33, %v1483_v38  ;;  %v10518_v44 = vrot.slane %v8341_v5, 1  ;;  %v1393_v1 = vsel %vm1346_vm1, %v1390_v14, %v10773_v28  ;;  %v1549_v28 = vadd.f32 %v1517_v60, %v1481_v48 }
 0x35c   : > { %v10520_v13 = vrot.slane %v8344_v15, 2  ;;  %v1518_v62 = vmul.f32 %v7481_v36, %v1393_v1  ;;  %v8369_v17 = vmul.f32 %v7484_v49, %v1393_v1  ;;  %v10522_v33 = vrot.slane %v8358_v47, 1 }
 0x35d   : > { %v1703_v38 = vsel %vm1640_vm2, %v10518_v44, %v1702_v58  ;;  %v8373_v57 = vmul.f32 %v7487_v25, %v1393_v1  ;;  %v10524_v11 = vrot.slane %v8361_v46, 2  ;;  %v8381_v44 = vmul.f32 %v7490_v42, %v1391_v39 }
 0x35e   : > { %v1772_v14 = vadd.f32 %v1703_v38, %v1551_v16  ;;  %v1924_v50 = vsel %vm1861_vm3, %v10520_v13, %v1923_v61  ;;  %v10521_v58 = vrot.slane %v8369_v17, 1  ;;  %v8386_v48 = vadd.f32 %v1518_v62, %v8237_v3  ;;  %v8392_v38 = vpop.f32.mrf.mxu0 }
 0x35f   : > { %v10523_v16 = vrot.slane %v8373_v57, 2  ;;  %v8390_v60 = vmul.f32 %v7490_v42, %v1393_v1  ;;  %v10775_v3 = vrot.slane %v8038_v0, 1  ;;  %v10776_v62 = vrot.slane %v7965_v63, 1 }
 0x360   : > { %v8383_v7 = vadd.f32 %v1924_v50, %v1772_v14  ;;  %v1699_v61 = vsel %vm1640_vm2, %v10522_v33, %v10521_v58  ;;  %v8402_v50 = vmul.f32 %v8327_v23, %v7478_v8  ;;  %v10777_v39 = vrot.slane %v8041_v19, 2 }
 0x361   : > { %v1679_v1 = vsel %vm1640_vm2, %v10776_v62, %v10775_v3  ;;  %v1770_v14 = vadd.f32 %v1699_v61, %v1549_v28  ;;  %v1920_v13 = vsel %vm1861_vm3, %v10524_v11, %v10523_v16  ;;  %v10778_v33 = vrot.slane %v7968_v59, 2 }
 0x362   : > { %10774 = vst [vmem:[#allocation18_spill] sm:$0xff] %v8383_v7  ;;  %v1761_v58 = vadd.f32 %v1679_v1, %v7979_v52  ;;  %v10779_v63 = vrot.slane %v8054_v56, 3  ;;  %v10780_v28 = vrot.slane %v7971_v51, 3  ;;  %v10781_v3 = vrot.slane %v8063_v32, 3 }
 0x363   : > { %v1900_v7 = vsel %vm1861_vm3, %v10778_v33, %v10777_v39  ;;  %v1396_v19 = vrot.slane %v8392_v38, 4  ;;  %v1484_v33 = vmul.f32 %v7478_v8, %v8392_v38  ;;  %v10783_v39 = vrot.slane %v7992_v2, 1 }
 0x364   : > { %v2121_v61 = vsel %vm2082_vm4, %v10780_v28, %v10779_v63  ;;  %v10782_v62 = vmov %v10779_v63  ;;  %v1982_v1 = vadd.f32 %v1900_v7, %v1761_v58  ;;  %v10784_v51 = vrot.slane %v8046_v34, 1  ;;  %v6240_v28 = vpop.f32.mrf.mxu0  ;;  %v10787_v58 = vld [vmem:[#allocation62_spill] sm:$0xff] }
 0x365   : > { %v2123_v52 = vsel %vm2082_vm4, %v10782_v62, %v10781_v3  ;;  %v1450_v16 = vsel %vm1346_vm1, 0.0, %v1396_v19  ;;  %v10785_v3 = vrot.slane %v7996_v20, 2  ;;  %v10786_v7 = vrot.slane %v8049_v4, 2 }
 0x366   : > { %v2204_v59 = vadd.f32 %v2123_v52, %v8126_v10  ;;  %v1683_v63 = vsel %vm1640_vm2, %v10784_v51, %v10783_v39  ;;  %v2124_v62 = vrot.slane %v10787_v58, 3  ;;  %v2203_v38 = vadd.f32 %v2121_v61, %v1982_v1  ;;  %v10788_v52 = vld [vmem:[#allocation28_spill] sm:$0xff]  ;;  %v10794_v58 = vld [vmem:[#allocation15_spill] sm:$0xff] }
 0x367   : > { %v1763_v56 = vadd.f32 %v1683_v63, %v8066_v53  ;;  %v1904_v10 = vsel %vm1861_vm3, %v10786_v7, %v10785_v3  ;;  %v10789_v2 = vmax.f32 %v10788_v52, 0.0  ;;  %v1520_v34 = vmul.f32 %v7481_v36, %v1450_v16  ;;  %v10791_v63 = vld [vmem:[#allocation25_spill] sm:$0xff]  ;;  %v1302_v52 = vpop.f32.mrf.mxu0 }
 0x368   : > { %v8454_v39 = vmul.f32 %v7484_v49, %v1450_v16  ;;  %v8456_v51 = vadd.f32 %v1920_v13, %v1770_v14  ;;  %v8459_v20 = vmul.f32 %v7487_v25, %v1450_v16  ;;  %v8462_v4 = vmul.f32 %v7490_v42, %v1450_v16 }
 0x369   : > { %v8450_v0 = vadd.f32 %v2204_v59, %v10789_v2  ;;  %v1984_v53 = vadd.f32 %v1904_v10, %v1763_v56  ;;  %v10792_v61 = vmax.f32 %v10791_v63, 0.0  ;;  %v8468_v59 = vadd.f32 %v1520_v34, %v1484_v33  ;;  %v6629_v2 = vld [vmem:[#allocation7 + $0x40] sm:$0xff]  }
 0x36a   : > { %v10793_v3 = vrot.slane %v8063_v32, 3  ;;  %v10795_v13 = vrot.slane %v10794_v58, 3  ;;  %v10796_v63 = vld [vmem:[#allocation63_spill] sm:$0xff]  ;;  %v1401_v34 = vrot.slane %v6240_v28, 4  ;;  %6303 = vmatprep.subr.bf16.mxu0 %v6629_v2 }
 0x36b   : > { %10790 = vst [vmem:[#allocation24_spill] sm:$0xff] %v8450_v0  ;;  %v8466_v1 = vadd.f32 %v2203_v38, %v10792_v61  ;;  %v1487_v61 = vmul.f32 %v6240_v28, %v7478_v8  ;;  %6304 = vmatpush3.bf16.msra.mxu0 %v6629_v2 }
 0x36c   : > { %v2125_v7 = vsel %vm2082_vm4, %v10793_v3, %v2124_v62  ;;  %v2127_v14 = vsel %vm2082_vm4, %v2124_v62, %v10795_v13  ;;  %v10797_v3 = vld [vmem:[#allocation27_spill] sm:$0xff]  ;;  %v10800_v13 = vld [vmem:[#allocation26_spill] sm:$0xff]  ;;  %v1599_v28 = vmul.f32 %v7484_v49, %v1401_v34  ;;  %v1820_v32 = vmul.f32 %v7487_v25, %v1401_v34 }
 0x36d   : > { %v2205_v10 = vadd.f32 %v2125_v7, %v1984_v53  ;;  %v2206_v38 = vadd.f32 %v2127_v14, %v10796_v63  ;;  %v2297_v33 = vpack.c.bf16 %v8450_v0, %v8466_v1  ;;  %v10798_v62 = vmax.f32 %v10797_v3, 0.0 }
 0x36e   : > { %v10801_v16 = vmax.f32 %v10800_v13, 0.0  ;;  %v1397_v53 = vrot.slane %v1302_v52, 4  ;;  %v1485_v7 = vmul.f32 %v7478_v8, %v1302_v52  ;;  %v10803_v14 = vrot.slane %v8327_v23, 4 }
 0x36f   : > { %v8485_v58 = vadd.f32 %v2205_v10, %v10798_v62  ;;  %6273 = vmatprep.mubr.bf16.mxu1 %v2297_v33  ;;  %v8498_v10 = vmul.f32 %v7490_v42, %v1401_v34  ;;  %v1711_v2 = vrot.slane %v1599_v28, 1  ;;  %v1932_v33 = vrot.slane %v1820_v32, 2 }
 0x370   : > { %v8489_v11 = vadd.f32 %v2206_v38, %v10801_v16  ;;  %v1402_v63 = vsel %vm1346_vm1, %v10803_v14, %v1401_v34  ;;  %v10804_v62 = vrot.slane %v8193_v43, 1  ;;  %v10805_v34 = vrot.slane %v8124_v21, 1 }
 0x371   : > { %10799 = vst [vmem:[#allocation21_spill] sm:$0xff] %v8485_v58  ;;  %v1523_v38 = vmul.f32 %v7481_v36, %v1402_v63  ;;  %v8504_v8 = vmul.f32 %v7484_v49, %v1402_v63  ;;  %v8507_v52 = vmul.f32 %v7487_v25, %v1402_v63  ;;  %v8510_v3 = vmul.f32 %v7490_v42, %v1402_v63 }
 0x372   : > { %10802 = vst [vmem:[#allocation59_spill] sm:$0xff] %v8489_v11  ;;  %v2298_v16 = vpack.c.bf16 %v8489_v11, %v8485_v58  ;;  %v1688_v13 = vsel %vm1640_vm2, %v10805_v34, %v10804_v62  ;;  %v1398_v58 = vsel %vm1346_vm1, %v1396_v19, %v1397_v53  ;;  %v10806_v28 = vrot.slane %v8327_v23, 4 }
 0x373   : > { %v1555_v14 = vadd.f32 %v1523_v38, %v1487_v61  ;;  %v1709_v56 = vrot.slane %v8504_v8, 1  ;;  %v1930_v11 = vrot.slane %v8507_v52, 2  ;;  %v1521_v63 = vmul.f32 %v7481_v36, %v1398_v58 }
 0x374   : > { %6274 = vmatmul.mubr.bf16.gmra.mxu1 %v2298_v16  ;;  %v1400_v32 = vsel %vm1346_vm1, %v1397_v53, %v10806_v28  ;;  %v1596_v43 = vmul.f32 %v7484_v49, %v1398_v58  ;;  %v8526_v21 = vmul.f32 %v7487_v25, %v1398_v58  ;;  %v2038_v16 = vmul.f32 %v7490_v42, %v1398_v58 }
 0x375   : > { %v1712_v61 = vsel %vm1640_vm2, %v1709_v56, %v1711_v2  ;;  %v1522_v38 = vmul.f32 %v7481_v36, %v1400_v32  ;;  %v8534_v19 = vmul.f32 %v7484_v49, %v1400_v32  ;;  %v1553_v53 = vadd.f32 %v1521_v63, %v1485_v7 }
 0x376   : > { %v1776_v23 = vadd.f32 %v1712_v61, %v1555_v14  ;;  %v1705_v62 = vrot.slane %v1596_v43, 1  ;;  %v8537_v34 = vmul.f32 %v7487_v25, %v1400_v32  ;;  %v1933_v28 = vsel %vm1861_vm3, %v1930_v11, %v1932_v33 }
 0x377   : > { %v1707_v0 = vrot.slane %v8534_v19, 1  ;;  %v1926_v2 = vrot.slane %v8526_v21, 2  ;;  %v1554_v36 = vadd.f32 %v1522_v38, %v8402_v50  ;;  %v8548_v7 = vmul.f32 %v7490_v42, %v1400_v32 }
 0x378   : > { %v1928_v49 = vrot.slane %v8537_v34, 2  ;;  %v1765_v25 = vadd.f32 %v1688_v13, %v8138_v30  ;;  %v8551_v14 = vadd.f32 %v1933_v28, %v1776_v23  ;;  %v2147_v33 = vrot.slane %v2038_v16, 3  ;;  %v10815_v28 = vld [vmem:[#allocation53_spill] sm:$0xff] }
 0x379   : > { %v1708_v63 = vsel %vm1640_vm2, %v1705_v62, %v1707_v0  ;;  %v10807_v43 = vrot.slane %v8196_v22, 2  ;;  %v10808_v21 = vrot.slane %v8129_v12, 2  ;;  %v10809_v32 = vrot.slane %v8216_v9, 3  ;;  %v10865_v34 = vld [vmem:[#allocation37_spill] sm:$0xff] }
 0x37a   : > { %v1774_v61 = vadd.f32 %v1708_v63, %v1553_v53  ;;  %v1929_v50 = vsel %vm1861_vm3, %v1926_v2, %v1928_v49  ;;  %v10810_v30 = vrot.slane %v8132_v6, 3  ;;  %v2149_v16 = vrot.slane %v8548_v7, 3 }
 0x37b   : > { %v1909_v58 = vsel %vm1861_vm3, %v10808_v21, %v10807_v43  ;;  %v10811_v22 = vrot.slane %v8227_v55, 3  ;;  %v10812_v12 = vmov %v10809_v32  ;;  %v10813_v19 = vrot.slane %v8176_v18, 1 }
 0x37c   : > { %v1986_v42 = vadd.f32 %v1909_v58, %v1765_v25  ;;  %v2130_v13 = vsel %vm2082_vm4, %v10810_v30, %v10809_v32  ;;  %v10814_v23 = vrot.slane %v8204_v26, 1  ;;  %v2133_v25 = vrot.slane %v10815_v28, 3  ;;  %v10819_v32 = vld [vmem:[#allocation51_spill] sm:$0xff] }
 0x37d   : > { %v2132_v38 = vsel %vm2082_vm4, %v10812_v12, %v10811_v22  ;;  %v10816_v7 = vrot.slane %v8179_v45, 2  ;;  %v10817_v21 = vrot.slane %v8208_v24, 2  ;;  %v1995_v58 = vadd.f32 %v1929_v50, %v1774_v61  ;;  %v10823_v45 = vld [vmem:[#allocation29_spill] sm:$0xff]  ;;  %v10825_v12 = vld [vmem:[#allocation32_spill] sm:$0xff] }
 0x37e   : > { %v1692_v53 = vsel %vm1640_vm2, %v10814_v23, %v10813_v19  ;;  %v2207_v63 = vadd.f32 %v2130_v13, %v1986_v42  ;;  %v2208_v6 = vadd.f32 %v2132_v38, %v8291_v31  ;;  %v10818_v18 = vmov %v10811_v22  ;;  %v10827_v38 = vld [vmem:[#allocation20_spill] sm:$0xff] }
 0x37f   : > { %v1767_v43 = vadd.f32 %v1692_v53, %v8223_v40  ;;  %v1913_v9 = vsel %vm1861_vm3, %v10817_v21, %v10816_v7  ;;  %v2134_v26 = vsel %vm2082_vm4, %v10818_v18, %v2133_v25  ;;  %v10820_v30 = vrot.slane %v10819_v32, 3  ;;  %v10836_v32 = vld [vmem:[#allocation30_spill] sm:$0xff] }
 0x380   : > { %v10821_v42 = vrot.slane %v8358_v47, 1  ;;  %v10822_v31 = vrot.slane %v8289_v41, 1  ;;  %v10824_v13 = vmax.f32 %v10823_v45, 0.0  ;;  %v10826_v61 = vmax.f32 %v10825_v12, 0.0 }
 0x381   : > { %v2136_v22 = vsel %vm2082_vm4, %v2133_v25, %v10820_v30  ;;  %v1988_v55 = vadd.f32 %v1913_v9, %v1767_v43  ;;  %v10828_v53 = vrot.slane %v8361_v46, 2  ;;  %v10829_v47 = vrot.slane %v8294_v54, 2 }
 0x382   : > { %v1697_v40 = vsel %vm1640_vm2, %v10822_v31, %v10821_v42  ;;  %v8599_v24 = vadd.f32 %v2207_v63, %v10824_v13  ;;  %v8603_v50 = vadd.f32 %v2208_v6, %v10826_v61  ;;  %v2210_v19 = vadd.f32 %v2136_v22, %v10827_v38  ;;  %v10839_v31 = vld [vmem:[#allocation31_spill] sm:$0xff] }
 0x383   : > { %v1769_v23 = vadd.f32 %v1697_v40, %v8303_v35  ;;  %v1918_v41 = vsel %vm1861_vm3, %v10829_v47, %v10828_v53  ;;  %v10830_v28 = vrot.slane %v8390_v60, 3  ;;  %v10831_v25 = vrot.slane %v8381_v44, 3  ;;  %v10842_v44 = vld [vmem:[#allocation36_spill] sm:$0xff] }
 0x384   : > { %v10832_v6 = vrot.slane %v8341_v5, 1  ;;  %v10833_v43 = vrot.slane %v8369_v17, 1  ;;  %v2299_v35 = vpack.c.bf16 %v8603_v50, %v8599_v24  ;;  %v2209_v46 = vadd.f32 %v2134_v26, %v1988_v55 }
 0x385   : > { %v2141_v63 = vsel %vm2082_vm4, %v10831_v25, %v10830_v28  ;;  %v10834_v54 = vmov %v10831_v25  ;;  %v10835_v21 = vrot.slane %v8297_v29, 3  ;;  %v10837_v30 = vmax.f32 %v10836_v32, 0.0 }
 0x386   : > { %v1701_v7 = vsel %vm1640_vm2, %v10833_v43, %v10832_v6  ;;  %v2212_v18 = vadd.f32 %v2141_v63, %v8456_v51  ;;  %v1990_v5 = vadd.f32 %v1918_v41, %v1769_v23  ;;  %v2142_v42 = vrot.slane %v8347_v27, 3  ;;  %6277 = vmatprep.mubr.bf16.mxu1 %v2299_v35 }
 0x387   : > { %v2139_v9 = vsel %vm2082_vm4, %v10835_v21, %v10834_v54  ;;  %v8632_v22 = vadd.f32 %v2210_v19, %v10837_v30  ;;  %v1771_v17 = vadd.f32 %v1701_v7, %v8386_v48  ;;  %v10840_v26 = vmax.f32 %v10839_v31, 0.0 }
 0x388   : > { %v10843_v29 = vmax.f32 %v10842_v44, 0.0  ;;  %v10845_v51 = vrot.slane %v8344_v15, 2  ;;  %v10846_v13 = vrot.slane %v8373_v57, 2  ;;  %v10847_v61 = vrot.slane %v8454_v39, 1  ;;  %v10851_v39 = vld [vmem:[#allocation18_spill] sm:$0xff] }
 0x389   : > { %10838 = vst [vmem:[#allocation23_spill] sm:$0xff] %v8632_v22  ;;  %v8638_v40 = vadd.f32 %v2209_v46, %v10840_v26  ;;  %v2211_v27 = vadd.f32 %v2139_v9, %v1990_v5  ;;  %v10848_v38 = vrot.slane %v8335_v37, 3  ;;  %v10849_v23 = vrot.slane %v8459_v20, 2  ;;  %v10856_v46 = vld [vmem:[#allocation35_spill] sm:$0xff] }
 0x38a   : > { %v8642_v45 = vadd.f32 %v2212_v18, %v10843_v29  ;;  %v1922_v12 = vsel %vm1861_vm3, %v10846_v13, %v10845_v51  ;;  %v1706_v48 = vsel %vm1640_vm2, %v10847_v61, %v1705_v62  ;;  %v10850_v57 = vmov %v10830_v28  ;;  %v10852_v28 = vld [vmem:[#allocation33_spill] sm:$0xff]  ;;  %v10869_v26 = vld [vmem:[#allocation39_spill] sm:$0xff]  ;;  %v10872_v29 = vld [vmem:[#allocation38_spill] sm:$0xff] }
 0x38b   : > { %10841 = vst [vmem:[#allocation22_spill] sm:$0xff] %v8638_v40  ;;  %v1992_v55 = vadd.f32 %v1922_v12, %v1771_v17  ;;  %v2145_v19 = vsel %vm2082_vm4, %v2142_v42, %v10848_v38  ;;  %v1927_v53 = vsel %vm1861_vm3, %v10849_v23, %v1926_v2  ;;  %v2300_v15 = vpack.c.bf16 %v8632_v22, %v8638_v40  ;;  %v6630_v61 = vld [vmem:[#allocation5 + $0xb8] sm:$0xff]   ;;  %v6632_v23 = vld [vmem:[#allocation5 + $0xa8] sm:$0xff]  }
 0x38c   : > { %10844 = vst [vmem:[#allocation62_spill] sm:$0xff] %v8642_v45  ;;  %v2143_v47 = vsel %vm2082_vm4, %v10850_v57, %v2142_v42  ;;  %v2214_v41 = vadd.f32 %v2145_v19, %v10851_v39  ;;  %v1773_v62 = vadd.f32 %v1706_v48, %v8468_v59  ;;  %v10853_v25 = vmax.f32 %v10852_v28, 0.0  ;;  %v6631_v48 = vld [vmem:[#allocation5 + $0xb0] sm:$0xff]   ;;  %6337 = vmatprep.subr.bf16.mxu1 %v6630_v61 }
 0x38d   : > { %v2213_v63 = vadd.f32 %v2143_v47, %v1992_v55  ;;  %v2150_v20 = vsel %vm2082_vm4, %v2147_v33, %v2149_v16  ;;  %v1710_v2 = vsel %vm1640_vm2, %v1707_v0, %v1709_v56  ;;  %6278 = vmatmul.mubr.bf16.gmra.mxu1 %v2300_v15  ;;  %v10855_v60 = vrot.slane %v8462_v4, 3  ;;  %v10859_v4 = vld [vmem:[#allocation34_spill] sm:$0xff] }
 0x38e   : > { %v8667_v37 = vadd.f32 %v2211_v27, %v10853_v25  ;;  %v1994_v6 = vadd.f32 %v1927_v53, %v1773_v62  ;;  %v2216_v7 = vadd.f32 %v2150_v20, %v1995_v58  ;;  %v1775_v35 = vadd.f32 %v1710_v2, %v1554_v36  ;;  %v10862_v58 = vld [vmem:[#allocation40_spill] sm:$0xff]  ;;  %6338 = vmatpush3.bf16.msra.mxu1 %v6630_v61  ;;  %v6633_v62 = vld [vmem:[#allocation5 + $0xa0] sm:$0xff]   ;;  %v6634_v20 = vld [vmem:[#allocation5 + $0x98] sm:$0xff]  }
 0x38f   : > { %v2148_v43 = vsel %vm2082_vm4, %v10855_v60, %v2147_v33  ;;  %v10857_v54 = vmax.f32 %v10856_v46, 0.0  ;;  %v1931_v0 = vsel %vm1861_vm3, %v1928_v49, %v1930_v11  ;;  %v2151_v56 = vrot.slane %v8510_v3, 3  ;;  %6339 = vmatprep.subr.bf16.mxu1 %v6631_v48 }
 0x390   : > { %10854 = vst [vmem:[#allocation28_spill] sm:$0xff] %v8667_v37  ;;  %v2301_v59 = vpack.c.bf16 %v8642_v45, %v8667_v37  ;;  %v10860_v8 = vmax.f32 %v10859_v4, 0.0  ;;  %v2215_v36 = vadd.f32 %v2148_v43, %v1994_v6  ;;  %v10863_v9 = vmax.f32 %v10862_v58, 0.0 }
 0x391   : > { %v8680_v21 = vadd.f32 %v2213_v63, %v10857_v54  ;;  %v1996_v32 = vadd.f32 %v1931_v0, %v1775_v35  ;;  %v2152_v30 = vsel %vm2082_vm4, %v2149_v16, %v2151_v56  ;;  %v10866_v11 = vmax.f32 %v10865_v34, 0.0 }
 0x392   : > { %v8690_v33 = vadd.f32 %v2214_v41, %v10860_v8  ;;  %v8694_v18 = vadd.f32 %v2216_v7, %v10863_v9  ;;  %6281 = vmatprep.mubr.bf16.mxu1 %v2301_v59  ;;  %v10868_v5 = vrot.slane %v8498_v10, 3  ;;  %v10870_v16 = vmax.f32 %v10869_v26, 0.0  ;;  %6340 = vmatpush3.bf16.msra.mxu1 %v6631_v48 }
 0x393   : > { %10858 = vst [vmem:[#allocation25_spill] sm:$0xff] %v8680_v21  ;;  %v8701_v49 = vadd.f32 %v2215_v36, %v10866_v11  ;;  %v2217_v3 = vadd.f32 %v2152_v30, %v1996_v32  ;;  %v10873_v51 = vmax.f32 %v10872_v29, 0.0  ;;  %6341 = vmatprep.subr.bf16.mxu1 %v6632_v23 }
 0x394   : > { %10861 = vst [vmem:[#allocation15_spill] sm:$0xff] %v8690_v33  ;;  %10864 = vst [vmem:[#allocation63_spill] sm:$0xff] %v8694_v18  ;;  %v2302_v52 = vpack.c.bf16 %v8690_v33, %v8680_v21  ;;  %v2154_v17 = vsel %vm2082_vm4, %v2151_v56, %v10868_v5 }
 0x395   : > { %10867 = vst [vmem:[#allocation27_spill] sm:$0xff] %v8701_v49  ;;  %v2303_v42 = vpack.c.bf16 %v8694_v18, %v8701_v49  ;;  %v2218_v31 = vadd.f32 %v2154_v17, %v8551_v14  ;;  %v8711_v44 = vadd.f32 %v2217_v3, %v10870_v16  ;;  %v8722_v14 = vld [vmem:[%s10391_s4 + $0x1] ss:$0 sm:$0xff] }
 0x396   : > { %6282 = vmatmul.mubr.bf16.gmra.mxu1 %v2302_v52 }
 0x397   : > { %10871 = vst [vmem:[#allocation26_spill] sm:$0xff] %v8711_v44  ;;  %6285 = vmatprep.mubr.bf16.mxu1 %v2303_v42  ;;  %v8715_v13 = vadd.f32 %v2218_v31, %v10873_v51  ;;  %6342 = vmatpush3.bf16.msra.mxu1 %v6632_v23 }
 0x398   : > { %6343 = vmatprep.subr.bf16.mxu1 %v6633_v62 }
 0x399   : > { %10874 = vst [vmem:[#allocation53_spill] sm:$0xff] %v8715_v13  ;;  %v2304_v10 = vpack.c.bf16 %v8715_v13, %v8711_v44 }
 0x39b   : > { %6344 = vmatpush3.bf16.msra.mxu1 %v6633_v62 }
 0x39c   : > { %6345 = vmatprep.subr.bf16.mxu1 %v6634_v20 }
 0x39e   : > { %6286 = vmatmul.mubr.bf16.gmra.mxu1 %v2304_v10 }
 0x39f   : > { %6346 = vmatpush3.bf16.msra.mxu1 %v6634_v20 }
 0x3d4   : > { %v6259_v12 = vpop.f32.mrf.mxu1 }
 0x3d5   : > { %v2402_v53 = vadd.f32 %v6259_v12, %v8722_v14 }
 0x3d6   : > { %v2393_v27 = vpop.f32.mrf.mxu1 }
 0x3d7   : > { %v2394_v38 = vadd.f32 %v8722_v14, %v2393_v27  ;;  %v2522_v28 = vmax.f32 %v2402_v53, 0.0 }
 0x3d8   : > { %v6260_v55 = vpop.f32.mrf.mxu1 }
 0x3d9   : > { %v2405_v19 = vadd.f32 %v6260_v55, %v8722_v14  ;;  %v2520_v39 = vmax.f32 %v2394_v38, 0.0 }
 0x3da   : > { %v2396_v15 = vpop.f32.mrf.mxu1 }
 0x3db   : > { %v2397_v57 = vadd.f32 %v8722_v14, %v2396_v15  ;;  %v2523_v47 = vmax.f32 %v2405_v19, 0.0 }
 0x3dd   : > { %v2521_v41 = vmax.f32 %v2397_v57, 0.0  ;;  %v2553_v63 = vpack.c.bf16 %v2523_v47, %v2522_v28  ;;  %v6635_v47 = vld [vmem:[#allocation5 + $0x90] sm:$0xff]  }
 0x3de   : > { %6347 = vmatprep.subr.bf16.mxu1 %v6635_v47 }
 0x3df   : > { %v2552_v25 = vpack.c.bf16 %v2521_v41, %v2520_v39  ;;  %6348 = vmatpush3.bf16.msra.mxu1 %v6635_v47 }
 0x3e1   : > { %6305 = vmatprep.mubr.bf16.mxu0 %v2552_v25 }
 0x3e2   : > { %6306 = vmatmul.mubr.bf16.vlgmr.msra.gmra.mxu0 %v2553_v63 }
 0x3ed   : > { %v6263_v2 = vpop.f32.mrf.mxu1 }
 0x3ee   : > { %v2418_v35 = vadd.f32 %v6263_v2, %v8722_v14 }
 0x3ef   : > { %v2409_v6 = vpop.f32.mrf.mxu1 }
 0x3f0   : > { %v2410_v43 = vadd.f32 %v8722_v14, %v2409_v6  ;;  %v2526_v4 = vmax.f32 %v2418_v35, 0.0 }
 0x3f1   : > { %v6264_v60 = vpop.f32.mrf.mxu1 }
 0x3f2   : > { %v2421_v7 = vadd.f32 %v6264_v60, %v8722_v14  ;;  %v2524_v0 = vmax.f32 %v2410_v43, 0.0 }
 0x3f3   : > { %v2412_v59 = vpop.f32.mrf.mxu1 }
 0x3f4   : > { %v2413_v46 = vadd.f32 %v8722_v14, %v2412_v59  ;;  %v2527_v54 = vmax.f32 %v2421_v7, 0.0 }
 0x3f6   : > { %v2525_v56 = vmax.f32 %v2413_v46, 0.0  ;;  %v2555_v36 = vpack.c.bf16 %v2527_v54, %v2526_v4  ;;  %v6636_v54 = vld [vmem:[#allocation5 + $0x88] sm:$0xff]  }
 0x3f7   : > { %6349 = vmatprep.subr.bf16.mxu1 %v6636_v54 }
 0x3f8   : > { %v2554_v8 = vpack.c.bf16 %v2525_v56, %v2524_v0  ;;  %6350 = vmatpush3.bf16.msra.mxu1 %v6636_v54 }
 0x3fa   : > { %6309 = vmatprep.mubr.bf16.mxu0 %v2554_v8 }
 0x3fb   : > { %6310 = vmatmul.mubr.bf16.gmra.mxu0 %v2555_v36 }
 0x403   : > { %v6267_v58 = vpop.f32.mrf.mxu1 }
 0x404   : > { %v2434_v34 = vadd.f32 %v6267_v58, %v8722_v14 }
 0x405   : > { %v2425_v9 = vpop.f32.mrf.mxu1 }
 0x406   : > { %v2426_v30 = vadd.f32 %v8722_v14, %v2425_v9  ;;  %v2530_v31 = vmax.f32 %v2434_v34, 0.0 }
 0x407   : > { %v6268_v32 = vpop.f32.mrf.mxu1 }
 0x408   : > { %v2437_v52 = vadd.f32 %v6268_v32, %v8722_v14  ;;  %v2528_v17 = vmax.f32 %v2426_v30, 0.0 }
 0x409   : > { %v2428_v11 = vpop.f32.mrf.mxu1 }
 0x40a   : > { %v2429_v3 = vadd.f32 %v8722_v14, %v2428_v11  ;;  %v2531_v5 = vmax.f32 %v2437_v52, 0.0 }
 0x40c   : > { %v2529_v42 = vmax.f32 %v2429_v3, 0.0  ;;  %v2557_v16 = vpack.c.bf16 %v2531_v5, %v2530_v31 }
 0x40e   : > { %v2556_v26 = vpack.c.bf16 %v2529_v42, %v2528_v17 }
 0x410   : > { %6313 = vmatprep.mubr.bf16.mxu0 %v2556_v26 }
 0x411   : > { %6314 = vmatmul.mubr.bf16.gmra.mxu0 %v2557_v16 }
 0x41b   : > { %v6271_v29 = vpop.f32.mrf.mxu1 }
 0x41c   : > { %v2450_v48 = vadd.f32 %v6271_v29, %v8722_v14 }
 0x41d   : > { %v2441_v51 = vpop.f32.mrf.mxu1 }
 0x41e   : > { %v2442_v12 = vadd.f32 %v8722_v14, %v2441_v51  ;;  %v2534_v53 = vmax.f32 %v2450_v48, 0.0 }
 0x41f   : > { %v6272_v10 = vpop.f32.mrf.mxu1 }
 0x420   : > { %v2453_v61 = vadd.f32 %v6272_v10, %v8722_v14  ;;  %v2532_v19 = vmax.f32 %v2442_v12, 0.0 }
 0x421   : > { %v2444_v27 = vpop.f32.mrf.mxu1 }
 0x422   : > { %v2445_v55 = vadd.f32 %v8722_v14, %v2444_v27  ;;  %v2535_v38 = vmax.f32 %v2453_v61, 0.0 }
 0x424   : > { %v2533_v23 = vmax.f32 %v2445_v55, 0.0  ;;  %v2559_v57 = vpack.c.bf16 %v2535_v38, %v2534_v53 }
 0x426   : > { %v2558_v15 = vpack.c.bf16 %v2533_v23, %v2532_v19 }
 0x428   : > { %6317 = vmatprep.mubr.bf16.mxu0 %v2558_v15 }
 0x429   : > { %6318 = vmatmul.mubr.bf16.gmra.mxu0 %v2559_v57  ;;  %v6637_v57 = vld [vmem:[#allocation5 + $0x80] sm:$0xff]  }
 0x42a   : > { %6351 = vmatprep.subr.bf16.mxu1 %v6637_v57 }
 0x42b   : > { %6352 = vmatpush3.bf16.msra.mxu1 %v6637_v57 }
 0x434   : > { %v6275_v39 = vpop.f32.mrf.mxu1 }
 0x435   : > { %v2466_v63 = vadd.f32 %v6275_v39, %v8722_v14 }
 0x436   : > { %v2457_v41 = vpop.f32.mrf.mxu1 }
 0x437   : > { %v2458_v28 = vadd.f32 %v8722_v14, %v2457_v41  ;;  %v2538_v7 = vmax.f32 %v2466_v63, 0.0 }
 0x438   : > { %v6276_v62 = vpop.f32.mrf.mxu1 }
 0x439   : > { %v2469_v25 = vadd.f32 %v6276_v62, %v8722_v14  ;;  %v2536_v60 = vmax.f32 %v2458_v28, 0.0 }
 0x43a   : > { %v2460_v20 = vpop.f32.mrf.mxu1 }
 0x43b   : > { %v2461_v2 = vadd.f32 %v8722_v14, %v2460_v20  ;;  %v2539_v6 = vmax.f32 %v2469_v25, 0.0 }
 0x43d   : > { %v2537_v43 = vmax.f32 %v2461_v2, 0.0  ;;  %v2561_v59 = vpack.c.bf16 %v2539_v6, %v2538_v7  ;;  %v5829_v6 = vld [vmem:[%s10393_s6 + $0x8] sm:$0x1f] }
 0x43f   : > { %v2560_v35 = vpack.c.bf16 %v2537_v43, %v2536_v60  ;;  %v2913_v60 = vadd.f32 1.0, %v5829_v6 }
 0x441   : > { %6321 = vmatprep.mubr.bf16.mxu0 %v2560_v35  ;;  %v10875_v35 = vld [vmem:[#allocation41_spill] sm:$0xff] }
 0x442   : > { %6322 = vmatmul.mubr.bf16.gmra.mxu0 %v2561_v59  ;;  %v8760_v59 = vrot.slane %v2913_v60, %v10875_v35 }
 0x44d   : > { %v6279_v46 = vpop.f32.mrf.mxu1 }
 0x44e   : > { %v2482_v36 = vadd.f32 %v6279_v46, %v8722_v14  ;;  %v10876_v46 = vld [vmem:[#allocation43_spill] sm:$0xff] }
 0x44f   : > { %v2473_v0 = vpop.f32.mrf.mxu1  ;;  %v8763_v54 = vrot.slane %v5829_v6, %v10876_v46 }
 0x450   : > { %v2474_v4 = vadd.f32 %v8722_v14, %v2473_v0  ;;  %v2542_v11 = vmax.f32 %v2482_v36, 0.0  ;;  %v10877_v0 = vld [vmem:[#allocation44_spill] sm:$0xff]  ;;  %v10879_v36 = vld [vmem:[#allocation45_spill] sm:$0xff] }
 0x451   : > { %v6280_v56 = vpop.f32.mrf.mxu1 }
 0x452   : > { %v2485_v8 = vadd.f32 %v6280_v56, %v8722_v14  ;;  %v2540_v52 = vmax.f32 %v2474_v4, 0.0  ;;  %v8766_v56 = vrot.slane %v5829_v6, %v10877_v0  ;;  %v10878_v4 = vld [vmem:[#allocation42_spill] sm:$0xff] }
 0x453   : > { %v2476_v58 = vpop.f32.mrf.mxu1 }
 0x454   : > { %v2477_v9 = vadd.f32 %v8722_v14, %v2476_v58  ;;  %v2543_v32 = vmax.f32 %v2485_v8, 0.0  ;;  %v8769_v8 = vrot.slane %v5829_v6, %v10878_v4  ;;  %v8772_v58 = vrot.slane %v5829_v6, %v10879_v36 }
 0x456   : > { %v6283_v30 = vpop.f32.mrf.mxu1  ;;  %v2541_v34 = vmax.f32 %v2477_v9, 0.0  ;;  %v2563_v17 = vpack.c.bf16 %v2543_v32, %v2542_v11 }
 0x457   : > { %v2498_v16 = vadd.f32 %v6283_v30, %v8722_v14 }
 0x458   : > { %v2489_v3 = vpop.f32.mrf.mxu1  ;;  %v2562_v5 = vpack.c.bf16 %v2541_v34, %v2540_v52 }
 0x459   : > { %v2490_v31 = vadd.f32 %v8722_v14, %v2489_v3  ;;  %v2546_v27 = vmax.f32 %v2498_v16, 0.0 }
 0x45a   : > { %v6284_v42 = vpop.f32.mrf.mxu1  ;;  %6325 = vmatprep.mubr.bf16.mxu0 %v2562_v5 }
 0x45b   : > { %v2501_v26 = vadd.f32 %v6284_v42, %v8722_v14  ;;  %6326 = vmatmul.mubr.bf16.gmra.mxu0 %v2563_v17  ;;  %v2544_v61 = vmax.f32 %v2490_v31, 0.0 }
 0x45c   : > { %v2492_v29 = vpop.f32.mrf.mxu1 }
 0x45d   : > { %v2493_v51 = vadd.f32 %v8722_v14, %v2492_v29  ;;  %v2547_v10 = vmax.f32 %v2501_v26, 0.0 }
 0x45e   : > { %v6287_v12 = vpop.f32.mrf.mxu1 }
 0x45f   : > { %v2545_v48 = vmax.f32 %v2493_v51, 0.0  ;;  %v2565_v19 = vpack.c.bf16 %v2547_v10, %v2546_v27  ;;  %v2514_v47 = vadd.f32 %v6287_v12, %v8722_v14 }
 0x460   : > { %v2505_v55 = vpop.f32.mrf.mxu1 }
 0x461   : > { %v2564_v38 = vpack.c.bf16 %v2545_v48, %v2544_v61  ;;  %v2506_v53 = vadd.f32 %v8722_v14, %v2505_v55  ;;  %v2550_v63 = vmax.f32 %v2514_v47, 0.0 }
 0x462   : > { %v6288_v23 = vpop.f32.mrf.mxu1 }
 0x463   : > { %v2517_v15 = vadd.f32 %v6288_v23, %v8722_v14  ;;  %6329 = vmatprep.mubr.bf16.mxu0 %v2564_v38  ;;  %v2548_v28 = vmax.f32 %v2506_v53, 0.0 }
 0x464   : > { %v2508_v39 = vpop.f32.mrf.mxu1  ;;  %6330 = vmatmul.mubr.bf16.gmra.mxu0 %v2565_v19 }
 0x465   : > { %v2509_v41 = vadd.f32 %v8722_v14, %v2508_v39  ;;  %v2551_v62 = vmax.f32 %v2517_v15, 0.0 }
 0x467   : > { %v2549_v25 = vmax.f32 %v2509_v41, 0.0  ;;  %v2567_v2 = vpack.c.bf16 %v2551_v62, %v2550_v63 }
 0x469   : > { %v2566_v20 = vpack.c.bf16 %v2549_v25, %v2548_v28 }
 0x46b   : > { %6333 = vmatprep.mubr.bf16.mxu0 %v2566_v20 }
 0x46c   : > { %6334 = vmatmul.mubr.bf16.gmra.mxu0 %v2567_v2 }
 0x4a2   : > { %v6307_v43 = vpop.f32.mrf.mxu0 }
 0x4a3   : > { %v2812_v32 = vrot.slane %v6307_v43, 4  ;;  %v2920_v34 = vmul.f32 %v6307_v43, %v8760_v59 }
 0x4a4   : > { %v2650_v7 = vpop.f32.mrf.mxu0 }
 0x4a5   : > { %v2809_v14 = vrot.slane %v2650_v7, 4  ;;  %v2918_v42 = vmul.f32 %v8760_v59, %v2650_v7 }
 0x4a6   : > { %v6308_v9 = vpop.f32.mrf.mxu0 }
 0x4a7   : > { %v2905_v30 = vsel %vm1346_vm1, 0.0, %v2809_v14  ;;  %v2814_v52 = vrot.slane %v6308_v9, 4  ;;  %v2921_v26 = vmul.f32 %v6308_v9, %v8760_v59 }
 0x4a8   : > { %v2653_v17 = vpop.f32.mrf.mxu0  ;;  %v2954_v31 = vmul.f32 %v8769_v8, %v2905_v30  ;;  %v3022_v61 = vmul.f32 %v8763_v54, %v2905_v30  ;;  %v3242_v48 = vmul.f32 %v8766_v56, %v2905_v30  ;;  %v3462_v38 = vmul.f32 %v8772_v58, %v2905_v30 }
 0x4a9   : > { %v2815_v11 = vsel %vm1346_vm1, %v2812_v32, %v2814_v52  ;;  %v3026_v3 = vmul.f32 %v8763_v54, %v2814_v52  ;;  %v3246_v5 = vmul.f32 %v8766_v56, %v2814_v52  ;;  %v3466_v16 = vmul.f32 %v8772_v58, %v2814_v52 }
 0x4aa   : > { %v2957_v29 = vmul.f32 %v8769_v8, %v2815_v11  ;;  %v3025_v51 = vmul.f32 %v8763_v54, %v2815_v11  ;;  %v3245_v12 = vmul.f32 %v8766_v56, %v2815_v11  ;;  %v3465_v27 = vmul.f32 %v8772_v58, %v2815_v11 }
 0x4ab   : > { %v3109_v10 = vrot.slane %v3026_v3, 1  ;;  %v2810_v55 = vrot.slane %v2653_v17, 4  ;;  %v3329_v53 = vrot.slane %v3246_v5, 2  ;;  %v3549_v57 = vrot.slane %v3466_v16, 3 }
 0x4ac   : > { %v2989_v19 = vadd.f32 %v2957_v29, %v2921_v26  ;;  %v3107_v23 = vrot.slane %v3025_v51, 1  ;;  %v3327_v15 = vrot.slane %v3245_v12, 2  ;;  %v2919_v62 = vmul.f32 %v8760_v59, %v2653_v17 }
 0x4ad   : > { %v2811_v47 = vsel %vm1346_vm1, %v2809_v14, %v2810_v55  ;;  %v2813_v39 = vsel %vm1346_vm1, %v2810_v55, %v2812_v32  ;;  %v3547_v20 = vrot.slane %v3465_v27, 3  ;;  %v2986_v26 = vadd.f32 %v2954_v31, %v2918_v42 }
 0x4ae   : > { %v3110_v41 = vsel %vm1640_vm2, %v3107_v23, %v3109_v10  ;;  %v2955_v28 = vmul.f32 %v8769_v8, %v2811_v47  ;;  %v2956_v25 = vmul.f32 %v8769_v8, %v2813_v39  ;;  %v3023_v2 = vmul.f32 %v8763_v54, %v2811_v47 }
 0x4af   : > { %v3209_v63 = vadd.f32 %v3110_v41, %v2989_v19  ;;  %v3024_v6 = vmul.f32 %v8763_v54, %v2813_v39  ;;  %v3243_v7 = vmul.f32 %v8766_v56, %v2811_v47  ;;  %v3244_v14 = vmul.f32 %v8766_v56, %v2813_v39 }
 0x4b0   : > { %v2987_v60 = vadd.f32 %v2955_v28, %v2919_v62  ;;  %v2988_v43 = vadd.f32 %v2956_v25, %v2920_v34  ;;  %v3330_v9 = vsel %vm1861_vm3, %v3327_v15, %v3329_v53  ;;  %v3103_v32 = vrot.slane %v3023_v2, 1 }
 0x4b1   : > { %v3105_v30 = vrot.slane %v3024_v6, 1  ;;  %v3463_v52 = vmul.f32 %v8772_v58, %v2811_v47  ;;  %v3429_v11 = vadd.f32 %v3330_v9, %v3209_v63  ;;  %v3323_v3 = vrot.slane %v3243_v7, 2  ;;  %v10880_v6 = vld [vmem:[#allocation46_spill] sm:$0xff] }
 0x4b2   : > { %v3325_v5 = vrot.slane %v3244_v14, 2  ;;  %v3464_v17 = vmul.f32 %v8772_v58, %v2813_v39  ;;  %v3102_v16 = vrot.slane %v3022_v61, 1  ;;  %v3550_v51 = vsel %vm2082_vm4, %v3547_v20, %v3549_v57 }
 0x4b3   : > { %v3106_v29 = vsel %vm1640_vm2, %v3103_v32, %v3105_v30  ;;  %v3108_v34 = vsel %vm1640_vm2, %v3105_v30, %v3107_v23  ;;  %v3543_v27 = vrot.slane %v3463_v52, 3  ;;  %v3649_v41 = vadd.f32 %v3550_v51, %v3429_v11  ;;  %v10882_v51 = vld [vmem:[#allocation56_spill] sm:$0xff] }
 0x4b4   : > { %v3207_v10 = vadd.f32 %v3106_v29, %v2987_v60  ;;  %v3208_v12 = vadd.f32 %v3108_v34, %v2988_v43  ;;  %v3326_v55 = vsel %vm1861_vm3, %v3323_v3, %v3325_v5  ;;  %v3328_v19 = vsel %vm1861_vm3, %v3325_v5, %v3327_v15 }
 0x4b5   : > { %v3545_v53 = vrot.slane %v3464_v17, 3  ;;  %v3104_v47 = vsel %vm1640_vm2, %v3102_v16, %v3103_v32  ;;  %v3322_v62 = vrot.slane %v3242_v48, 2  ;;  %v3542_v28 = vrot.slane %v3462_v38, 3 }
 0x4b6   : > { %v3427_v39 = vadd.f32 %v3326_v55, %v3207_v10  ;;  %v3428_v42 = vadd.f32 %v3328_v19, %v3208_v12  ;;  %v3206_v61 = vadd.f32 %v3104_v47, %v2986_v26  ;;  %v8813_v15 = vadd.f32 %v3649_v41, %v10880_v6  ;;  %v10884_v12 = vld [vmem:[#allocation57_spill] sm:$0xff] }
 0x4b7   : > { %v3548_v57 = vsel %vm2082_vm4, %v3545_v53, %v3547_v20  ;;  %v3324_v63 = vsel %vm1861_vm3, %v3322_v62, %v3323_v3  ;;  %v3546_v2 = vsel %vm2082_vm4, %v3543_v27, %v3545_v53  ;;  %v3544_v38 = vsel %vm2082_vm4, %v3542_v28, %v3543_v27 }
 0x4b8   : > { %10881 = vst [vmem:[#allocation51_spill] sm:$0xff] %v8813_v15  ;;  %v3426_v43 = vadd.f32 %v3324_v63, %v3206_v61  ;;  %v3647_v7 = vadd.f32 %v3546_v2, %v3427_v39  ;;  %v3648_v14 = vadd.f32 %v3548_v57, %v3428_v42 }
 0x4ba   : > { %v3646_v34 = vadd.f32 %v3544_v38, %v3426_v43  ;;  %v8827_v10 = vadd.f32 %v3647_v7, %v10882_v51  ;;  %v8830_v27 = vadd.f32 %v3648_v14, %v10884_v12  ;;  %v10886_v14 = vld [vmem:[#allocation58_spill] sm:$0xff] }
 0x4bb   : > { %v6311_v31 = vpop.f32.mrf.mxu0 }
 0x4bc   : > { %v2819_v9 = vrot.slane %v6311_v31, 4  ;;  %v2924_v20 = vmul.f32 %v6311_v31, %v8760_v59  ;;  %10883 = vst [vmem:[#allocation29_spill] sm:$0xff] %v8827_v10  ;;  %10885 = vst [vmem:[#allocation32_spill] sm:$0xff] %v8830_v27 }
 0x4bd   : > { %v2666_v23 = vpop.f32.mrf.mxu0 }
 0x4be   : > { %v2816_v25 = vrot.slane %v2666_v23, 4  ;;  %v2922_v30 = vmul.f32 %v8760_v59, %v2666_v23 }
 0x4bf   : > { %v6312_v60 = vpop.f32.mrf.mxu0 }
 0x4c0   : > { %v2906_v32 = vsel %vm1346_vm1, 0.0, %v2816_v25  ;;  %v2821_v48 = vrot.slane %v6312_v60, 4  ;;  %v2925_v29 = vmul.f32 %v6312_v60, %v8760_v59 }
 0x4c1   : > { %v2958_v52 = vmul.f32 %v8769_v8, %v2906_v32  ;;  %v3027_v11 = vmul.f32 %v8763_v54, %v2906_v32  ;;  %v3247_v3 = vmul.f32 %v8766_v56, %v2906_v32  ;;  %v2669_v16 = vpop.f32.mrf.mxu0  ;;  %v3467_v55 = vmul.f32 %v8772_v58, %v2906_v32 }
 0x4c2   : > { %v2822_v5 = vsel %vm1346_vm1, %v2819_v9, %v2821_v48  ;;  %v3031_v17 = vmul.f32 %v8763_v54, %v2821_v48  ;;  %v3251_v26 = vmul.f32 %v8766_v56, %v2821_v48  ;;  %v8839_v42 = vmul.f32 %v8772_v58, %v2821_v48 }
 0x4c3   : > { %v2961_v19 = vmul.f32 %v8769_v8, %v2822_v5  ;;  %v3030_v53 = vmul.f32 %v8763_v54, %v2822_v5  ;;  %v8836_v47 = vmul.f32 %v8766_v56, %v2822_v5  ;;  %v2990_v41 = vadd.f32 %v2958_v52, %v2922_v30 }
 0x4c4   : > { %v3118_v39 = vrot.slane %v3031_v17, 1  ;;  %v2817_v31 = vrot.slane %v2669_v16, 4  ;;  %v3111_v61 = vrot.slane %v3027_v11, 1  ;;  %v3331_v62 = vrot.slane %v3247_v3, 2 }
 0x4c5   : > { %v3116_v28 = vrot.slane %v3030_v53, 1  ;;  %v3338_v23 = vrot.slane %v3251_v26, 2  ;;  %v2993_v57 = vadd.f32 %v2961_v19, %v2925_v29  ;;  %v3336_v63 = vrot.slane %v8836_v47, 2 }
 0x4c6   : > { %v2818_v2 = vsel %vm1346_vm1, %v2816_v25, %v2817_v31  ;;  %v2820_v6 = vsel %vm1346_vm1, %v2817_v31, %v2819_v9  ;;  %v2923_v60 = vmul.f32 %v8760_v59, %v2669_v16  ;;  %v8848_v32 = vadd.f32 %v3646_v34, %v10886_v14 }
 0x4c7   : > { %v2959_v43 = vmul.f32 %v8769_v8, %v2818_v2  ;;  %v2960_v7 = vmul.f32 %v8769_v8, %v2820_v6  ;;  %v3119_v48 = vsel %vm1640_vm2, %v3116_v28, %v3118_v39  ;;  %v3028_v38 = vmul.f32 %v8763_v54, %v2818_v2 }
 0x4c8   : > { %10887 = vst [vmem:[#allocation20_spill] sm:$0xff] %v8848_v32  ;;  %v3029_v30 = vmul.f32 %v8763_v54, %v2820_v6  ;;  %v3248_v52 = vmul.f32 %v8766_v56, %v2818_v2  ;;  %v3249_v9 = vmul.f32 %v8766_v56, %v2820_v6  ;;  %v3468_v11 = vmul.f32 %v8772_v58, %v2818_v2 }
 0x4c9   : > { %v2991_v25 = vadd.f32 %v2959_v43, %v2923_v60  ;;  %v3749_v3 = vpack.c.bf16 %v8813_v15, %v8830_v27  ;;  %v2992_v17 = vadd.f32 %v2960_v7, %v2924_v20  ;;  %v3112_v26 = vrot.slane %v3028_v38, 1 }
 0x4ca   : > { %v3114_v16 = vrot.slane %v3029_v30, 1  ;;  %v3332_v29 = vrot.slane %v3248_v52, 2  ;;  %v3213_v34 = vadd.f32 %v3119_v48, %v2993_v57  ;;  %v3334_v51 = vrot.slane %v3249_v9, 2 }
 0x4cb   : > { %v3469_v12 = vmul.f32 %v8772_v58, %v2820_v6  ;;  %v3748_v19 = vpack.c.bf16 %v8827_v10, %v8848_v32  ;;  %v3552_v47 = vrot.slane %v3468_v11, 3  ;;  %v3113_v39 = vsel %vm1640_vm2, %v3111_v61, %v3112_v26  ;;  %v10888_v61 = vld [vmem:[#allocation61_spill] sm:$0xff] }
 0x4cc   : > { %v3115_v53 = vsel %vm1640_vm2, %v3112_v26, %v3114_v16  ;;  %v3117_v31 = vsel %vm1640_vm2, %v3114_v16, %v3116_v28  ;;  %v3551_v2 = vrot.slane %v3467_v55, 3  ;;  %v3210_v7 = vadd.f32 %v3113_v39, %v2990_v41 }
 0x4cd   : > { %v3211_v60 = vadd.f32 %v3115_v53, %v2991_v25  ;;  %v3554_v20 = vrot.slane %v3469_v12, 3  ;;  %6353 = vmatprep.mubr.bf16.mxu1 %v3748_v19  ;;  %v3339_v57 = vsel %vm1861_vm3, %v3336_v63, %v3338_v23  ;;  %v8866_v6 = vmul.f32 %v8772_v58, %v2822_v5 }
 0x4ce   : > { %6354 = vmatmul.mubr.bf16.vlgmr.msra.gmra.mxu1 %v3749_v3  ;;  %v3333_v14 = vsel %vm1861_vm3, %v3331_v62, %v3332_v29  ;;  %v3212_v48 = vadd.f32 %v3117_v31, %v2992_v17  ;;  %v8869_v38 = vadd.f32 %v3339_v57, %v3213_v34  ;;  %v3335_v55 = vsel %vm1861_vm3, %v3332_v29, %v3334_v51 }
 0x4cf   : > { %v3430_v30 = vadd.f32 %v3333_v14, %v3210_v7  ;;  %v3553_v5 = vsel %vm2082_vm4, %v3551_v2, %v3552_v47  ;;  %v3431_v25 = vadd.f32 %v3335_v55, %v3211_v60  ;;  %v3555_v11 = vsel %vm2082_vm4, %v3552_v47, %v3554_v20 }
 0x4d0   : > { %v3337_v3 = vsel %vm1861_vm3, %v3334_v51, %v3336_v63  ;;  %v3556_v29 = vrot.slane %v8866_v6, 3 }
 0x4d1   : > { %v6315_v43 = vpop.f32.mrf.mxu0  ;;  %v3432_v16 = vadd.f32 %v3337_v3, %v3212_v48  ;;  %v3650_v53 = vadd.f32 %v3553_v5, %v3430_v30  ;;  %v6639_v3 = vld [vmem:[#allocation7 + $0xb0] sm:$0xff]  }
 0x4d2   : > { %v2826_v52 = vrot.slane %v6315_v43, 4  ;;  %v8874_v41 = vmul.f32 %v6315_v43, %v8760_v59  ;;  %v3651_v43 = vadd.f32 %v3555_v11, %v3431_v25  ;;  %v3557_v7 = vsel %vm2082_vm4, %v3554_v20, %v3556_v29 }
 0x4d3   : > { %v2682_v28 = vpop.f32.mrf.mxu0 }
 0x4d4   : > { %v2823_v23 = vrot.slane %v2682_v28, 4  ;;  %v2926_v9 = vmul.f32 %v8760_v59, %v2682_v28 }
 0x4d5   : > { %v6316_v62 = vpop.f32.mrf.mxu0 }
 0x4d6   : > { %v2907_v17 = vsel %vm1346_vm1, 0.0, %v2823_v23  ;;  %v2828_v26 = vrot.slane %v6316_v62, 4  ;;  %v2929_v2 = vmul.f32 %v6316_v62, %v8760_v59  ;;  %v6638_v62 = vld [vmem:[#allocation7 + $0xb8] sm:$0xff]  }
 0x4d7   : > { %v2962_v34 = vmul.f32 %v8769_v8, %v2907_v17  ;;  %v3032_v12 = vmul.f32 %v8763_v54, %v2907_v17  ;;  %v8885_v19 = vmul.f32 %v8766_v56, %v2907_v17  ;;  %v8888_v39 = vmul.f32 %v8772_v58, %v2907_v17  ;;  %v2685_v31 = vpop.f32.mrf.mxu0  ;;  %6385 = vmatprep.subr.bf16.mxu0 %v6638_v62 }
 0x4d8   : > { %v2829_v47 = vsel %vm1346_vm1, %v2826_v52, %v2828_v26  ;;  %v3036_v63 = vmul.f32 %v8763_v54, %v2828_v26  ;;  %v3256_v51 = vmul.f32 %v8766_v56, %v2828_v26  ;;  %v8895_v60 = vmul.f32 %v8772_v58, %v2828_v26  ;;  %6386 = vmatpush3.bf16.msra.mxu0 %v6638_v62 }
 0x4d9   : > { %v2994_v57 = vadd.f32 %v2962_v34, %v2926_v9  ;;  %v2965_v6 = vmul.f32 %v8769_v8, %v2829_v47  ;;  %v8900_v14 = vmul.f32 %v8763_v54, %v2829_v47  ;;  %v3120_v55 = vrot.slane %v3032_v12, 1  ;;  %6387 = vmatprep.subr.bf16.mxu0 %v6639_v3 }
 0x4da   : > { %v3127_v48 = vrot.slane %v3036_v63, 1  ;;  %v3340_v28 = vrot.slane %v8885_v19, 2  ;;  %v8904_v30 = vmul.f32 %v8766_v56, %v2829_v47  ;;  %v2824_v5 = vrot.slane %v2685_v31, 4 }
 0x4db   : > { %v3560_v25 = vrot.slane %v8888_v39, 3  ;;  %v3125_v20 = vrot.slane %v8900_v14, 1  ;;  %v3347_v9 = vrot.slane %v3256_v51, 2  ;;  %v8909_v11 = vmul.f32 %v8772_v58, %v2829_v47  ;;  %v10890_v14 = vld [vmem:[#allocation60_spill] sm:$0xff] }
 0x4dc   : > { %v2997_v17 = vadd.f32 %v2965_v6, %v2929_v2  ;;  %v2825_v26 = vsel %vm1346_vm1, %v2823_v23, %v2824_v5  ;;  %v2827_v34 = vsel %vm1346_vm1, %v2824_v5, %v2826_v52  ;;  %v2927_v12 = vmul.f32 %v8760_v59, %v2685_v31  ;;  %v6640_v2 = vld [vmem:[#allocation7 + $0xa8] sm:$0xff]   ;;  %6388 = vmatpush3.bf16.msra.mxu0 %v6639_v3 }
 0x4dd   : > { %v3128_v19 = vsel %vm1640_vm2, %v3125_v20, %v3127_v48  ;;  %v2963_v63 = vmul.f32 %v8769_v8, %v2825_v26  ;;  %v8917_v39 = vadd.f32 %v3650_v53, %v10888_v61  ;;  %v8920_v51 = vadd.f32 %v3651_v43, %v10890_v14  ;;  %6389 = vmatprep.subr.bf16.mxu0 %v6640_v2 }
 0x4de   : > { %v3345_v47 = vrot.slane %v8904_v30, 2  ;;  %v3033_v23 = vmul.f32 %v8763_v54, %v2825_v26  ;;  %v3034_v52 = vmul.f32 %v8763_v54, %v2827_v34  ;;  %v3253_v31 = vmul.f32 %v8766_v56, %v2825_v26 }
 0x4df   : > { %10889 = vst [vmem:[#allocation30_spill] sm:$0xff] %v8917_v39  ;;  %10891 = vst [vmem:[#allocation31_spill] sm:$0xff] %v8920_v51  ;;  %v2964_v6 = vmul.f32 %v8769_v8, %v2827_v34  ;;  %v2995_v48 = vadd.f32 %v2963_v63, %v2927_v12  ;;  %v3254_v61 = vmul.f32 %v8766_v56, %v2827_v34  ;;  %v10892_v12 = vrot.slane %v8839_v42, 3 }
 0x4e0   : > { %v3473_v53 = vmul.f32 %v8772_v58, %v2825_v26  ;;  %v3217_v43 = vadd.f32 %v3128_v19, %v2997_v17  ;;  %v3121_v5 = vrot.slane %v3033_v23, 1  ;;  %v3123_v62 = vrot.slane %v3034_v52, 1  ;;  %v6641_v19 = vld [vmem:[#allocation7 + $0xa0] sm:$0xff]   ;;  %6390 = vmatpush3.bf16.msra.mxu0 %v6640_v2 }
 0x4e1   : > { %v3341_v14 = vrot.slane %v3253_v31, 2  ;;  %v3343_v30 = vrot.slane %v3254_v61, 2  ;;  %v8930_v32 = vmul.f32 %v8772_v58, %v2827_v34  ;;  %v3750_v15 = vpack.c.bf16 %v8920_v51, %v8917_v39  ;;  %6391 = vmatprep.subr.bf16.mxu0 %v6641_v19  ;;  %v10899_v39 = vld [vmem:[#allocation50_spill] sm:$0xff] }
 0x4e2   : > { %v3561_v10 = vrot.slane %v3473_v53, 3  ;;  %v3124_v27 = vsel %vm1640_vm2, %v3121_v5, %v3123_v62  ;;  %v3559_v63 = vsel %vm2082_vm4, %v3556_v29, %v10892_v12  ;;  %v3652_v26 = vadd.f32 %v3557_v7, %v3432_v16  ;;  %v10893_v29 = vld [vmem:[#allocation47_spill] sm:$0xff] }
 0x4e3   : > { %v3122_v17 = vsel %vm1640_vm2, %v3120_v55, %v3121_v5  ;;  %v3215_v34 = vadd.f32 %v3124_v27, %v2995_v48  ;;  %v10532_v52 = vrot.slane %v8930_v32, 3  ;;  %6357 = vmatprep.mubr.bf16.mxu1 %v3750_v15  ;;  %v3653_v31 = vadd.f32 %v3559_v63, %v8869_v38  ;;  %v10895_v5 = vld [vmem:[#allocation16_spill] sm:$0xff] }
 0x4e4   : > { %v3348_v3 = vsel %vm1861_vm3, %v3345_v47, %v3347_v9  ;;  %v3344_v61 = vsel %vm1861_vm3, %v3341_v14, %v3343_v30  ;;  %v8947_v16 = vadd.f32 %v3652_v26, %v10893_v29  ;;  %v3214_v7 = vadd.f32 %v3122_v17, %v2994_v57  ;;  %v6642_v26 = vld [vmem:[#allocation7 + $0x98] sm:$0xff]   ;;  %6392 = vmatpush3.bf16.msra.mxu0 %v6641_v19  ;;  %v6643_v29 = vld [vmem:[#allocation7 + $0x90] sm:$0xff]  }
 0x4e5   : > { %v2996_v55 = vadd.f32 %v2964_v6, %v8874_v41  ;;  %v3435_v53 = vadd.f32 %v3344_v61, %v3215_v34  ;;  %v8951_v27 = vadd.f32 %v3653_v31, %v10895_v5  ;;  %v3342_v15 = vsel %vm1861_vm3, %v3340_v28, %v3341_v14  ;;  %6393 = vmatprep.subr.bf16.mxu0 %v6642_v26 }
 0x4e6   : > { %10894 = vst [vmem:[#allocation36_spill] sm:$0xff] %v8947_v16  ;;  %v8954_v38 = vadd.f32 %v3348_v3, %v3217_v43  ;;  %v3434_v48 = vadd.f32 %v3342_v15, %v3214_v7  ;;  %v3562_v12 = vsel %vm2082_vm4, %v3560_v25, %v3561_v10  ;;  %v3126_v63 = vsel %vm1640_vm2, %v3123_v62, %v3125_v20 }
 0x4e7   : > { %10896 = vst [vmem:[#allocation18_spill] sm:$0xff] %v8951_v27  ;;  %v3751_v6 = vpack.c.bf16 %v8951_v27, %v8947_v16  ;;  %v3564_v28 = vsel %vm2082_vm4, %v3561_v10, %v10532_v52  ;;  %v3346_v62 = vsel %vm1861_vm3, %v3343_v30, %v3345_v47  ;;  %v3216_v31 = vadd.f32 %v3126_v63, %v2996_v55 }
 0x4e8   : > { %v3655_v20 = vadd.f32 %v3564_v28, %v3435_v53  ;;  %v3654_v34 = vadd.f32 %v3562_v12, %v3434_v48  ;;  %v3565_v19 = vrot.slane %v8909_v11, 3  ;;  %6394 = vmatpush3.bf16.msra.mxu0 %v6642_v26 }
 0x4e9   : > { %v8944_v42 = vpop.f32.mrf.mxu0  ;;  %6358 = vmatmul.mubr.bf16.gmra.mxu1 %v3751_v6  ;;  %6395 = vmatprep.subr.bf16.mxu0 %v6643_v29 }
 0x4ea   : > { %v2833_v57 = vrot.slane %v8944_v42, 4  ;;  %v8966_v2 = vmul.f32 %v8944_v42, %v8760_v59  ;;  %v9010_v16 = vadd.f32 %v3654_v34, %v10899_v39 }
 0x4eb   : > { %v2698_v9 = vpop.f32.mrf.mxu0 }
 0x4ec   : > { %v2830_v41 = vrot.slane %v2698_v9, 4  ;;  %v2930_v25 = vmul.f32 %v8760_v59, %v2698_v9  ;;  %v10897_v9 = vld [vmem:[#allocation48_spill] sm:$0xff]  ;;  %10900 = vst [vmem:[#allocation35_spill] sm:$0xff] %v9010_v16  ;;  %6396 = vmatpush3.bf16.msra.mxu0 %v6643_v29 }
 0x4ed   : > { %v6320_v43 = vpop.f32.mrf.mxu0  ;;  %v8988_v48 = vadd.f32 %v3655_v20, %v10897_v9 }
 0x4ee   : > { %v2908_v14 = vsel %vm1346_vm1, 0.0, %v2830_v41  ;;  %v2835_v17 = vrot.slane %v6320_v43, 4  ;;  %v2933_v5 = vmul.f32 %v6320_v43, %v8760_v59 }
 0x4ef   : > { %v2966_v3 = vmul.f32 %v8769_v8, %v2908_v14  ;;  %v3037_v10 = vmul.f32 %v8763_v54, %v2908_v14  ;;  %v8974_v61 = vmul.f32 %v8766_v56, %v2908_v14  ;;  %v8977_v42 = vmul.f32 %v8772_v58, %v2908_v14  ;;  %v2701_v55 = vpop.f32.mrf.mxu0  ;;  %10898 = vst [vmem:[#allocation33_spill] sm:$0xff] %v8988_v48 }
 0x4f0   : > { %v2836_v47 = vsel %vm1346_vm1, %v2833_v57, %v2835_v17  ;;  %v3041_v30 = vmul.f32 %v8763_v54, %v2835_v17  ;;  %v3261_v7 = vmul.f32 %v8766_v56, %v2835_v17  ;;  %v8985_v15 = vmul.f32 %v8772_v58, %v2835_v17  ;;  %v6644_v17 = vld [vmem:[#allocation7 + $0x88] sm:$0xff]  }
 0x4f1   : > { %v2998_v53 = vadd.f32 %v2966_v3, %v2930_v25  ;;  %v3129_v12 = vrot.slane %v3037_v10, 1  ;;  %v2969_v63 = vmul.f32 %v8769_v8, %v2836_v47  ;;  %v8992_v6 = vmul.f32 %v8763_v54, %v2836_v47  ;;  %6397 = vmatprep.subr.bf16.mxu0 %v6644_v17 }
 0x4f2   : > { %v8995_v28 = vmul.f32 %v8766_v56, %v2836_v47  ;;  %v3349_v11 = vrot.slane %v8974_v61, 2  ;;  %v3569_v25 = vrot.slane %v8977_v42, 3  ;;  %v3136_v43 = vrot.slane %v3041_v30, 1  ;;  %6398 = vmatpush3.bf16.msra.mxu0 %v6644_v17 }
 0x4f3   : > { %v2831_v14 = vrot.slane %v2701_v55, 4  ;;  %v3134_v20 = vrot.slane %v8992_v6, 1  ;;  %v3356_v10 = vrot.slane %v3261_v7, 2  ;;  %v9002_v9 = vmul.f32 %v8772_v58, %v2836_v47 }
 0x4f4   : > { %v10536_v3 = vrot.slane %v8995_v28, 2  ;;  %v3001_v23 = vadd.f32 %v2969_v63, %v2933_v5  ;;  %v2931_v42 = vmul.f32 %v8760_v59, %v2701_v55  ;;  %v3436_v6 = vadd.f32 %v3346_v62, %v3216_v31 }
 0x4f5   : > { %v2832_v26 = vsel %vm1346_vm1, %v2830_v41, %v2831_v14  ;;  %v2834_v61 = vsel %vm1346_vm1, %v2831_v14, %v2833_v57  ;;  %v3137_v7 = vsel %vm1640_vm2, %v3134_v20, %v3136_v43  ;;  %v3752_v51 = vpack.c.bf16 %v8988_v48, %v9010_v16 }
 0x4f6   : > { %v2967_v30 = vmul.f32 %v8769_v8, %v2832_v26  ;;  %v3038_v47 = vmul.f32 %v8763_v54, %v2832_v26  ;;  %v3039_v5 = vmul.f32 %v8763_v54, %v2834_v61  ;;  %v3258_v63 = vmul.f32 %v8766_v56, %v2832_v26 }
 0x4f7   : > { %v3357_v57 = vsel %vm1861_vm3, %v10536_v3, %v3356_v10  ;;  %v3259_v55 = vmul.f32 %v8766_v56, %v2834_v61  ;;  %v3478_v39 = vmul.f32 %v8772_v58, %v2832_v26  ;;  %v2968_v62 = vmul.f32 %v8769_v8, %v2834_v61  ;;  %6361 = vmatprep.mubr.bf16.mxu1 %v3752_v51 }
 0x4f8   : > { %v2999_v41 = vadd.f32 %v2967_v30, %v2931_v42  ;;  %v3130_v34 = vrot.slane %v3038_v47, 1  ;;  %v3132_v31 = vrot.slane %v3039_v5, 1  ;;  %v3350_v29 = vrot.slane %v3258_v63, 2 }
 0x4f9   : > { %v3221_v43 = vadd.f32 %v3137_v7, %v3001_v23  ;;  %v3352_v14 = vrot.slane %v3259_v55, 2  ;;  %v9023_v52 = vmul.f32 %v8772_v58, %v2834_v61  ;;  %v3570_v42 = vrot.slane %v3478_v39, 3 }
 0x4fa   : > { %v3133_v10 = vsel %vm1640_vm2, %v3130_v34, %v3132_v31  ;;  %v10901_v30 = vrot.slane %v8930_v32, 3  ;;  %v3131_v47 = vsel %vm1640_vm2, %v3129_v12, %v3130_v34  ;;  %v10902_v61 = vrot.slane %v8895_v60, 3 }
 0x4fb   : > { %v3219_v5 = vadd.f32 %v3133_v10, %v2999_v41  ;;  %v10537_v23 = vrot.slane %v9023_v52, 3  ;;  %v3000_v17 = vadd.f32 %v2968_v62, %v8966_v2  ;;  %v3353_v55 = vsel %vm1861_vm3, %v3350_v29, %v3352_v14  ;;  %v10903_v41 = vld [vmem:[#allocation49_spill] sm:$0xff]  ;;  %v10905_v10 = vld [vmem:[#allocation55_spill] sm:$0xff] }
 0x4fc   : > { %v3566_v26 = vsel %vm2082_vm4, %v10901_v30, %v3565_v19  ;;  %v3568_v7 = vsel %vm2082_vm4, %v3565_v19, %v10902_v61  ;;  %v3218_v3 = vadd.f32 %v3131_v47, %v2998_v53  ;;  %v9039_v30 = vadd.f32 %v3357_v57, %v3221_v43 }
 0x4fd   : > { %v3656_v63 = vadd.f32 %v3566_v26, %v3436_v6  ;;  %v3657_v32 = vadd.f32 %v3568_v7, %v8954_v38  ;;  %v3439_v12 = vadd.f32 %v3353_v55, %v3219_v5  ;;  %v3351_v51 = vsel %vm1861_vm3, %v3349_v11, %v3350_v29 }
 0x4fe   : > { %v3438_v6 = vadd.f32 %v3351_v51, %v3218_v3  ;;  %v3571_v2 = vsel %vm2082_vm4, %v3569_v25, %v3570_v42  ;;  %v3135_v62 = vsel %vm1640_vm2, %v3132_v31, %v3134_v20  ;;  %v3573_v57 = vsel %vm2082_vm4, %v3570_v42, %v10537_v23 }
 0x4ff   : > { %v9042_v34 = vadd.f32 %v3656_v63, %v10903_v41  ;;  %v9046_v19 = vadd.f32 %v3657_v32, %v10905_v10  ;;  %v3659_v3 = vadd.f32 %v3573_v57, %v3439_v12  ;;  %v3220_v47 = vadd.f32 %v3135_v62, %v3000_v17 }
 0x500   : > { %v3658_v31 = vadd.f32 %v3571_v2, %v3438_v6  ;;  %v10907_v5 = vrot.slane %v8995_v28, 2 }
 0x501   : > { %10904 = vst [vmem:[#allocation34_spill] sm:$0xff] %v9042_v34  ;;  %10906 = vst [vmem:[#allocation40_spill] sm:$0xff] %v9046_v19  ;;  %v3753_v43 = vpack.c.bf16 %v9046_v19, %v9042_v34 }
 0x502   : > { %v6323_v39 = vpop.f32.mrf.mxu0  ;;  %v3355_v61 = vsel %vm1861_vm3, %v3352_v14, %v10907_v5  ;;  %v3574_v14 = vrot.slane %v9002_v9, 3 }
 0x503   : > { %v2840_v26 = vrot.slane %v6323_v39, 4  ;;  %v9051_v38 = vmul.f32 %v6323_v39, %v8760_v59  ;;  %6362 = vmatmul.mubr.bf16.gmra.mxu1 %v3753_v43 }
 0x504   : > { %v2714_v60 = vpop.f32.mrf.mxu0 }
 0x505   : > { %v2837_v53 = vrot.slane %v2714_v60, 4  ;;  %v2934_v11 = vmul.f32 %v8760_v59, %v2714_v60  ;;  %v10908_v60 = vld [vmem:[#allocation17_spill] sm:$0xff] }
 0x506   : > { %v6324_v29 = vpop.f32.mrf.mxu0  ;;  %v9080_v10 = vadd.f32 %v3659_v3, %v10908_v60 }
 0x507   : > { %v2909_v25 = vsel %vm1346_vm1, 0.0, %v2837_v53  ;;  %v2842_v20 = vrot.slane %v6324_v29, 4  ;;  %v2937_v41 = vmul.f32 %v6324_v29, %v8760_v59 }
 0x508   : > { %v2970_v7 = vmul.f32 %v8769_v8, %v2909_v25  ;;  %v3042_v42 = vmul.f32 %v8763_v54, %v2909_v25  ;;  %v9066_v63 = vmul.f32 %v8766_v56, %v2909_v25  ;;  %v9069_v55 = vmul.f32 %v8772_v58, %v2909_v25  ;;  %v2717_v28 = vpop.f32.mrf.mxu0  ;;  %10909 = vst [vmem:[#allocation37_spill] sm:$0xff] %v9080_v10 }
 0x509   : > { %v2843_v17 = vsel %vm1346_vm1, %v2840_v26, %v2842_v20  ;;  %v3046_v39 = vmul.f32 %v8763_v54, %v2842_v20  ;;  %v3266_v32 = vmul.f32 %v8766_v56, %v2842_v20  ;;  %v9077_v51 = vmul.f32 %v8772_v58, %v2842_v20 }
 0x50a   : > { %v3002_v12 = vadd.f32 %v2970_v7, %v2934_v11  ;;  %v2973_v6 = vmul.f32 %v8769_v8, %v2843_v17  ;;  %v9084_v2 = vmul.f32 %v8763_v54, %v2843_v17  ;;  %v9087_v57 = vmul.f32 %v8766_v56, %v2843_v17 }
 0x50b   : > { %v3145_v62 = vrot.slane %v3046_v39, 1  ;;  %v3138_v43 = vrot.slane %v3042_v42, 1  ;;  %v3358_v9 = vrot.slane %v9066_v63, 2  ;;  %v3578_v11 = vrot.slane %v9069_v55, 3 }
 0x50c   : > { %v2838_v29 = vrot.slane %v2717_v28, 4  ;;  %v3143_v25 = vrot.slane %v9084_v2, 1  ;;  %v3363_v3 = vrot.slane %v9087_v57, 2  ;;  %v3365_v20 = vrot.slane %v3266_v32, 2  ;;  %v10910_v2 = vld [vmem:[#allocation52_spill] sm:$0xff] }
 0x50d   : > { %v9094_v5 = vmul.f32 %v8772_v58, %v2843_v17  ;;  %v3005_v7 = vadd.f32 %v2973_v6, %v2937_v41  ;;  %v2935_v55 = vmul.f32 %v8760_v59, %v2717_v28  ;;  %v9103_v19 = vadd.f32 %v3658_v31, %v10910_v2 }
 0x50e   : > { %v2839_v60 = vsel %vm1346_vm1, %v2837_v53, %v2838_v29  ;;  %v2841_v42 = vsel %vm1346_vm1, %v2838_v29, %v2840_v26  ;;  %v3146_v63 = vsel %vm1640_vm2, %v3143_v25, %v3145_v62  ;;  %v3440_v6 = vadd.f32 %v3355_v61, %v3220_v47 }
 0x50f   : > { %v2971_v23 = vmul.f32 %v8769_v8, %v2839_v60  ;;  %10911 = vst [vmem:[#allocation39_spill] sm:$0xff] %v9103_v19  ;;  %v3043_v32 = vmul.f32 %v8763_v54, %v2839_v60  ;;  %v3044_v17 = vmul.f32 %v8763_v54, %v2841_v42  ;;  %v3263_v41 = vmul.f32 %v8766_v56, %v2839_v60 }
 0x510   : > { %v3366_v26 = vsel %vm1861_vm3, %v3363_v3, %v3365_v20  ;;  %v3264_v62 = vmul.f32 %v8766_v56, %v2841_v42  ;;  %v3483_v28 = vmul.f32 %v8772_v58, %v2839_v60  ;;  %v3225_v29 = vadd.f32 %v3146_v63, %v3005_v7 }
 0x511   : > { %v3003_v53 = vadd.f32 %v2971_v23, %v2935_v55  ;;  %v2972_v31 = vmul.f32 %v8769_v8, %v2841_v42  ;;  %v3139_v2 = vrot.slane %v3043_v32, 1  ;;  %v3141_v39 = vrot.slane %v3044_v17, 1 }
 0x512   : > { %v3359_v34 = vrot.slane %v3263_v41, 2  ;;  %v3361_v48 = vrot.slane %v3264_v62, 2  ;;  %v9115_v16 = vmul.f32 %v8772_v58, %v2841_v42  ;;  %v3754_v47 = vpack.c.bf16 %v9080_v10, %v9103_v19 }
 0x513   : > { %v3142_v61 = vsel %vm1640_vm2, %v3139_v2, %v3141_v39  ;;  %v3579_v23 = vrot.slane %v3483_v28, 3  ;;  %v10912_v20 = vrot.slane %v9023_v52, 3  ;;  %v3140_v7 = vsel %vm1640_vm2, %v3138_v43, %v3139_v2 }
 0x514   : > { %v3223_v63 = vadd.f32 %v3142_v61, %v3003_v53  ;;  %v10542_v55 = vrot.slane %v9115_v16, 3  ;;  %6365 = vmatprep.mubr.bf16.mxu1 %v3754_v47  ;;  %v10913_v42 = vrot.slane %v8985_v15, 3  ;;  %v9128_v62 = vadd.f32 %v3366_v26, %v3225_v29  ;;  %v10914_v61 = vld [vmem:[#allocation54_spill] sm:$0xff]  ;;  %v10916_v26 = vld [vmem:[#allocation19_spill] sm:$0xff] }
 0x515   : > { %v3575_v60 = vsel %vm2082_vm4, %v10912_v20, %v3574_v14  ;;  %v9131_v28 = vadd.f32 %v2972_v31, %v9051_v38  ;;  %v3222_v20 = vadd.f32 %v3140_v7, %v3002_v12  ;;  %v3362_v43 = vsel %vm1861_vm3, %v3359_v34, %v3361_v48 }
 0x516   : > { %v3577_v17 = vsel %vm2082_vm4, %v3574_v14, %v10913_v42  ;;  %v3660_v41 = vadd.f32 %v3575_v60, %v3440_v6  ;;  %v9141_v14 = vadd.f32 %v3362_v43, %v3223_v63  ;;  %v3360_v38 = vsel %vm1861_vm3, %v3358_v9, %v3359_v34 }
 0x517   : > { %v3661_v52 = vadd.f32 %v3577_v17, %v9039_v30  ;;  %v9148_v31 = vadd.f32 %v3360_v38, %v3222_v20  ;;  %v9151_v60 = vsel %vm2082_vm4, %v3578_v11, %v3579_v23  ;;  %v9156_v7 = vsel %vm2082_vm4, %v3579_v23, %v10542_v55 }
 0x518   : > { %v9139_v15 = vadd.f32 %v3660_v41, %v10914_v61  ;;  %v9162_v34 = vsel %vm1640_vm2, %v3141_v39, %v3143_v25  ;;  %v9180_v25 = vsel %vm1861_vm3, %v3361_v48, %v3363_v3 }
 0x519   : > { %v9144_v29 = vadd.f32 %v3661_v52, %v10916_v26 }
 0x51a   : > { %10915 = vst [vmem:[#allocation38_spill] sm:$0xff] %v9139_v15 }
 0x51b   : > { %v6327_v32 = vpop.f32.mrf.mxu0  ;;  %10917 = vst [vmem:[#allocation46_spill] sm:$0xff] %v9144_v29  ;;  %v3755_v42 = vpack.c.bf16 %v9144_v29, %v9139_v15 }
 0x51c   : > { %v2847_v53 = vrot.slane %v6327_v32, 4  ;;  %v9136_v2 = vmul.f32 %v6327_v32, %v8760_v59 }
 0x51d   : > { %v2730_v47 = vpop.f32.mrf.mxu0  ;;  %6366 = vmatmul.mubr.bf16.gmra.mxu1 %v3755_v42 }
 0x51e   : > { %v2844_v6 = vrot.slane %v2730_v47, 4  ;;  %v2938_v30 = vmul.f32 %v8760_v59, %v2730_v47 }
 0x51f   : > { %v6328_v12 = vpop.f32.mrf.mxu0 }
 0x520   : > { %v2910_v63 = vsel %vm1346_vm1, 0.0, %v2844_v6  ;;  %v2849_v32 = vrot.slane %v6328_v12, 4  ;;  %v2941_v47 = vmul.f32 %v6328_v12, %v8760_v59 }
 0x521   : > { %v2974_v9 = vmul.f32 %v8769_v8, %v2910_v63  ;;  %v9166_v17 = vmul.f32 %v8763_v54, %v2910_v63  ;;  %v9169_v11 = vmul.f32 %v8766_v56, %v2910_v63  ;;  %v9172_v23 = vmul.f32 %v8772_v58, %v2910_v63  ;;  %v2733_v41 = vpop.f32.mrf.mxu0 }
 0x522   : > { %v2850_v52 = vsel %vm1346_vm1, %v2847_v53, %v2849_v32  ;;  %v3051_v20 = vmul.f32 %v8763_v54, %v2849_v32  ;;  %v3271_v43 = vmul.f32 %v8766_v56, %v2849_v32  ;;  %v9186_v61 = vmul.f32 %v8772_v58, %v2849_v32 }
 0x523   : > { %v9182_v39 = vadd.f32 %v2974_v9, %v2938_v30  ;;  %v2977_v63 = vmul.f32 %v8769_v8, %v2850_v52  ;;  %v9193_v42 = vmul.f32 %v8763_v54, %v2850_v52  ;;  %v9196_v48 = vmul.f32 %v8766_v56, %v2850_v52 }
 0x524   : > { %v9188_v26 = vpop.f32.mrf.mxu0  ;;  %v3154_v57 = vrot.slane %v3051_v20, 1  ;;  %v2845_v32 = vrot.slane %v2733_v41, 4  ;;  %v3374_v38 = vrot.slane %v3271_v43, 2  ;;  %v9203_v29 = vmul.f32 %v8772_v58, %v2850_v52 }
 0x525   : > { %v3009_v9 = vadd.f32 %v2977_v63, %v2941_v47  ;;  %v10547_v55 = vrot.slane %v9193_v42, 1  ;;  %v2939_v63 = vmul.f32 %v8760_v59, %v2733_v41  ;;  %v2944_v36 = vmul.f32 %v9188_v26, %v8760_v59 }
 0x526   : > { %v9205_v15 = vpop.f32.mrf.mxu0  ;;  %v2846_v3 = vsel %vm1346_vm1, %v2844_v6, %v2845_v32  ;;  %v2848_v30 = vsel %vm1346_vm1, %v2845_v32, %v2847_v53 }
 0x527   : > { %v3155_v47 = vsel %vm1640_vm2, %v10547_v55, %v3154_v57  ;;  %v2975_v43 = vmul.f32 %v8769_v8, %v2846_v3  ;;  %v2976_v52 = vmul.f32 %v8769_v8, %v2848_v30  ;;  %v9218_v19 = vmul.f32 %v8763_v54, %v2846_v3 }
 0x528   : > { %v3229_v12 = vadd.f32 %v3155_v47, %v3009_v9  ;;  %v9221_v10 = vmul.f32 %v8763_v54, %v2848_v30  ;;  %v9224_v6 = vmul.f32 %v8766_v56, %v2846_v3  ;;  %v9227_v32 = vmul.f32 %v8766_v56, %v2848_v30  ;;  %v6332_v55 = vpop.f32.mrf.mxu0  ;;  %v6645_v9 = vld [vmem:[#allocation7 + $0x80] sm:$0xff]  }
 0x529   : > { %v3007_v53 = vadd.f32 %v2975_v43, %v2939_v63  ;;  %v9230_v41 = vmul.f32 %v8772_v58, %v2846_v3  ;;  %v2854_v57 = vrot.slane %v9188_v26, 4  ;;  %v10918_v63 = vrot.slane %v9196_v48, 2  ;;  %6399 = vmatprep.subr.bf16.mxu0 %v6645_v9 }
 0x52a   : > { %v10549_v20 = vrot.slane %v9221_v10, 1  ;;  %v9242_v3 = vadd.f32 %v2976_v52, %v9136_v2  ;;  %v10551_v35 = vrot.slane %v9227_v32, 2  ;;  %v2851_v0 = vrot.slane %v9205_v15, 4  ;;  %6400 = vmatpush3.bf16.msra.mxu0 %v6645_v9  ;;  %v2749_v9 = vpop.f32.mrf.mxu0 }
 0x52b   : > { %v3375_v43 = vsel %vm1861_vm3, %v10918_v63, %v3374_v38  ;;  %v10919_v27 = vrot.slane %v9218_v19, 1  ;;  %v9254_v46 = vmul.f32 %v8772_v58, %v2848_v30  ;;  %v2856_v38 = vrot.slane %v6332_v55, 4 }
 0x52c   : > { %v9246_v47 = vadd.f32 %v3375_v43, %v3229_v12  ;;  %v2911_v63 = vsel %vm1346_vm1, 0.0, %v2851_v0  ;;  %v2942_v12 = vmul.f32 %v8760_v59, %v9205_v15  ;;  %v10920_v43 = vrot.slane %v9224_v6, 2 }
 0x52d   : > { %v3151_v26 = vsel %vm1640_vm2, %v10919_v27, %v10549_v20  ;;  %v2978_v27 = vmul.f32 %v8769_v8, %v2911_v63  ;;  %v9267_v30 = vmul.f32 %v8763_v54, %v2911_v63  ;;  %v2857_v15 = vsel %vm1346_vm1, %v2854_v57, %v2856_v38 }
 0x52e   : > { %v3227_v2 = vadd.f32 %v3151_v26, %v3007_v53  ;;  %v3371_v4 = vsel %vm1861_vm3, %v10920_v43, %v10551_v35  ;;  %v9270_v53 = vmul.f32 %v8766_v56, %v2911_v63  ;;  %v9273_v26 = vmul.f32 %v8772_v58, %v2911_v63 }
 0x52f   : > { %v3056_v20 = vmul.f32 %v8763_v54, %v2856_v38  ;;  %v3276_v52 = vmul.f32 %v8766_v56, %v2856_v38  ;;  %v9281_v35 = vadd.f32 %v2978_v27, %v2942_v12  ;;  %v2945_v44 = vmul.f32 %v6332_v55, %v8760_v59  ;;  %v9296_v27 = vpop.f32.mrf.mxu0 }
 0x530   : > { %10921 = vst [vmem:[#allocation56_spill] sm:$0xff] %v9273_v26  ;;  %v9278_v13 = vadd.f32 %v3371_v4, %v3227_v2  ;;  %v2981_v18 = vmul.f32 %v8769_v8, %v2857_v15  ;;  %v9286_v49 = vmul.f32 %v8763_v54, %v2857_v15  ;;  %v9289_v33 = vmul.f32 %v8766_v56, %v2857_v15 }
 0x531   : > { %v3163_v63 = vrot.slane %v3056_v20, 1  ;;  %v9294_v2 = vmul.f32 %v8772_v58, %v2856_v38  ;;  %v2852_v12 = vrot.slane %v2749_v9, 4  ;;  %v3383_v45 = vrot.slane %v3276_v52, 2 }
 0x532   : > { %10922 = vst [vmem:[#allocation57_spill] sm:$0xff] %v9286_v49  ;;  %10923 = vst [vmem:[#allocation58_spill] sm:$0xff] %v9289_v33  ;;  %v3013_v43 = vadd.f32 %v2981_v18, %v2945_v44  ;;  %v10561_v37 = vrot.slane %v9286_v49, 1  ;;  %v10565_v20 = vrot.slane %v9289_v33, 2  ;;  %v9302_v40 = vmul.f32 %v8772_v58, %v2857_v15 }
 0x533   : > { %10924 = vst [vmem:[#allocation61_spill] sm:$0xff] %v9294_v2  ;;  %v2853_v21 = vsel %vm1346_vm1, %v2851_v0, %v2852_v12  ;;  %v2855_v4 = vsel %vm1346_vm1, %v2852_v12, %v2854_v57  ;;  %v2943_v22 = vmul.f32 %v8760_v59, %v2749_v9  ;;  %v9322_v57 = vpop.f32.mrf.mxu0  ;;  %v2861_v49 = vrot.slane %v9296_v27, 4 }
 0x534   : > { %10925 = vst [vmem:[#allocation60_spill] sm:$0xff] %v9302_v40  ;;  %v3164_v38 = vsel %vm1640_vm2, %v10561_v37, %v3163_v63  ;;  %v2979_v18 = vmul.f32 %v8769_v8, %v2853_v21  ;;  %v2980_v44 = vmul.f32 %v8769_v8, %v2855_v4  ;;  %v9314_v55 = vmul.f32 %v8763_v54, %v2853_v21 }
 0x535   : > { %v9317_v15 = vmul.f32 %v8763_v54, %v2855_v4  ;;  %v9320_v0 = vmul.f32 %v8766_v56, %v2853_v21  ;;  %v3233_v63 = vadd.f32 %v3164_v38, %v3013_v43  ;;  %v9325_v9 = vmul.f32 %v8766_v56, %v2855_v4 }
 0x536   : > { %v3011_v12 = vadd.f32 %v2979_v18, %v2943_v22  ;;  %v9328_v37 = vmul.f32 %v8772_v58, %v2853_v21  ;;  %v3384_v52 = vsel %vm1861_vm3, %v10565_v20, %v3383_v45  ;;  %v10568_v2 = vrot.slane %v9314_v55, 1 }
 0x537   : > { %v10567_v40 = vrot.slane %v9317_v15, 1  ;;  %v9336_v26 = vadd.f32 %v2980_v44, %v2944_v36  ;;  %v9341_v38 = vmul.f32 %v8772_v58, %v2855_v4  ;;  %v3662_v21 = vadd.f32 %v9151_v60, %v9148_v31  ;;  %v6336_v44 = vpop.f32.mrf.mxu0 }
 0x538   : > { %v3663_v36 = vadd.f32 %v9156_v7, %v9141_v14  ;;  %v2858_v18 = vrot.slane %v9322_v57, 4  ;;  %v9353_v20 = vadd.f32 %v3384_v52, %v3233_v63  ;;  %v2948_v43 = vmul.f32 %v9296_v27, %v8760_v59 }
 0x539   : > { %v3160_v45 = vsel %vm1640_vm2, %v10568_v2, %v10567_v40  ;;  %v9359_v33 = vadd.f32 %v3662_v21, %v8466_v1  ;;  %v10928_v40 = vld [vmem:[#allocation24_spill] sm:$0xff]  ;;  %v3224_v14 = vadd.f32 %v9162_v34, %v9131_v28  ;;  %v10930_v60 = vrot.slane %v9325_v9, 2 }
 0x53a   : > { %10926 = vst [vmem:[#allocation47_spill] sm:$0xff] %v9353_v20  ;;  %v3231_v22 = vadd.f32 %v3160_v45, %v3011_v12  ;;  %v9362_v2 = vadd.f32 %v3663_v36, %v10928_v40  ;;  %v2912_v31 = vsel %vm1346_vm1, 0.0, %v2858_v18  ;;  %v10931_v7 = vrot.slane %v9320_v0, 2  ;;  %v2765_v45 = vpop.f32.mrf.mxu0 }
 0x53b   : > { %10927 = vst [vmem:[#allocation16_spill] sm:$0xff] %v9359_v33  ;;  %v2982_v63 = vmul.f32 %v8769_v8, %v2912_v31  ;;  %v9374_v27 = vmul.f32 %v8763_v54, %v2912_v31  ;;  %v9377_v1 = vmul.f32 %v8766_v56, %v2912_v31  ;;  %v2946_v28 = vmul.f32 %v8760_v59, %v9322_v57 }
 0x53c   : > { %10929 = vst [vmem:[#allocation48_spill] sm:$0xff] %v9362_v2  ;;  %v3380_v52 = vsel %vm1861_vm3, %v10931_v7, %v10930_v60  ;;  %v3756_v12 = vpack.c.bf16 %v9362_v2, %v9359_v33  ;;  %v3444_v34 = vadd.f32 %v9180_v25, %v3224_v14  ;;  %v9388_v36 = vmul.f32 %v8772_v58, %v2912_v31 }
 0x53d   : > { %v9385_v21 = vadd.f32 %v3380_v52, %v3231_v22  ;;  %v10932_v60 = vrot.slane %v9094_v5, 3  ;;  %v10933_v7 = vrot.slane %v9115_v16, 3  ;;  %v10934_v4 = vrot.slane %v9077_v51, 3  ;;  %v10937_v5 = vld [vmem:[#allocation59_spill] sm:$0xff] }
 0x53e   : > { %6369 = vmatprep.mubr.bf16.mxu1 %v3756_v12  ;;  %v9400_v25 = vadd.f32 %v2982_v63, %v2946_v28  ;;  %v2863_v31 = vrot.slane %v6336_v44, 4  ;;  %v2949_v16 = vmul.f32 %v6336_v44, %v8760_v59  ;;  %v10940_v33 = vrot.slane %v9166_v17, 1 }
 0x53f   : > { %v3584_v40 = vsel %vm2082_vm4, %v10933_v7, %v10932_v60  ;;  %v10935_v2 = vmov %v10932_v60  ;;  %v2859_v60 = vrot.slane %v2765_v45, 4  ;;  %v10936_v7 = vld [vmem:[#allocation21_spill] sm:$0xff] }
 0x540   : > { %v3586_v57 = vsel %vm2082_vm4, %v10935_v2, %v10934_v4  ;;  %v3664_v22 = vadd.f32 %v3584_v40, %v3444_v34  ;;  %v2864_v2 = vsel %vm1346_vm1, %v2861_v49, %v2863_v31  ;;  %v3061_v4 = vmul.f32 %v8763_v54, %v2863_v31 }
 0x541   : > { %v3665_v14 = vadd.f32 %v3586_v57, %v9128_v62  ;;  %v2985_v62 = vmul.f32 %v8769_v8, %v2864_v2  ;;  %v9416_v63 = vmul.f32 %v8763_v54, %v2864_v2  ;;  %v9419_v40 = vmul.f32 %v8766_v56, %v2864_v2 }
 0x542   : > { %v9407_v51 = vadd.f32 %v3664_v22, %v10936_v7  ;;  %v9422_v44 = vmul.f32 %v8766_v56, %v2863_v31  ;;  %v3172_v34 = vrot.slane %v3061_v4, 1  ;;  %v2947_v57 = vmul.f32 %v8760_v59, %v2765_v45 }
 0x543   : > { %v9410_v20 = vadd.f32 %v3665_v14, %v10937_v5  ;;  %v3017_v22 = vadd.f32 %v2985_v62, %v2949_v16  ;;  %v3170_v14 = vrot.slane %v9416_v63, 1  ;;  %v9430_v7 = vmul.f32 %v8772_v58, %v2864_v2 }
 0x544   : > { %v10939_v5 = vrot.slane %v9218_v19, 1  ;;  %v2860_v59 = vsel %vm1346_vm1, %v2858_v18, %v2859_v60  ;;  %v2862_v45 = vsel %vm1346_vm1, %v2859_v60, %v2861_v49 }
 0x545   : > { %10938 = vst [vmem:[#allocation50_spill] sm:$0xff] %v9410_v20  ;;  %v3757_v28 = vpack.c.bf16 %v9410_v20, %v9407_v51  ;;  %v9439_v20 = vmul.f32 %v8772_v58, %v2863_v31  ;;  %v3173_v16 = vsel %vm1640_vm2, %v3170_v14, %v3172_v34  ;;  %v2983_v17 = vmul.f32 %v8769_v8, %v2860_v59 }
 0x546   : > { %v3149_v52 = vsel %vm1640_vm2, %v10940_v33, %v10939_v5  ;;  %v2984_v33 = vmul.f32 %v8769_v8, %v2862_v45  ;;  %v3058_v2 = vmul.f32 %v8763_v54, %v2860_v59  ;;  %v9451_v4 = vmul.f32 %v8763_v54, %v2862_v45 }
 0x547   : > { %6370 = vmatmul.mubr.bf16.gmra.mxu1 %v3757_v28  ;;  %v3278_v31 = vmul.f32 %v8766_v56, %v2860_v59  ;;  %v3226_v18 = vadd.f32 %v3149_v52, %v9182_v39  ;;  %v9455_v49 = vadd.f32 %v3173_v16, %v3017_v22  ;;  %v3015_v60 = vadd.f32 %v2983_v17, %v2947_v57 }
 0x548   : > { %v9458_v62 = vmul.f32 %v8766_v56, %v2862_v45  ;;  %v3498_v28 = vmul.f32 %v8772_v58, %v2860_v59  ;;  %v9461_v34 = vadd.f32 %v2984_v33, %v2948_v43  ;;  %v3166_v8 = vrot.slane %v3058_v2, 1 }
 0x549   : > { %v3168_v5 = vrot.slane %v9451_v4, 1  ;;  %v3386_v12 = vrot.slane %v3278_v31, 2  ;;  %v9466_v19 = vmul.f32 %v8772_v58, %v2862_v45  ;;  %v10941_v52 = vrot.slane %v9224_v6, 2 }
 0x54a   : > { %v3388_v54 = vrot.slane %v9458_v62, 2  ;;  %v3606_v39 = vrot.slane %v3498_v28, 3  ;;  %v10942_v57 = vrot.slane %v9169_v11, 2  ;;  %v10943_v59 = vrot.slane %v9230_v41, 3 }
 0x54b   : > { %v3169_v22 = vsel %vm1640_vm2, %v3166_v8, %v3168_v5  ;;  %v10944_v16 = vrot.slane %v9172_v23, 3  ;;  %v10945_v33 = vrot.slane %v9254_v46, 3  ;;  %v3608_v2 = vrot.slane %v9466_v19, 3  ;;  %v10958_v46 = vld [vmem:[#allocation56_spill] sm:$0xff] }
 0x54c   : > { %v3369_v56 = vsel %vm1861_vm3, %v10942_v57, %v10941_v52  ;;  %v10946_v58 = vmov %v10943_v59  ;;  %v3235_v6 = vadd.f32 %v3169_v22, %v3015_v60  ;;  %v3389_v11 = vsel %vm1861_vm3, %v3386_v12, %v3388_v54 }
 0x54d   : > { %v3446_v43 = vadd.f32 %v3369_v56, %v3226_v18  ;;  %v3589_v17 = vsel %vm2082_vm4, %v10944_v16, %v10943_v59  ;;  %v3591_v45 = vsel %vm2082_vm4, %v10946_v58, %v10945_v33  ;;  %v10947_v23 = vrot.slane %v9193_v42, 1 }
 0x54e   : > { %v3667_v4 = vadd.f32 %v3591_v45, %v9278_v13  ;;  %v10948_v18 = vrot.slane %v9221_v10, 1  ;;  %v10949_v41 = vrot.slane %v9196_v48, 2  ;;  %v10950_v52 = vrot.slane %v9227_v32, 2 }
 0x54f   : > { %v3666_v31 = vadd.f32 %v3589_v17, %v3446_v43  ;;  %v3592_v57 = vrot.slane %v9203_v29, 3  ;;  %v3455_v56 = vadd.f32 %v3389_v11, %v3235_v6  ;;  %v10951_v42 = vrot.slane %v9314_v55, 1  ;;  %v10962_v11 = vld [vmem:[#allocation57_spill] sm:$0xff] }
 0x550   : > { %v3153_v28 = vsel %vm1640_vm2, %v10948_v18, %v10947_v23  ;;  %v3373_v60 = vsel %vm1861_vm3, %v10950_v52, %v10949_v41  ;;  %v9501_v22 = vadd.f32 %v3667_v4, %v8603_v50  ;;  %v10952_v10 = vrot.slane %v9267_v30, 1  ;;  %v10965_v18 = vld [vmem:[#allocation23_spill] sm:$0xff] }
 0x551   : > { %v3228_v13 = vadd.f32 %v3153_v28, %v9242_v3  ;;  %v9510_v48 = vadd.f32 %v3666_v31, %v8599_v24  ;;  %v10953_v32 = vmov %v10945_v33  ;;  %v10954_v29 = vrot.slane %v9186_v61, 3 }
 0x552   : > { %v3158_v43 = vsel %vm1640_vm2, %v10952_v10, %v10951_v42  ;;  %v3593_v59 = vsel %vm2082_vm4, %v10953_v32, %v3592_v57  ;;  %v10955_v30 = vrot.slane %v9320_v0, 2  ;;  %v10956_v17 = vrot.slane %v9270_v53, 2  ;;  %v10969_v10 = vld [vmem:[#allocation60_spill] sm:$0xff] }
 0x553   : > { %v3595_v50 = vsel %vm2082_vm4, %v3592_v57, %v10954_v29  ;;  %v3230_v16 = vadd.f32 %v3158_v43, %v9281_v35  ;;  %v3448_v3 = vadd.f32 %v3373_v60, %v3228_v13  ;;  %v10957_v33 = vrot.slane %v9328_v37, 3  ;;  %v10966_v57 = vld [vmem:[#allocation58_spill] sm:$0xff] }
 0x554   : > { %v3669_v55 = vadd.f32 %v3595_v50, %v9246_v47  ;;  %v3378_v24 = vsel %vm1861_vm3, %v10956_v17, %v10955_v30  ;;  %v10959_v58 = vrot.slane %v10958_v46, 3  ;;  %v3758_v61 = vpack.c.bf16 %v9501_v22, %v9510_v48  ;;  %v10976_v17 = vld [vmem:[#allocation61_spill] sm:$0xff] }
 0x555   : > { %v3450_v6 = vadd.f32 %v3378_v24, %v3230_v16  ;;  %v10960_v35 = vrot.slane %v9341_v38, 3  ;;  %v10961_v47 = vmov %v10957_v33  ;;  %v10963_v53 = vrot.slane %v10962_v11, 1 }
 0x556   : > { %v3598_v45 = vsel %vm2082_vm4, %v10959_v58, %v10957_v33  ;;  %v10964_v4 = vrot.slane %v9317_v15, 1  ;;  %v3668_v23 = vadd.f32 %v3593_v59, %v3448_v3  ;;  %v9543_v28 = vadd.f32 %v3669_v55, %v10965_v18  ;;  %6373 = vmatprep.mubr.bf16.mxu1 %v3758_v61  ;;  %v10971_v59 = vld [vmem:[#allocation22_spill] sm:$0xff]  ;;  %v10973_v3 = vld [vmem:[#allocation28_spill] sm:$0xff]  ;;  %v10987_v18 = vld [vmem:[#allocation27_spill] sm:$0xff] }
 0x557   : > { %v3600_v0 = vsel %vm2082_vm4, %v10961_v47, %v10960_v35  ;;  %v3670_v60 = vadd.f32 %v3598_v45, %v3450_v6  ;;  %v10967_v37 = vrot.slane %v10966_v57, 2  ;;  %v10968_v13 = vrot.slane %v9325_v9, 2 }
 0x558   : > { %v3162_v31 = vsel %vm1640_vm2, %v10964_v4, %v10963_v53  ;;  %v3671_v41 = vadd.f32 %v3600_v0, %v9385_v21  ;;  %v3601_v15 = vrot.slane %v10969_v10, 3  ;;  %v10970_v43 = vrot.slane %v9374_v27, 1  ;;  %v10972_v21 = vld [vmem:[#allocation62_spill] sm:$0xff]  ;;  %v10983_v53 = vld [vmem:[#allocation25_spill] sm:$0xff] }
 0x559   : > { %v3232_v52 = vadd.f32 %v3162_v31, %v9336_v26  ;;  %v3382_v42 = vsel %vm1861_vm3, %v10968_v13, %v10967_v37  ;;  %v9557_v29 = vadd.f32 %v3668_v23, %v10971_v59  ;;  %v9564_v55 = vadd.f32 %v3670_v60, %v10973_v3 }
 0x55a   : > { %v3167_v32 = vsel %vm1640_vm2, %v10970_v43, %v3166_v8  ;;  %v9560_v50 = vadd.f32 %v3671_v41, %v10972_v21  ;;  %v10975_v9 = vmov %v10960_v35  ;;  %v10977_v27 = vrot.slane %v10976_v17, 3  ;;  %v9634_v43 = vld [vmem:[%s10391_s4 + $0x2] ss:$0 sm:$0xff] }
 0x55b   : > { %v3452_v26 = vadd.f32 %v3382_v42, %v3232_v52  ;;  %v3234_v16 = vadd.f32 %v3167_v32, %v9400_v25  ;;  %10974 = vst [vmem:[#allocation49_spill] sm:$0xff] %v9564_v55  ;;  %v3602_v30 = vsel %vm2082_vm4, %v10975_v9, %v3601_v15  ;;  %v10978_v24 = vrot.slane %v9377_v1, 2  ;;  %v10979_v25 = vld [vmem:[#allocation47_spill] sm:$0xff] }
 0x55c   : > { %v3604_v8 = vsel %vm2082_vm4, %v3601_v15, %v10977_v27  ;;  %v3759_v46 = vpack.c.bf16 %v9543_v28, %v9557_v29  ;;  %v3760_v38 = vpack.c.bf16 %v9560_v50, %v9564_v55  ;;  %v10980_v6 = vrot.slane %v9388_v36, 3  ;;  %v10989_v52 = vld [vmem:[#allocation63_spill] sm:$0xff] }
 0x55d   : > { %v3387_v33 = vsel %vm1861_vm3, %v10978_v24, %v3386_v12  ;;  %v3672_v58 = vadd.f32 %v3602_v30, %v3452_v26  ;;  %v3673_v45 = vadd.f32 %v3604_v8, %v10979_v25  ;;  %v3609_v1 = vsel %vm2082_vm4, %v3606_v39, %v3608_v2 }
 0x55e   : > { %v3454_v61 = vadd.f32 %v3387_v33, %v3234_v16  ;;  %v3607_v35 = vsel %vm2082_vm4, %v10980_v6, %v3606_v39  ;;  %v3171_v12 = vsel %vm1640_vm2, %v3168_v5, %v3170_v14  ;;  %v10981_v47 = vrot.slane %v9422_v44, 2  ;;  %6374 = vmatmul.mubr.bf16.gmra.mxu1 %v3759_v46  ;;  %v10985_v44 = vld [vmem:[#allocation15_spill] sm:$0xff]  ;;  %v6646_v33 = vld [vmem:[#allocation8 + $0x38] sm:$0xff]   ;;  %v6647_v46 = vld [vmem:[#allocation8 + $0x30] sm:$0xff]  }
 0x55f   : > { %v10982_v0 = vrot.slane %v9419_v40, 2  ;;  %v9595_v4 = vadd.f32 %v3672_v58, %v10983_v53  ;;  %v3675_v31 = vadd.f32 %v3609_v1, %v3455_v56  ;;  %v3612_v39 = vrot.slane %v9439_v20, 3  ;;  %6377 = vmatprep.mubr.bf16.mxu1 %v3760_v38  ;;  %v10992_v40 = vld [vmem:[#allocation26_spill] sm:$0xff]  ;;  %6481 = vmatprep.subr.bf16.mxu1 %v6646_v33 }
 0x560   : > { %v3674_v36 = vadd.f32 %v3607_v35, %v3454_v61  ;;  %v3236_v63 = vadd.f32 %v3171_v12, %v9461_v34  ;;  %v3610_v14 = vrot.slane %v9430_v7, 3  ;;  %v9602_v5 = vadd.f32 %v3673_v45, %v10985_v44  ;;  %6433 = vmatprep.subr.bf16.mxu0 %v6646_v33  ;;  %6489 = vmatpush3.bf16.msra.mxu1 %v6646_v33  ;;  %v6648_v45 = vld [vmem:[#allocation8 + $0x28] sm:$0xff]  }
 0x561   : > { %v3393_v11 = vsel %vm1861_vm3, %v10982_v0, %v10981_v47  ;;  %10984 = vst [vmem:[#allocation55_spill] sm:$0xff] %v9595_v4  ;;  %v9608_v60 = vadd.f32 %v3675_v31, %v10989_v52  ;;  %v10991_v56 = vmov %v10982_v0  ;;  %6482 = vmatprep.subr.bf16.mxu1 %v6647_v46  ;;  %v6649_v47 = vld [vmem:[#allocation8 + $0x20] sm:$0xff]  }
 0x562   : > { %v3457_v23 = vadd.f32 %v3393_v11, %v9455_v49  ;;  %10986 = vst [vmem:[#allocation17_spill] sm:$0xff] %v9602_v5  ;;  %v9605_v41 = vadd.f32 %v3674_v36, %v10987_v18  ;;  %v3391_v20 = vsel %vm1861_vm3, %v3388_v54, %v10991_v56  ;;  %v3761_v34 = vpack.c.bf16 %v9602_v5, %v9595_v4  ;;  %v10994_v54 = vld [vmem:[#allocation53_spill] sm:$0xff] }
 0x563   : > { %10990 = vst [vmem:[#allocation54_spill] sm:$0xff] %v9608_v60  ;;  %v3456_v49 = vadd.f32 %v3391_v20, %v3236_v63  ;;  %v3611_v7 = vsel %vm2082_vm4, %v3608_v2, %v3610_v14  ;;  %v3613_v37 = vsel %vm2082_vm4, %v3610_v14, %v3612_v39 }
 0x564   : > { %10988 = vst [vmem:[#allocation52_spill] sm:$0xff] %v9605_v41  ;;  %v3762_v57 = vpack.c.bf16 %v9608_v60, %v9605_v41  ;;  %v3677_v42 = vadd.f32 %v3613_v37, %v3457_v23  ;;  %6490 = vmatpush3.bf16.msra.mxu1 %v6647_v46 }
 0x565   : > { %v3676_v13 = vadd.f32 %v3611_v7, %v3456_v49  ;;  %6483 = vmatprep.subr.bf16.mxu1 %v6648_v45 }
 0x566   : > { %6378 = vmatmul.mubr.bf16.gmra.mxu1 %v3761_v34  ;;  %v9627_v10 = vadd.f32 %v3677_v42, %v10994_v54 }
 0x567   : > { %v9624_v62 = vadd.f32 %v3676_v13, %v10992_v40  ;;  %6381 = vmatprep.mubr.bf16.mxu1 %v3762_v57 }
 0x568   : > { %10995 = vst [vmem:[#allocation24_spill] sm:$0xff] %v9627_v10  ;;  %6491 = vmatpush3.bf16.msra.mxu1 %v6648_v45 }
 0x569   : > { %10993 = vst [vmem:[#allocation19_spill] sm:$0xff] %v9624_v62  ;;  %v3763_v19 = vpack.c.bf16 %v9627_v10, %v9624_v62  ;;  %6484 = vmatprep.subr.bf16.mxu1 %v6649_v47 }
 0x56c   : > { %6492 = vmatpush3.bf16.msra.mxu1 %v6649_v47 }
 0x56e   : > { %6382 = vmatmul.mubr.bf16.gmra.mxu1 %v3763_v19 }
 0x58e   : > { %v6355_v2 = vpop.f32.mrf.mxu1 }
 0x58f   : > { %v3861_v26 = vadd.f32 %v6355_v2, %v9634_v43 }
 0x590   : > { %v3852_v15 = vpop.f32.mrf.mxu1 }
 0x591   : > { %v3853_v59 = vadd.f32 %v9634_v43, %v3852_v15  ;;  %v3981_v27 = vmax.f32 %v3861_v26, 0.0 }
 0x592   : > { %v6356_v32 = vpop.f32.mrf.mxu1 }
 0x593   : > { %v3864_v21 = vadd.f32 %v6356_v32, %v9634_v43  ;;  %v3979_v30 = vmax.f32 %v3853_v59, 0.0 }
 0x594   : > { %v3855_v16 = vpop.f32.mrf.mxu1 }
 0x595   : > { %v3856_v3 = vadd.f32 %v9634_v43, %v3855_v16  ;;  %v3982_v9 = vmax.f32 %v3864_v21, 0.0 }
 0x597   : > { %v3980_v17 = vmax.f32 %v3856_v3, 0.0  ;;  %v4012_v24 = vpack.c.bf16 %v3982_v9, %v3981_v27 }
 0x599   : > { %v4011_v8 = vpack.c.bf16 %v3980_v17, %v3979_v30  ;;  %v6650_v17 = vld [vmem:[#allocation8 + $0x18] sm:$0xff]  }
 0x59a   : > { %6485 = vmatprep.subr.bf16.mxu1 %v6650_v17 }
 0x59b   : > { %6401 = vmatprep.mubr.bf16.mxu0 %v4011_v8  ;;  %6493 = vmatpush3.bf16.msra.mxu1 %v6650_v17  ;;  %v6651_v8 = vld [vmem:[#allocation8 + $0x10] sm:$0xff]  }
 0x59c   : > { %6402 = vmatmul.mubr.bf16.vlgmr.msra.gmra.mxu0 %v4012_v24  ;;  %6486 = vmatprep.subr.bf16.mxu1 %v6651_v8 }
 0x59d   : > { %6434 = vmatpush3.bf16.msra.mxu0 %v6646_v33 }
 0x59e   : > { %6435 = vmatprep.subr.bf16.mxu0 %v6647_v46 }
 0x59f   : > { %6494 = vmatpush3.bf16.msra.mxu1 %v6651_v8 }
 0x5a1   : > { %6436 = vmatpush3.bf16.msra.mxu0 %v6647_v46 }
 0x5a2   : > { %6437 = vmatprep.subr.bf16.mxu0 %v6648_v45 }
 0x5a5   : > { %6438 = vmatpush3.bf16.msra.mxu0 %v6648_v45 }
 0x5a6   : > { %6439 = vmatprep.subr.bf16.mxu0 %v6649_v47 }
 0x5a9   : > { %v6359_v58 = vpop.f32.mrf.mxu1  ;;  %6440 = vmatpush3.bf16.msra.mxu0 %v6649_v47 }
 0x5aa   : > { %v3877_v35 = vadd.f32 %v6359_v58, %v9634_v43  ;;  %6441 = vmatprep.subr.bf16.mxu0 %v6650_v17 }
 0x5ab   : > { %v3868_v25 = vpop.f32.mrf.mxu1 }
 0x5ac   : > { %v3869_v38 = vadd.f32 %v9634_v43, %v3868_v25  ;;  %v3985_v36 = vmax.f32 %v3877_v35, 0.0 }
 0x5ad   : > { %v6360_v61 = vpop.f32.mrf.mxu1  ;;  %6442 = vmatpush3.bf16.msra.mxu0 %v6650_v17 }
 0x5ae   : > { %v3880_v6 = vadd.f32 %v6360_v61, %v9634_v43  ;;  %v3983_v11 = vmax.f32 %v3869_v38, 0.0  ;;  %6443 = vmatprep.subr.bf16.mxu0 %v6651_v8 }
 0x5af   : > { %v3871_v1 = vpop.f32.mrf.mxu1 }
 0x5b0   : > { %v3872_v12 = vadd.f32 %v9634_v43, %v3871_v1  ;;  %v3986_v0 = vmax.f32 %v3880_v6, 0.0 }
 0x5b1   : > { %6444 = vmatpush3.bf16.msra.mxu0 %v6651_v8 }
 0x5b2   : > { %v3984_v53 = vmax.f32 %v3872_v12, 0.0  ;;  %v4014_v23 = vpack.c.bf16 %v3986_v0, %v3985_v36 }
 0x5b4   : > { %v4013_v31 = vpack.c.bf16 %v3984_v53, %v3983_v11  ;;  %v6652_v53 = vld [vmem:[#allocation8 + $0x8] sm:$0xff]  }
 0x5b5   : > { %6487 = vmatprep.subr.bf16.mxu1 %v6652_v53  ;;  %6445 = vmatprep.subr.bf16.mxu0 %v6652_v53 }
 0x5b6   : > { %6405 = vmatprep.mubr.bf16.mxu0 %v4013_v31  ;;  %6495 = vmatpush3.bf16.msra.mxu1 %v6652_v53 }
 0x5b7   : > { %6406 = vmatmul.mubr.bf16.gmra.mxu0 %v4014_v23 }
 0x5b8   : > { %6446 = vmatpush3.bf16.msra.mxu0 %v6652_v53  ;;  %v10998_v53 = vld [vmem:[#allocation44_spill] sm:$0xff] }
 0x5c3   : > { %v6363_v39 = vpop.f32.mrf.mxu1 }
 0x5c4   : > { %v3893_v52 = vadd.f32 %v6363_v39, %v9634_v43 }
 0x5c5   : > { %v3884_v63 = vpop.f32.mrf.mxu1 }
 0x5c6   : > { %v3885_v44 = vadd.f32 %v9634_v43, %v3884_v63  ;;  %v3989_v57 = vmax.f32 %v3893_v52, 0.0 }
 0x5c7   : > { %v6364_v14 = vpop.f32.mrf.mxu1 }
 0x5c8   : > { %v3896_v18 = vadd.f32 %v6364_v14, %v9634_v43  ;;  %v3987_v34 = vmax.f32 %v3885_v44, 0.0 }
 0x5c9   : > { %v3887_v56 = vpop.f32.mrf.mxu1 }
 0x5ca   : > { %v3888_v20 = vadd.f32 %v9634_v43, %v3887_v56  ;;  %v3990_v49 = vmax.f32 %v3896_v18, 0.0 }
 0x5cc   : > { %v3988_v7 = vmax.f32 %v3888_v20, 0.0  ;;  %v4016_v13 = vpack.c.bf16 %v3990_v49, %v3989_v57 }
 0x5ce   : > { %v4015_v37 = vpack.c.bf16 %v3988_v7, %v3987_v34 }
 0x5d0   : > { %6409 = vmatprep.mubr.bf16.mxu0 %v4015_v37 }
 0x5d1   : > { %6410 = vmatmul.mubr.bf16.gmra.mxu0 %v4016_v13 }
 0x5dd   : > { %v6367_v42 = vpop.f32.mrf.mxu1 }
 0x5de   : > { %v3909_v15 = vadd.f32 %v6367_v42, %v9634_v43 }
 0x5df   : > { %v3900_v40 = vpop.f32.mrf.mxu1 }
 0x5e0   : > { %v3901_v19 = vadd.f32 %v9634_v43, %v3900_v40  ;;  %v3993_v3 = vmax.f32 %v3909_v15, 0.0 }
 0x5e1   : > { %v6368_v54 = vpop.f32.mrf.mxu1 }
 0x5e2   : > { %v3912_v2 = vadd.f32 %v6368_v54, %v9634_v43  ;;  %v3991_v26 = vmax.f32 %v3901_v19, 0.0 }
 0x5e3   : > { %v3903_v32 = vpop.f32.mrf.mxu1 }
 0x5e4   : > { %v3904_v59 = vadd.f32 %v9634_v43, %v3903_v32  ;;  %v3994_v21 = vmax.f32 %v3912_v2, 0.0 }
 0x5e6   : > { %v3992_v16 = vmax.f32 %v3904_v59, 0.0  ;;  %v4018_v30 = vpack.c.bf16 %v3994_v21, %v3993_v3 }
 0x5e8   : > { %v4017_v9 = vpack.c.bf16 %v3992_v16, %v3991_v26 }
 0x5ea   : > { %6413 = vmatprep.mubr.bf16.mxu0 %v4017_v9 }
 0x5eb   : > { %6414 = vmatmul.mubr.bf16.gmra.mxu0 %v4018_v30 }
 0x607   : > { %v6371_v27 = vpop.f32.mrf.mxu1 }
 0x608   : > { %v3925_v25 = vadd.f32 %v6371_v27, %v9634_v43 }
 0x609   : > { %v3916_v24 = vpop.f32.mrf.mxu1 }
 0x60a   : > { %v3917_v46 = vadd.f32 %v9634_v43, %v3916_v24  ;;  %v3997_v1 = vmax.f32 %v3925_v25, 0.0  ;;  %v6653_v24 = vld [vmem:[#allocation8] sm:$0xff]  }
 0x60b   : > { %v6372_v33 = vpop.f32.mrf.mxu1  ;;  %6447 = vmatprep.subr.bf16.mxu0 %v6653_v24  ;;  %6488 = vmatprep.subr.bf16.mxu1 %v6653_v24 }
 0x60c   : > { %v3928_v58 = vadd.f32 %v6372_v33, %v9634_v43  ;;  %v3995_v6 = vmax.f32 %v3917_v46, 0.0  ;;  %6448 = vmatpush3.bf16.msra.mxu0 %v6653_v24  ;;  %6496 = vmatpush3.bf16.msra.mxu1 %v6653_v24 }
 0x60d   : > { %v3919_v45 = vpop.f32.mrf.mxu1 }
 0x60e   : > { %v3920_v61 = vadd.f32 %v9634_v43, %v3919_v45  ;;  %v3998_v38 = vmax.f32 %v3928_v58, 0.0 }
 0x610   : > { %v3996_v35 = vmax.f32 %v3920_v61, 0.0  ;;  %v4020_v47 = vpack.c.bf16 %v3998_v38, %v3997_v1  ;;  %v5848_v38 = vld [vmem:[%s10393_s6 + $0x10] sm:$0x1f]  ;;  %v10996_v1 = vld [vmem:[#allocation42_spill] sm:$0xff] }
 0x612   : > { %v4019_v12 = vpack.c.bf16 %v3996_v35, %v3995_v6  ;;  %v4372_v35 = vadd.f32 1.0, %v5848_v38 }
 0x614   : > { %6417 = vmatprep.mubr.bf16.mxu0 %v4019_v12  ;;  %v9672_v12 = vrot.slane %v5848_v38, %v10996_v1 }
 0x615   : > { %6418 = vmatmul.mubr.bf16.gmra.mxu0 %v4020_v47 }
 0x61e   : > { %v6375_v0 = vpop.f32.mrf.mxu1 }
 0x61f   : > { %v3941_v39 = vadd.f32 %v6375_v0, %v9634_v43  ;;  %v10997_v0 = vld [vmem:[#allocation43_spill] sm:$0xff] }
 0x620   : > { %v3932_v11 = vpop.f32.mrf.mxu1 }
 0x621   : > { %v3933_v31 = vadd.f32 %v9634_v43, %v3932_v11  ;;  %v4001_v20 = vmax.f32 %v3941_v39, 0.0  ;;  %v9675_v11 = vrot.slane %v5848_v38, %v10997_v0 }
 0x622   : > { %v6376_v36 = vpop.f32.mrf.mxu1 }
 0x623   : > { %v3944_v23 = vadd.f32 %v6376_v36, %v9634_v43  ;;  %v3999_v52 = vmax.f32 %v3933_v31, 0.0  ;;  %v9678_v36 = vrot.slane %v5848_v38, %v10998_v53  ;;  %v10999_v31 = vld [vmem:[#allocation41_spill] sm:$0xff] }
 0x624   : > { %v3935_v63 = vpop.f32.mrf.mxu1 }
 0x625   : > { %v3936_v14 = vadd.f32 %v9634_v43, %v3935_v63  ;;  %v4002_v44 = vmax.f32 %v3944_v23, 0.0  ;;  %v9681_v23 = vrot.slane %v4372_v35, %v10999_v31 }
 0x626   : > { %v6379_v18 = vpop.f32.mrf.mxu1 }
 0x627   : > { %v4000_v56 = vmax.f32 %v3936_v14, 0.0  ;;  %v4022_v7 = vpack.c.bf16 %v4002_v44, %v4001_v20  ;;  %v3957_v42 = vadd.f32 %v6379_v18, %v9634_v43 }
 0x628   : > { %v3948_v49 = vpop.f32.mrf.mxu1 }
 0x629   : > { %v4021_v34 = vpack.c.bf16 %v4000_v56, %v3999_v52  ;;  %v3949_v37 = vadd.f32 %v9634_v43, %v3948_v49  ;;  %v4005_v59 = vmax.f32 %v3957_v42, 0.0  ;;  %v11000_v52 = vld [vmem:[#allocation45_spill] sm:$0xff] }
 0x62a   : > { %v6380_v57 = vpop.f32.mrf.mxu1  ;;  %v9686_v56 = vrot.slane %v5848_v38, %v11000_v52 }
 0x62b   : > { %v3960_v13 = vadd.f32 %v6380_v57, %v9634_v43  ;;  %6421 = vmatprep.mubr.bf16.mxu0 %v4021_v34  ;;  %v4003_v15 = vmax.f32 %v3949_v37, 0.0 }
 0x62c   : > { %v3951_v40 = vpop.f32.mrf.mxu1  ;;  %6422 = vmatmul.mubr.bf16.gmra.mxu0 %v4022_v7 }
 0x62d   : > { %v3952_v54 = vadd.f32 %v9634_v43, %v3951_v40  ;;  %v4006_v19 = vmax.f32 %v3960_v13, 0.0 }
 0x62e   : > { %v6383_v2 = vpop.f32.mrf.mxu1 }
 0x62f   : > { %v4004_v32 = vmax.f32 %v3952_v54, 0.0  ;;  %v4024_v16 = vpack.c.bf16 %v4006_v19, %v4005_v59  ;;  %v3973_v17 = vadd.f32 %v6383_v2, %v9634_v43 }
 0x630   : > { %v3964_v21 = vpop.f32.mrf.mxu1 }
 0x631   : > { %v4023_v26 = vpack.c.bf16 %v4004_v32, %v4003_v15  ;;  %v3965_v9 = vadd.f32 %v9634_v43, %v3964_v21  ;;  %v4009_v25 = vmax.f32 %v3973_v17, 0.0 }
 0x632   : > { %v6384_v3 = vpop.f32.mrf.mxu1 }
 0x633   : > { %v3976_v30 = vadd.f32 %v6384_v3, %v9634_v43  ;;  %6425 = vmatprep.mubr.bf16.mxu0 %v4023_v26  ;;  %v4007_v46 = vmax.f32 %v3965_v9, 0.0 }
 0x634   : > { %v3967_v27 = vpop.f32.mrf.mxu1  ;;  %6426 = vmatmul.mubr.bf16.gmra.mxu0 %v4024_v16 }
 0x635   : > { %v3968_v8 = vadd.f32 %v9634_v43, %v3967_v27  ;;  %v4010_v33 = vmax.f32 %v3976_v30, 0.0 }
 0x637   : > { %v4008_v58 = vmax.f32 %v3968_v8, 0.0  ;;  %v4026_v61 = vpack.c.bf16 %v4010_v33, %v4009_v25 }
 0x639   : > { %v4025_v45 = vpack.c.bf16 %v4008_v58, %v4007_v46 }
 0x63b   : > { %6429 = vmatprep.mubr.bf16.mxu0 %v4025_v45 }
 0x63c   : > { %6430 = vmatmul.mubr.bf16.gmra.mxu0 %v4026_v61 }
 0x65c   : > { %v6403_v6 = vpop.f32.mrf.mxu0 }
 0x65d   : > { %v4271_v63 = vrot.slane %v6403_v6, 4  ;;  %v4379_v37 = vmul.f32 %v6403_v6, %v9681_v23 }
 0x65e   : > { %v4109_v43 = vpop.f32.mrf.mxu0 }
 0x65f   : > { %v4268_v47 = vrot.slane %v4109_v43, 4  ;;  %v4377_v13 = vmul.f32 %v9681_v23, %v4109_v43 }
 0x660   : > { %v6404_v39 = vpop.f32.mrf.mxu0 }
 0x661   : > { %v4364_v14 = vsel %vm1346_vm1, 0.0, %v4268_v47  ;;  %v4273_v44 = vrot.slane %v6404_v39, 4  ;;  %v4380_v40 = vmul.f32 %v6404_v39, %v9681_v23 }
 0x662   : > { %v4413_v18 = vmul.f32 %v9672_v12, %v4364_v14  ;;  %v4481_v20 = vmul.f32 %v9675_v11, %v4364_v14  ;;  %v4112_v57 = vpop.f32.mrf.mxu0  ;;  %v4701_v42 = vmul.f32 %v9678_v36, %v4364_v14  ;;  %v4921_v59 = vmul.f32 %v9686_v56, %v4364_v14 }
 0x663   : > { %v4274_v49 = vsel %vm1346_vm1, %v4271_v63, %v4273_v44  ;;  %v4485_v34 = vmul.f32 %v9675_v11, %v4273_v44  ;;  %v4705_v7 = vmul.f32 %v9678_v36, %v4273_v44  ;;  %v4925_v21 = vmul.f32 %v9686_v56, %v4273_v44 }
 0x664   : > { %v4416_v54 = vmul.f32 %v9672_v12, %v4274_v49  ;;  %v4484_v19 = vmul.f32 %v9675_v11, %v4274_v49  ;;  %v4704_v15 = vmul.f32 %v9678_v36, %v4274_v49  ;;  %v4445_v32 = vadd.f32 %v4413_v18, %v4377_v13 }
 0x665   : > { %v4568_v2 = vrot.slane %v4485_v34, 1  ;;  %v4269_v26 = vrot.slane %v4112_v57, 4  ;;  %v4561_v16 = vrot.slane %v4481_v20, 1  ;;  %v4788_v30 = vrot.slane %v4705_v7, 2 }
 0x666   : > { %v4448_v3 = vadd.f32 %v4416_v54, %v4380_v40  ;;  %v4566_v9 = vrot.slane %v4484_v19, 1  ;;  %v4786_v17 = vrot.slane %v4704_v15, 2  ;;  %v4924_v27 = vmul.f32 %v9686_v56, %v4274_v49 }
 0x667   : > { %v4270_v8 = vsel %vm1346_vm1, %v4268_v47, %v4269_v26  ;;  %v4272_v24 = vsel %vm1346_vm1, %v4269_v26, %v4271_v63  ;;  %v4378_v46 = vmul.f32 %v9681_v23, %v4112_v57  ;;  %v5008_v61 = vrot.slane %v4925_v21, 3 }
 0x668   : > { %v4569_v33 = vsel %vm1640_vm2, %v4566_v9, %v4568_v2  ;;  %v4414_v58 = vmul.f32 %v9672_v12, %v4270_v8  ;;  %v4415_v25 = vmul.f32 %v9672_v12, %v4272_v24  ;;  %v4482_v38 = vmul.f32 %v9675_v11, %v4270_v8 }
 0x669   : > { %v4668_v45 = vadd.f32 %v4569_v33, %v4448_v3  ;;  %v4483_v6 = vmul.f32 %v9675_v11, %v4272_v24  ;;  %v4702_v1 = vmul.f32 %v9678_v36, %v4270_v8  ;;  %v4703_v47 = vmul.f32 %v9678_v36, %v4272_v24 }
 0x66a   : > { %v4446_v35 = vadd.f32 %v4414_v58, %v4378_v46  ;;  %v4447_v43 = vadd.f32 %v4415_v25, %v4379_v37  ;;  %v5006_v0 = vrot.slane %v4924_v27, 3  ;;  %v4562_v53 = vrot.slane %v4482_v38, 1  ;;  %v11001_v46 = vld [vmem:[#allocation32_spill] sm:$0xff]  ;;  %v11002_v25 = vld [vmem:[#allocation51_spill] sm:$0xff] }
 0x66b   : > { %v4564_v31 = vrot.slane %v4483_v6, 1  ;;  %v4922_v39 = vmul.f32 %v9686_v56, %v4270_v8  ;;  %v4789_v63 = vsel %vm1861_vm3, %v4786_v17, %v4788_v30  ;;  %v4782_v14 = vrot.slane %v4702_v1, 2 }
 0x66c   : > { %v4784_v44 = vrot.slane %v4703_v47, 2  ;;  %v4923_v18 = vmul.f32 %v9686_v56, %v4272_v24  ;;  %v4888_v52 = vadd.f32 %v4789_v63, %v4668_v45  ;;  %v4781_v7 = vrot.slane %v4701_v42, 2 }
 0x66d   : > { %v4565_v20 = vsel %vm1640_vm2, %v4562_v53, %v4564_v31  ;;  %v4567_v49 = vsel %vm1640_vm2, %v4564_v31, %v4566_v9  ;;  %v5002_v34 = vrot.slane %v4922_v39, 3  ;;  %v5001_v57 = vrot.slane %v4921_v59, 3 }
 0x66e   : > { %v4666_v37 = vadd.f32 %v4565_v20, %v4446_v35  ;;  %v4667_v13 = vadd.f32 %v4567_v49, %v4447_v43  ;;  %v4785_v40 = vsel %vm1861_vm3, %v4782_v14, %v4784_v44  ;;  %v4787_v54 = vsel %vm1861_vm3, %v4784_v44, %v4786_v17  ;;  %v11004_v35 = vld [vmem:[#allocation20_spill] sm:$0xff] }
 0x66f   : > { %v5004_v19 = vrot.slane %v4923_v18, 3  ;;  %v4563_v2 = vsel %vm1640_vm2, %v4561_v16, %v4562_v53  ;;  %v5009_v15 = vsel %vm2082_vm4, %v5006_v0, %v5008_v61  ;;  %v4783_v42 = vsel %vm1861_vm3, %v4781_v7, %v4782_v14 }
 0x670   : > { %v4886_v21 = vadd.f32 %v4785_v40, %v4666_v37  ;;  %v4887_v26 = vadd.f32 %v4787_v54, %v4667_v13  ;;  %v4665_v3 = vadd.f32 %v4563_v2, %v4445_v32  ;;  %v5108_v30 = vadd.f32 %v5009_v15, %v4888_v52  ;;  %v11003_v32 = vld [vmem:[#allocation29_spill] sm:$0xff] }
 0x671   : > { %v5007_v9 = vsel %vm2082_vm4, %v5004_v19, %v5006_v0  ;;  %v5005_v59 = vsel %vm2082_vm4, %v5002_v34, %v5004_v19  ;;  %v5003_v17 = vsel %vm2082_vm4, %v5001_v57, %v5002_v34 }
 0x672   : > { %v5107_v27 = vadd.f32 %v5007_v9, %v4887_v26  ;;  %v4885_v8 = vadd.f32 %v4783_v42, %v4665_v3  ;;  %v5106_v24 = vadd.f32 %v5005_v59, %v4886_v21  ;;  %v5140_v45 = vadd.f32 %v5108_v30, %v11002_v25 }
 0x674   : > { %v5139_v16 = vadd.f32 %v5107_v27, %v11001_v46  ;;  %v5105_v58 = vadd.f32 %v5003_v17, %v4885_v8  ;;  %v5138_v38 = vadd.f32 %v5106_v24, %v11003_v32 }
 0x676   : > { %v5137_v43 = vadd.f32 %v5105_v58, %v11004_v35  ;;  %v5170_v47 = vpack.c.bf16 %v5140_v45, %v5139_v16 }
 0x677   : > { %v6407_v33 = vpop.f32.mrf.mxu0 }
 0x678   : > { %v4278_v0 = vrot.slane %v6407_v33, 4  ;;  %v5169_v39 = vpack.c.bf16 %v5138_v38, %v5137_v43  ;;  %v4383_v63 = vmul.f32 %v6407_v33, %v9681_v23 }
 0x679   : > { %v4125_v61 = vpop.f32.mrf.mxu0 }
 0x67a   : > { %v4275_v6 = vrot.slane %v4125_v61, 4  ;;  %v4381_v14 = vmul.f32 %v9681_v23, %v4125_v61  ;;  %6449 = vmatprep.mubr.bf16.mxu0 %v5169_v39 }
 0x67b   : > { %v6408_v1 = vpop.f32.mrf.mxu0  ;;  %6450 = vmatmul.mubr.bf16.vlgmr.msra.gmra.mxu0 %v5170_v47 }
 0x67c   : > { %v4365_v53 = vsel %vm1346_vm1, 0.0, %v4275_v6  ;;  %v4280_v31 = vrot.slane %v6408_v1, 4  ;;  %v4384_v57 = vmul.f32 %v6408_v1, %v9681_v23 }
 0x67d   : > { %v4417_v44 = vmul.f32 %v9672_v12, %v4365_v53  ;;  %v4128_v49 = vpop.f32.mrf.mxu0  ;;  %v4486_v34 = vmul.f32 %v9675_v11, %v4365_v53  ;;  %v4706_v7 = vmul.f32 %v9678_v36, %v4365_v53  ;;  %v4926_v2 = vmul.f32 %v9686_v56, %v4365_v53 }
 0x67e   : > { %v4281_v18 = vsel %vm1346_vm1, %v4278_v0, %v4280_v31  ;;  %v4490_v52 = vmul.f32 %v9675_v11, %v4280_v31  ;;  %v4710_v20 = vmul.f32 %v9678_v36, %v4280_v31  ;;  %v4930_v37 = vmul.f32 %v9686_v56, %v4280_v31 }
 0x67f   : > { %v4420_v13 = vmul.f32 %v9672_v12, %v4281_v18  ;;  %v4489_v40 = vmul.f32 %v9675_v11, %v4281_v18  ;;  %v4709_v19 = vmul.f32 %v9678_v36, %v4281_v18  ;;  %v4929_v21 = vmul.f32 %v9686_v56, %v4281_v18 }
 0x680   : > { %v4577_v54 = vrot.slane %v4490_v52, 1  ;;  %v4797_v15 = vrot.slane %v4710_v20, 2  ;;  %v4276_v26 = vrot.slane %v4128_v49, 4  ;;  %v4449_v3 = vadd.f32 %v4417_v44, %v4381_v14 }
 0x681   : > { %v4452_v30 = vadd.f32 %v4420_v13, %v4384_v57  ;;  %v4575_v9 = vrot.slane %v4489_v40, 1  ;;  %v4795_v42 = vrot.slane %v4709_v19, 2  ;;  %v5017_v59 = vrot.slane %v4930_v37, 3 }
 0x682   : > { %v4277_v27 = vsel %vm1346_vm1, %v4275_v6, %v4276_v26  ;;  %v4279_v8 = vsel %vm1346_vm1, %v4276_v26, %v4278_v0  ;;  %v4382_v24 = vmul.f32 %v9681_v23, %v4128_v49  ;;  %v5015_v17 = vrot.slane %v4929_v21, 3 }
 0x683   : > { %v4578_v33 = vsel %vm1640_vm2, %v4575_v9, %v4577_v54  ;;  %v4418_v46 = vmul.f32 %v9672_v12, %v4277_v27  ;;  %v4419_v16 = vmul.f32 %v9672_v12, %v4279_v8  ;;  %v4798_v25 = vsel %vm1861_vm3, %v4795_v42, %v4797_v15 }
 0x684   : > { %v4672_v58 = vadd.f32 %v4578_v33, %v4452_v30  ;;  %v4487_v45 = vmul.f32 %v9675_v11, %v4277_v27  ;;  %v4488_v61 = vmul.f32 %v9675_v11, %v4279_v8  ;;  %v4707_v6 = vmul.f32 %v9678_v36, %v4277_v27 }
 0x685   : > { %v4450_v32 = vadd.f32 %v4418_v46, %v4382_v24  ;;  %v4451_v38 = vadd.f32 %v4419_v16, %v4383_v63  ;;  %v4708_v35 = vmul.f32 %v9678_v36, %v4279_v8  ;;  %v4927_v0 = vmul.f32 %v9686_v56, %v4277_v27  ;;  %v11005_v27 = vld [vmem:[#allocation18_spill] sm:$0xff] }
 0x686   : > { %v4892_v43 = vadd.f32 %v4798_v25, %v4672_v58  ;;  %v4571_v1 = vrot.slane %v4487_v45, 1  ;;  %v4573_v47 = vrot.slane %v4488_v61, 1  ;;  %v4570_v53 = vrot.slane %v4486_v34, 1 }
 0x687   : > { %v4791_v31 = vrot.slane %v4707_v6, 2  ;;  %v4793_v39 = vrot.slane %v4708_v35, 2  ;;  %v4928_v14 = vmul.f32 %v9686_v56, %v4279_v8  ;;  %v4790_v44 = vrot.slane %v4706_v7, 2 }
 0x688   : > { %v5018_v18 = vsel %vm2082_vm4, %v5015_v17, %v5017_v59  ;;  %v4574_v52 = vsel %vm1640_vm2, %v4571_v1, %v4573_v47  ;;  %v4576_v63 = vsel %vm1640_vm2, %v4573_v47, %v4575_v9  ;;  %v5011_v37 = vrot.slane %v4927_v0, 3 }
 0x689   : > { %v5112_v20 = vadd.f32 %v5018_v18, %v4892_v43  ;;  %v4670_v49 = vadd.f32 %v4574_v52, %v4450_v32  ;;  %v4671_v57 = vadd.f32 %v4576_v63, %v4451_v38  ;;  %v4794_v13 = vsel %vm1861_vm3, %v4791_v31, %v4793_v39  ;;  %v11007_v18 = vld [vmem:[#allocation36_spill] sm:$0xff] }
 0x68a   : > { %v4796_v40 = vsel %vm1861_vm3, %v4793_v39, %v4795_v42  ;;  %v5013_v34 = vrot.slane %v4928_v14, 3  ;;  %v4572_v54 = vsel %vm1640_vm2, %v4570_v53, %v4571_v1  ;;  %v4792_v26 = vsel %vm1861_vm3, %v4790_v44, %v4791_v31  ;;  %v11006_v14 = vld [vmem:[#allocation31_spill] sm:$0xff] }
 0x68b   : > { %v4890_v19 = vadd.f32 %v4794_v13, %v4670_v49  ;;  %v4891_v15 = vadd.f32 %v4796_v40, %v4671_v57  ;;  %v4669_v21 = vadd.f32 %v4572_v54, %v4449_v3  ;;  %v5010_v30 = vrot.slane %v4926_v2, 3 }
 0x68c   : > { %v9766_v8 = vadd.f32 %v5112_v20, %v11005_v27  ;;  %v5016_v24 = vsel %vm2082_vm4, %v5013_v34, %v5015_v17  ;;  %v5014_v42 = vsel %vm2082_vm4, %v5011_v37, %v5013_v34 }
 0x68d   : > { %v4889_v9 = vadd.f32 %v4792_v26, %v4669_v21  ;;  %v5012_v58 = vsel %vm2082_vm4, %v5010_v30, %v5011_v37  ;;  %v5110_v25 = vadd.f32 %v5014_v42, %v4890_v19  ;;  %v5111_v45 = vadd.f32 %v5016_v24, %v4891_v15  ;;  %v11008_v42 = vld [vmem:[#allocation30_spill] sm:$0xff] }
 0x68f   : > { %v5109_v35 = vadd.f32 %v5012_v58, %v4889_v9  ;;  %v5142_v44 = vadd.f32 %v5110_v25, %v11006_v14  ;;  %v5143_v52 = vadd.f32 %v5111_v45, %v11007_v18 }
 0x691   : > { %v6411_v7 = vpop.f32.mrf.mxu0 }
 0x692   : > { %v4285_v46 = vrot.slane %v6411_v7, 4  ;;  %v4387_v3 = vmul.f32 %v6411_v7, %v9681_v23 }
 0x693   : > { %v4141_v59 = vpop.f32.mrf.mxu0 }
 0x694   : > { %v4282_v33 = vrot.slane %v4141_v59, 4  ;;  %v4385_v61 = vmul.f32 %v9681_v23, %v4141_v59 }
 0x695   : > { %v6412_v16 = vpop.f32.mrf.mxu0 }
 0x696   : > { %v4366_v2 = vsel %vm1346_vm1, 0.0, %v4282_v33  ;;  %v4287_v32 = vrot.slane %v6412_v16, 4  ;;  %v4388_v31 = vmul.f32 %v6412_v16, %v9681_v23  ;;  %v5141_v16 = vadd.f32 %v5109_v35, %v11008_v42 }
 0x697   : > { %v4421_v38 = vmul.f32 %v9672_v12, %v4366_v2  ;;  %v4491_v17 = vmul.f32 %v9675_v11, %v4366_v2  ;;  %v4711_v6 = vmul.f32 %v9678_v36, %v4366_v2  ;;  %v9778_v43 = vmul.f32 %v9686_v56, %v4366_v2  ;;  %v4144_v53 = vpop.f32.mrf.mxu0 }
 0x698   : > { %v4288_v1 = vsel %vm1346_vm1, %v4285_v46, %v4287_v32  ;;  %v4495_v47 = vmul.f32 %v9675_v11, %v4287_v32  ;;  %v4715_v0 = vmul.f32 %v9678_v36, %v4287_v32  ;;  %v9785_v39 = vmul.f32 %v9686_v56, %v4287_v32 }
 0x699   : > { %v4453_v63 = vadd.f32 %v4421_v38, %v4385_v61  ;;  %v4424_v20 = vmul.f32 %v9672_v12, %v4288_v1  ;;  %v4494_v49 = vmul.f32 %v9675_v11, %v4288_v1  ;;  %v4714_v57 = vmul.f32 %v9678_v36, %v4288_v1 }
 0x69a   : > { %v4579_v37 = vrot.slane %v4491_v17, 1  ;;  %v4799_v13 = vrot.slane %v4711_v6, 2  ;;  %v4586_v40 = vrot.slane %v4495_v47, 1  ;;  %v4283_v34 = vrot.slane %v4144_v53, 4 }
 0x69b   : > { %v5019_v54 = vrot.slane %v9778_v43, 3  ;;  %v4584_v19 = vrot.slane %v4494_v49, 1  ;;  %v4806_v15 = vrot.slane %v4715_v0, 2  ;;  %v4934_v7 = vmul.f32 %v9686_v56, %v4288_v1 }
 0x69c   : > { %v4456_v21 = vadd.f32 %v4424_v20, %v4388_v31  ;;  %v4804_v26 = vrot.slane %v4714_v57, 2  ;;  %v4284_v30 = vsel %vm1346_vm1, %v4282_v33, %v4283_v34  ;;  %v4286_v59 = vsel %vm1346_vm1, %v4283_v34, %v4285_v46 }
 0x69d   : > { %v4386_v9 = vmul.f32 %v9681_v23, %v4144_v53  ;;  %v4422_v27 = vmul.f32 %v9672_v12, %v4284_v30  ;;  %v4423_v24 = vmul.f32 %v9672_v12, %v4286_v59  ;;  %v4587_v58 = vsel %vm1640_vm2, %v4584_v19, %v4586_v40 }
 0x69e   : > { %v4492_v25 = vmul.f32 %v9675_v11, %v4284_v30  ;;  %v4493_v45 = vmul.f32 %v9675_v11, %v4286_v59  ;;  %v4712_v2 = vmul.f32 %v9678_v36, %v4284_v30  ;;  %v4713_v33 = vmul.f32 %v9678_v36, %v4286_v59 }
 0x69f   : > { %v4454_v61 = vadd.f32 %v4422_v27, %v4386_v9  ;;  %v4932_v46 = vmul.f32 %v9686_v56, %v4284_v30  ;;  %v5172_v32 = vpack.c.bf16 %v9766_v8, %v5143_v52  ;;  %v4455_v38 = vadd.f32 %v4423_v24, %v4387_v3 }
 0x6a0   : > { %v4580_v17 = vrot.slane %v4492_v25, 1  ;;  %v4582_v6 = vrot.slane %v4493_v45, 1  ;;  %v4800_v43 = vrot.slane %v4712_v2, 2  ;;  %v4676_v35 = vadd.f32 %v4587_v58, %v4456_v21 }
 0x6a1   : > { %v4802_v1 = vrot.slane %v4713_v33, 2  ;;  %v4933_v47 = vmul.f32 %v9686_v56, %v4286_v59  ;;  %v5171_v0 = vpack.c.bf16 %v5142_v44, %v5141_v16  ;;  %v5020_v31 = vrot.slane %v4932_v46, 3 }
 0x6a2   : > { %v4583_v53 = vsel %vm1640_vm2, %v4580_v17, %v4582_v6  ;;  %v4581_v14 = vsel %vm1640_vm2, %v4579_v37, %v4580_v17  ;;  %v4585_v18 = vsel %vm1640_vm2, %v4582_v6, %v4584_v19  ;;  %v5026_v20 = vrot.slane %v9785_v39, 3 }
 0x6a3   : > { %v4674_v49 = vadd.f32 %v4583_v53, %v4454_v61  ;;  %v5022_v8 = vrot.slane %v4933_v47, 3  ;;  %6453 = vmatprep.mubr.bf16.mxu1 %v5171_v0  ;;  %v4673_v3 = vadd.f32 %v4581_v14, %v4453_v63  ;;  %v4803_v52 = vsel %vm1861_vm3, %v4800_v43, %v4802_v1  ;;  %v11009_v0 = vld [vmem:[#allocation35_spill] sm:$0xff] }
 0x6a4   : > { %6454 = vmatmul.mubr.bf16.vlgmr.msra.gmra.mxu1 %v5172_v32  ;;  %v4801_v40 = vsel %vm1861_vm3, %v4799_v13, %v4800_v43  ;;  %v4675_v44 = vadd.f32 %v4585_v18, %v4455_v38  ;;  %v5024_v34 = vrot.slane %v4934_v7, 3  ;;  %v4807_v21 = vsel %vm1861_vm3, %v4804_v26, %v4806_v15 }
 0x6a5   : > { %v4894_v30 = vadd.f32 %v4803_v52, %v4674_v49  ;;  %v4893_v37 = vadd.f32 %v4801_v40, %v4673_v3  ;;  %v4805_v19 = vsel %vm1861_vm3, %v4802_v1, %v4804_v26  ;;  %v4896_v59 = vadd.f32 %v4807_v21, %v4676_v35 }
 0x6a6   : > { %v5021_v9 = vsel %vm2082_vm4, %v5019_v54, %v5020_v31  ;;  %v4895_v27 = vadd.f32 %v4805_v19, %v4675_v44  ;;  %v5023_v16 = vsel %vm2082_vm4, %v5020_v31, %v5022_v8  ;;  %v5025_v15 = vsel %vm2082_vm4, %v5022_v8, %v5024_v34 }
 0x6a7   : > { %v5113_v58 = vadd.f32 %v5021_v9, %v4893_v37  ;;  %v5027_v25 = vsel %vm2082_vm4, %v5024_v34, %v5026_v20  ;;  %v5114_v2 = vadd.f32 %v5023_v16, %v4894_v30  ;;  %v11010_v16 = vld [vmem:[#allocation33_spill] sm:$0xff] }
 0x6a8   : > { %v5115_v54 = vadd.f32 %v5025_v15, %v4895_v27  ;;  %v5116_v31 = vadd.f32 %v5027_v25, %v4896_v59 }
 0x6a9   : > { %v5145_v53 = vadd.f32 %v5113_v58, %v11009_v0  ;;  %v11012_v0 = vld [vmem:[#allocation40_spill] sm:$0xff] }
 0x6ab   : > { %v6415_v57 = vpop.f32.mrf.mxu0 }
 0x6ac   : > { %v4292_v63 = vrot.slane %v6415_v57, 4  ;;  %v4391_v24 = vmul.f32 %v6415_v57, %v9681_v23 }
 0x6ad   : > { %v4157_v39 = vpop.f32.mrf.mxu0 }
 0x6ae   : > { %v4289_v42 = vrot.slane %v4157_v39, 4  ;;  %v4389_v13 = vmul.f32 %v9681_v23, %v4157_v39 }
 0x6af   : > { %v6416_v7 = vpop.f32.mrf.mxu0 }
 0x6b0   : > { %v4367_v26 = vsel %vm1346_vm1, 0.0, %v4289_v42  ;;  %v4294_v45 = vrot.slane %v6416_v7, 4  ;;  %v4392_v47 = vmul.f32 %v6416_v7, %v9681_v23 }
 0x6b1   : > { %v4425_v61 = vmul.f32 %v9672_v12, %v4367_v26  ;;  %v4496_v33 = vmul.f32 %v9675_v11, %v4367_v26  ;;  %v4716_v46 = vmul.f32 %v9678_v36, %v4367_v26  ;;  %v9827_v32 = vmul.f32 %v9686_v56, %v4367_v26  ;;  %v4160_v35 = vpop.f32.mrf.mxu0 }
 0x6b2   : > { %v4295_v38 = vsel %vm1346_vm1, %v4292_v63, %v4294_v45  ;;  %v4500_v17 = vmul.f32 %v9675_v11, %v4294_v45  ;;  %v4720_v6 = vmul.f32 %v9678_v36, %v4294_v45  ;;  %v9833_v43 = vmul.f32 %v9686_v56, %v4294_v45  ;;  %v11011_v45 = vld [vmem:[#allocation34_spill] sm:$0xff] }
 0x6b3   : > { %v4457_v1 = vadd.f32 %v4425_v61, %v4389_v13  ;;  %v4588_v14 = vrot.slane %v4496_v33, 1  ;;  %v4428_v18 = vmul.f32 %v9672_v12, %v4295_v38  ;;  %v4499_v20 = vmul.f32 %v9675_v11, %v4295_v38 }
 0x6b4   : > { %v4595_v49 = vrot.slane %v4500_v17, 1  ;;  %v4808_v8 = vrot.slane %v4716_v46, 2  ;;  %v5028_v3 = vrot.slane %v9827_v32, 3  ;;  %v4719_v52 = vmul.f32 %v9678_v36, %v4295_v38 }
 0x6b5   : > { %v4290_v57 = vrot.slane %v4160_v35, 4  ;;  %v4593_v40 = vrot.slane %v4499_v20, 1  ;;  %v4815_v44 = vrot.slane %v4720_v6, 2  ;;  %v4939_v34 = vmul.f32 %v9686_v56, %v4295_v38 }
 0x6b6   : > { %v5035_v21 = vrot.slane %v9833_v43, 3  ;;  %v4460_v30 = vadd.f32 %v4428_v18, %v4392_v47  ;;  %v4390_v59 = vmul.f32 %v9681_v23, %v4160_v35  ;;  %v5146_v13 = vadd.f32 %v5114_v2, %v11010_v16 }
 0x6b7   : > { %v4291_v37 = vsel %vm1346_vm1, %v4289_v42, %v4290_v57  ;;  %v4293_v19 = vsel %vm1346_vm1, %v4290_v57, %v4292_v63  ;;  %v4596_v39 = vsel %vm1640_vm2, %v4593_v40, %v4595_v49  ;;  %v4813_v7 = vrot.slane %v4719_v52, 2 }
 0x6b8   : > { %v4426_v9 = vmul.f32 %v9672_v12, %v4291_v37  ;;  %v4427_v27 = vmul.f32 %v9672_v12, %v4293_v19  ;;  %v4497_v58 = vmul.f32 %v9675_v11, %v4291_v37  ;;  %v4498_v15 = vmul.f32 %v9675_v11, %v4293_v19 }
 0x6b9   : > { %v4717_v25 = vmul.f32 %v9678_v36, %v4291_v37  ;;  %v4718_v63 = vmul.f32 %v9678_v36, %v4293_v19  ;;  %v4937_v26 = vmul.f32 %v9686_v56, %v4291_v37  ;;  %v5147_v61 = vadd.f32 %v5115_v54, %v11011_v45 }
 0x6ba   : > { %v4458_v42 = vadd.f32 %v4426_v9, %v4390_v59  ;;  %v4680_v33 = vadd.f32 %v4596_v39, %v4460_v30  ;;  %v4589_v46 = vrot.slane %v4497_v58, 1  ;;  %v4591_v32 = vrot.slane %v4498_v15, 1 }
 0x6bb   : > { %v4809_v38 = vrot.slane %v4717_v25, 2  ;;  %v4459_v17 = vadd.f32 %v4427_v27, %v4391_v24  ;;  %v4811_v2 = vrot.slane %v4718_v63, 2  ;;  %v4938_v6 = vmul.f32 %v9686_v56, %v4293_v19  ;;  %v11014_v25 = vld [vmem:[#allocation37_spill] sm:$0xff] }
 0x6bc   : > { %v5173_v43 = vpack.c.bf16 %v5146_v13, %v5145_v53  ;;  %v4592_v35 = vsel %vm1640_vm2, %v4589_v46, %v4591_v32  ;;  %v5029_v47 = vrot.slane %v4937_v26, 3  ;;  %v5148_v18 = vadd.f32 %v5116_v31, %v11012_v0 }
 0x6bd   : > { %v4590_v20 = vsel %vm1640_vm2, %v4588_v14, %v4589_v46  ;;  %v4816_v49 = vsel %vm1861_vm3, %v4813_v7, %v4815_v44  ;;  %v4678_v52 = vadd.f32 %v4592_v35, %v4458_v42  ;;  %v5031_v54 = vrot.slane %v4938_v6, 3 }
 0x6be   : > { %6457 = vmatprep.mubr.bf16.mxu1 %v5173_v43  ;;  %v4677_v57 = vadd.f32 %v4590_v20, %v4457_v1  ;;  %v4812_v30 = vsel %vm1861_vm3, %v4809_v38, %v4811_v2  ;;  %v5174_v24 = vpack.c.bf16 %v5148_v18, %v5147_v61  ;;  %v4810_v37 = vsel %vm1861_vm3, %v4808_v8, %v4809_v38 }
 0x6bf   : > { %v4594_v53 = vsel %vm1640_vm2, %v4591_v32, %v4593_v40  ;;  %v4900_v19 = vadd.f32 %v4816_v49, %v4680_v33  ;;  %v4898_v59 = vadd.f32 %v4812_v30, %v4678_v52  ;;  %v5030_v31 = vsel %vm2082_vm4, %v5028_v3, %v5029_v47  ;;  %v11013_v40 = vld [vmem:[#allocation39_spill] sm:$0xff]  ;;  %v11015_v3 = vld [vmem:[#allocation38_spill] sm:$0xff] }
 0x6c0   : > { %v4897_v39 = vadd.f32 %v4810_v37, %v4677_v57  ;;  %v4679_v9 = vadd.f32 %v4594_v53, %v4459_v17  ;;  %6458 = vmatmul.mubr.bf16.gmra.mxu1 %v5174_v24  ;;  %v5032_v14 = vsel %vm2082_vm4, %v5029_v47, %v5031_v54  ;;  %v4814_v44 = vsel %vm1861_vm3, %v4811_v2, %v4813_v7  ;;  %v11016_v33 = vld [vmem:[#allocation46_spill] sm:$0xff] }
 0x6c1   : > { %v5033_v27 = vrot.slane %v4939_v34, 3  ;;  %v5118_v16 = vadd.f32 %v5032_v14, %v4898_v59 }
 0x6c2   : > { %v5117_v1 = vadd.f32 %v5030_v31, %v4897_v39  ;;  %v4899_v13 = vadd.f32 %v4814_v44, %v4679_v9 }
 0x6c3   : > { %v5034_v58 = vsel %vm2082_vm4, %v5031_v54, %v5033_v27  ;;  %v5036_v8 = vsel %vm2082_vm4, %v5033_v27, %v5035_v21  ;;  %v5150_v42 = vadd.f32 %v5118_v16, %v11014_v25 }
 0x6c4   : > { %v5149_v15 = vadd.f32 %v5117_v1, %v11013_v40  ;;  %v5119_v63 = vadd.f32 %v5034_v58, %v4899_v13  ;;  %v5120_v26 = vadd.f32 %v5036_v8, %v4900_v19 }
 0x6c6   : > { %v5175_v45 = vpack.c.bf16 %v5150_v42, %v5149_v15  ;;  %v5151_v61 = vadd.f32 %v5119_v63, %v11015_v3  ;;  %v5152_v46 = vadd.f32 %v5120_v26, %v11016_v33 }
 0x6c8   : > { %6461 = vmatprep.mubr.bf16.mxu1 %v5175_v45  ;;  %v5176_v34 = vpack.c.bf16 %v5152_v46, %v5151_v61 }
 0x6ca   : > { %6462 = vmatmul.mubr.bf16.gmra.mxu1 %v5176_v34 }
 0x6d5   : > { %v6419_v7 = vpop.f32.mrf.mxu0 }
 0x6d6   : > { %v4299_v2 = vrot.slane %v6419_v7, 4  ;;  %v4395_v54 = vmul.f32 %v6419_v7, %v9681_v23 }
 0x6d7   : > { %v4173_v32 = vpop.f32.mrf.mxu0 }
 0x6d8   : > { %v4296_v38 = vrot.slane %v4173_v32, 4  ;;  %v4393_v49 = vmul.f32 %v9681_v23, %v4173_v32 }
 0x6d9   : > { %v6420_v17 = vpop.f32.mrf.mxu0 }
 0x6da   : > { %v4368_v21 = vsel %vm1346_vm1, 0.0, %v4296_v38  ;;  %v4301_v6 = vrot.slane %v6420_v17, 4  ;;  %v4396_v30 = vmul.f32 %v6420_v17, %v9681_v23 }
 0x6db   : > { %v4429_v43 = vmul.f32 %v9672_v12, %v4368_v21  ;;  %v4501_v35 = vmul.f32 %v9675_v11, %v4368_v21  ;;  %v4721_v47 = vmul.f32 %v9678_v36, %v4368_v21  ;;  %v4176_v20 = vpop.f32.mrf.mxu0  ;;  %v9883_v57 = vmul.f32 %v9686_v56, %v4368_v21 }
 0x6dc   : > { %v4302_v0 = vsel %vm1346_vm1, %v4299_v2, %v4301_v6  ;;  %v4505_v18 = vmul.f32 %v9675_v11, %v4301_v6  ;;  %v4725_v52 = vmul.f32 %v9678_v36, %v4301_v6  ;;  %v4945_v19 = vmul.f32 %v9686_v56, %v4301_v6 }
 0x6dd   : > { %v4504_v24 = vmul.f32 %v9675_v11, %v4302_v0  ;;  %v4461_v37 = vadd.f32 %v4429_v43, %v4393_v49  ;;  %v4432_v53 = vmul.f32 %v9672_v12, %v4302_v0  ;;  %v4297_v59 = vrot.slane %v4176_v20, 4 }
 0x6de   : > { %v4597_v39 = vrot.slane %v4501_v35, 1  ;;  %v4817_v9 = vrot.slane %v4721_v47, 2  ;;  %v4604_v14 = vrot.slane %v4505_v18, 1  ;;  %v4724_v44 = vmul.f32 %v9678_v36, %v4302_v0 }
 0x6df   : > { %v4602_v31 = vrot.slane %v4504_v24, 1  ;;  %v4824_v27 = vrot.slane %v4725_v52, 2  ;;  %v4298_v1 = vsel %vm1346_vm1, %v4296_v38, %v4297_v59  ;;  %v4300_v16 = vsel %vm1346_vm1, %v4297_v59, %v4299_v2 }
 0x6e0   : > { %v4944_v13 = vmul.f32 %v9686_v56, %v4302_v0  ;;  %v4394_v58 = vmul.f32 %v9681_v23, %v4176_v20  ;;  %v4430_v8 = vmul.f32 %v9672_v12, %v4298_v1  ;;  %v4431_v40 = vmul.f32 %v9672_v12, %v4300_v16 }
 0x6e1   : > { %v4464_v15 = vadd.f32 %v4432_v53, %v4396_v30  ;;  %v4502_v25 = vmul.f32 %v9675_v11, %v4298_v1  ;;  %v4503_v42 = vmul.f32 %v9675_v11, %v4300_v16  ;;  %v4722_v63 = vmul.f32 %v9678_v36, %v4298_v1 }
 0x6e2   : > { %v4605_v26 = vsel %vm1640_vm2, %v4602_v31, %v4604_v14  ;;  %v4462_v45 = vadd.f32 %v4430_v8, %v4394_v58  ;;  %v4723_v3 = vmul.f32 %v9678_v36, %v4300_v16  ;;  %v4942_v61 = vmul.f32 %v9686_v56, %v4298_v1 }
 0x6e3   : > { %v4463_v33 = vadd.f32 %v4431_v40, %v4395_v54  ;;  %v4598_v46 = vrot.slane %v4502_v25, 1  ;;  %v4600_v34 = vrot.slane %v4503_v42, 1  ;;  %v4818_v7 = vrot.slane %v4722_v63, 2 }
 0x6e4   : > { %v4822_v32 = vrot.slane %v4724_v44, 2  ;;  %v5044_v38 = vrot.slane %v4945_v19, 3  ;;  %v4820_v17 = vrot.slane %v4723_v3, 2  ;;  %v4943_v2 = vmul.f32 %v9686_v56, %v4300_v16 }
 0x6e5   : > { %v4684_v21 = vadd.f32 %v4605_v26, %v4464_v15  ;;  %v4601_v6 = vsel %vm1640_vm2, %v4598_v46, %v4600_v34  ;;  %v4599_v43 = vsel %vm1640_vm2, %v4597_v39, %v4598_v46  ;;  %v4603_v35 = vsel %vm1640_vm2, %v4600_v34, %v4602_v31 }
 0x6e6   : > { %v4682_v47 = vadd.f32 %v4601_v6, %v4462_v45  ;;  %v5038_v0 = vrot.slane %v4942_v61, 3  ;;  %v4681_v20 = vadd.f32 %v4599_v43, %v4461_v37  ;;  %v5042_v49 = vrot.slane %v4944_v13, 3 }
 0x6e7   : > { %v4821_v52 = vsel %vm1861_vm3, %v4818_v7, %v4820_v17  ;;  %v5040_v54 = vrot.slane %v4943_v2, 3  ;;  %v4819_v30 = vsel %vm1861_vm3, %v4817_v9, %v4818_v7  ;;  %v4683_v24 = vadd.f32 %v4603_v35, %v4463_v33 }
 0x6e8   : > { %v4825_v53 = vsel %vm1861_vm3, %v4822_v32, %v4824_v27  ;;  %v4902_v19 = vadd.f32 %v4821_v52, %v4682_v47  ;;  %v4901_v14 = vadd.f32 %v4819_v30, %v4681_v20  ;;  %v5037_v39 = vrot.slane %v9883_v57, 3 }
 0x6e9   : > { %v4904_v44 = vadd.f32 %v4825_v53, %v4684_v21  ;;  %v4823_v1 = vsel %vm1861_vm3, %v4820_v17, %v4822_v32  ;;  %v5045_v8 = vsel %vm2082_vm4, %v5042_v49, %v5044_v38  ;;  %v5041_v15 = vsel %vm2082_vm4, %v5038_v0, %v5040_v54 }
 0x6ea   : > { %v4903_v58 = vadd.f32 %v4823_v1, %v4683_v24  ;;  %v5039_v27 = vsel %vm2082_vm4, %v5037_v39, %v5038_v0  ;;  %v9919_v63 = vadd.f32 %v5041_v15, %v4902_v19  ;;  %v5043_v26 = vsel %vm2082_vm4, %v5040_v54, %v5042_v49 }
 0x6eb   : > { %v9917_v42 = vadd.f32 %v5039_v27, %v4901_v14  ;;  %v9925_v33 = vadd.f32 %v5045_v8, %v4904_v44 }
 0x6ec   : > { %v6423_v18 = vpop.f32.mrf.mxu0  ;;  %v9932_v38 = vadd.f32 %v5043_v26, %v4903_v58 }
 0x6ed   : > { %v4306_v16 = vrot.slane %v6423_v18, 4  ;;  %v4399_v37 = vmul.f32 %v6423_v18, %v9681_v23 }
 0x6ee   : > { %v4189_v59 = vpop.f32.mrf.mxu0 }
 0x6ef   : > { %v4303_v31 = vrot.slane %v4189_v59, 4  ;;  %v4397_v57 = vmul.f32 %v9681_v23, %v4189_v59 }
 0x6f0   : > { %v6424_v13 = vpop.f32.mrf.mxu0 }
 0x6f1   : > { %v4369_v9 = vsel %vm1346_vm1, 0.0, %v4303_v31  ;;  %v4308_v40 = vrot.slane %v6424_v13, 4  ;;  %v4400_v34 = vmul.f32 %v6424_v13, %v9681_v23 }
 0x6f2   : > { %v4192_v25 = vpop.f32.mrf.mxu0  ;;  %v4433_v46 = vmul.f32 %v9672_v12, %v4369_v9  ;;  %v9940_v43 = vmul.f32 %v9675_v11, %v4369_v9  ;;  %v9943_v35 = vmul.f32 %v9678_v36, %v4369_v9  ;;  %v9954_v24 = vmul.f32 %v9686_v56, %v4369_v9 }
 0x6f3   : > { %v4309_v45 = vsel %vm1346_vm1, %v4306_v16, %v4308_v40  ;;  %v4510_v3 = vmul.f32 %v9675_v11, %v4308_v40  ;;  %v4730_v61 = vmul.f32 %v9678_v36, %v4308_v40  ;;  %v4950_v7 = vmul.f32 %v9686_v56, %v4308_v40 }
 0x6f4   : > { %v9930_v32 = vpop.f32.mrf.mxu0  ;;  %v4436_v17 = vmul.f32 %v9672_v12, %v4309_v45  ;;  %v4509_v2 = vmul.f32 %v9675_v11, %v4309_v45  ;;  %v9937_v6 = vmul.f32 %v9678_v36, %v4309_v45  ;;  %v4304_v0 = vrot.slane %v4192_v25, 4 }
 0x6f5   : > { %v4613_v21 = vrot.slane %v4510_v3, 1  ;;  %v4833_v47 = vrot.slane %v4730_v61, 2  ;;  %v9949_v54 = vmul.f32 %v9686_v56, %v4309_v45  ;;  %v9951_v30 = vadd.f32 %v4433_v46, %v4397_v57 }
 0x6f6   : > { %v9945_v18 = vpop.f32.mrf.mxu0  ;;  %v4468_v20 = vadd.f32 %v4436_v17, %v4400_v34  ;;  %v4611_v49 = vrot.slane %v4509_v2, 1  ;;  %v10574_v52 = vrot.slane %v9937_v6, 2  ;;  %v4305_v53 = vsel %vm1346_vm1, %v4303_v31, %v4304_v0 }
 0x6f7   : > { %v4307_v19 = vsel %vm1346_vm1, %v4304_v0, %v4306_v16  ;;  %v5053_v14 = vrot.slane %v4950_v7, 3  ;;  %v4434_v39 = vmul.f32 %v9672_v12, %v4305_v53  ;;  %v4398_v13 = vmul.f32 %v9681_v23, %v4192_v25 }
 0x6f8   : > { %v4614_v59 = vsel %vm1640_vm2, %v4611_v49, %v4613_v21  ;;  %v4435_v44 = vmul.f32 %v9672_v12, %v4307_v19  ;;  %v9963_v58 = vmul.f32 %v9675_v11, %v4305_v53  ;;  %v4508_v8 = vmul.f32 %v9675_v11, %v4307_v19  ;;  %v6428_v9 = vpop.f32.mrf.mxu0 }
 0x6f9   : > { %v4688_v1 = vadd.f32 %v4614_v59, %v4468_v20  ;;  %v4834_v31 = vsel %vm1861_vm3, %v10574_v52, %v4833_v47  ;;  %v10572_v16 = vrot.slane %v9949_v54, 3  ;;  %v9971_v40 = vmul.f32 %v9678_v36, %v4305_v53 }
 0x6fa   : > { %v9974_v27 = vmul.f32 %v9678_v36, %v4307_v19  ;;  %v4466_v57 = vadd.f32 %v4434_v39, %v4398_v13  ;;  %v10576_v25 = vrot.slane %v9963_v58, 1  ;;  %v4609_v26 = vrot.slane %v4508_v8, 1  ;;  %v4208_v21 = vpop.f32.mrf.mxu0 }
 0x6fb   : > { %v4908_v15 = vadd.f32 %v4834_v31, %v4688_v1  ;;  %v4467_v45 = vadd.f32 %v4435_v44, %v4399_v37  ;;  %v10575_v3 = vrot.slane %v9971_v40, 2  ;;  %v9980_v46 = vmul.f32 %v9686_v56, %v4305_v53 }
 0x6fc   : > { %v10573_v61 = vrot.slane %v9974_v27, 2  ;;  %v4610_v17 = vsel %vm1640_vm2, %v10576_v25, %v4609_v26  ;;  %v4612_v2 = vsel %vm1640_vm2, %v4609_v26, %v4611_v49  ;;  %v5054_v47 = vsel %vm2082_vm4, %v10572_v16, %v5053_v14 }
 0x6fd   : > { %v9993_v0 = vmul.f32 %v9686_v56, %v4307_v19  ;;  %v4313_v20 = vrot.slane %v9930_v32, 4  ;;  %v9996_v53 = vadd.f32 %v5054_v47, %v4908_v15  ;;  %v4403_v59 = vmul.f32 %v9930_v32, %v9681_v23  ;;  %v10013_v15 = vpop.f32.mrf.mxu0 }
 0x6fe   : > { %v4310_v39 = vrot.slane %v9945_v18, 4  ;;  %v4315_v49 = vrot.slane %v6428_v9, 4  ;;  %v4686_v44 = vadd.f32 %v4610_v17, %v4466_v57  ;;  %v10001_v1 = vadd.f32 %v4612_v2, %v4467_v45 }
 0x6ff   : > { %v4830_v19 = vsel %vm1861_vm3, %v10575_v3, %v10573_v61  ;;  %v4401_v26 = vmul.f32 %v9681_v23, %v9945_v18  ;;  %v4404_v45 = vmul.f32 %v6428_v9, %v9681_v23  ;;  %v4311_v17 = vrot.slane %v4208_v21, 4 }
 0x700   : > { %v4370_v13 = vsel %vm1346_vm1, 0.0, %v4310_v39  ;;  %v4316_v8 = vsel %vm1346_vm1, %v4313_v20, %v4315_v49  ;;  %v4515_v32 = vmul.f32 %v9675_v11, %v4315_v49  ;;  %v4735_v31 = vmul.f32 %v9678_v36, %v4315_v49 }
 0x701   : > { %v4440_v2 = vmul.f32 %v9672_v12, %v4316_v8  ;;  %v4514_v47 = vmul.f32 %v9675_v11, %v4316_v8  ;;  %v10022_v37 = vmul.f32 %v9678_v36, %v4316_v8  ;;  %v10024_v61 = vadd.f32 %v4830_v19, %v4686_v44 }
 0x702   : > { %v4622_v16 = vrot.slane %v4515_v32, 1  ;;  %v4437_v52 = vmul.f32 %v9672_v12, %v4370_v13  ;;  %v4402_v14 = vmul.f32 %v9681_v23, %v4208_v21  ;;  %v4842_v3 = vrot.slane %v4735_v31, 2 }
 0x703   : > { %v4472_v18 = vadd.f32 %v4440_v2, %v4404_v45  ;;  %v4620_v7 = vrot.slane %v4514_v47, 1  ;;  %v10580_v9 = vrot.slane %v10022_v37, 2  ;;  %v10031_v34 = vmul.f32 %v9686_v56, %v4316_v8  ;;  %v10046_v2 = vpop.f32.mrf.mxu0 }
 0x704   : > { %v4955_v32 = vmul.f32 %v9686_v56, %v4315_v49  ;;  %v4312_v25 = vsel %vm1346_vm1, %v4310_v39, %v4311_v17  ;;  %v4314_v44 = vsel %vm1346_vm1, %v4311_v17, %v4313_v20  ;;  %v10037_v19 = vmul.f32 %v9675_v11, %v4370_v13 }
 0x705   : > { %v10040_v21 = vmul.f32 %v9678_v36, %v4370_v13  ;;  %v10043_v45 = vmul.f32 %v9686_v56, %v4370_v13  ;;  %v4623_v31 = vsel %vm1640_vm2, %v4620_v7, %v4622_v16  ;;  %v4438_v49 = vmul.f32 %v9672_v12, %v4312_v25  ;;  %v6432_v47 = vpop.f32.mrf.mxu0 }
 0x706   : > { %v4692_v8 = vadd.f32 %v4623_v31, %v4472_v18  ;;  %v4439_v39 = vmul.f32 %v9672_v12, %v4314_v44  ;;  %v10051_v20 = vmul.f32 %v9675_v11, %v4312_v25  ;;  %v4843_v17 = vsel %vm1861_vm3, %v10580_v9, %v4842_v3 }
 0x707   : > { %v5062_v13 = vrot.slane %v4955_v32, 3  ;;  %v4513_v57 = vmul.f32 %v9675_v11, %v4314_v44  ;;  %v10060_v18 = vmul.f32 %v9678_v36, %v4312_v25  ;;  %v10063_v31 = vmul.f32 %v9678_v36, %v4314_v44 }
 0x708   : > { %v4912_v16 = vadd.f32 %v4843_v17, %v4692_v8  ;;  %v10065_v62 = vadd.f32 %v4437_v52, %v4401_v26  ;;  %v4470_v60 = vadd.f32 %v4438_v49, %v4402_v14  ;;  %v4471_v8 = vadd.f32 %v4439_v39, %v4403_v59  ;;  %v11017_v17 = vld [vmem:[#allocation16_spill] sm:$0xff] }
 0x709   : > { %v4618_v9 = vrot.slane %v4513_v57, 1  ;;  %v5153_v10 = vadd.f32 %v9917_v42, %v11017_v17  ;;  %v11018_v5 = vrot.slane %v10031_v34, 3  ;;  %v11019_v52 = vrot.slane %v10051_v20, 1  ;;  %v11021_v14 = vld [vmem:[#allocation48_spill] sm:$0xff]  ;;  %v4224_v17 = vpop.f32.mrf.mxu0 }
 0x70a   : > { %v10079_v41 = vmul.f32 %v9686_v56, %v4312_v25  ;;  %v10082_v57 = vmul.f32 %v9686_v56, %v4314_v44  ;;  %v10584_v42 = vrot.slane %v10063_v31, 2  ;;  %v5154_v49 = vadd.f32 %v9919_v63, %v11021_v14 }
 0x70b   : > { %v5063_v4 = vsel %vm2082_vm4, %v11018_v5, %v5062_v13  ;;  %v4619_v26 = vsel %vm1640_vm2, %v11019_v52, %v4618_v9  ;;  %v4621_v5 = vsel %vm1640_vm2, %v4618_v9, %v4620_v7  ;;  %v4317_v39 = vrot.slane %v10046_v2, 4  ;;  %v11022_v13 = vld [vmem:[#allocation50_spill] sm:$0xff] }
 0x70c   : > { %v10084_v32 = vadd.f32 %v5063_v4, %v4912_v16  ;;  %v5155_v25 = vadd.f32 %v9932_v38, %v9407_v51  ;;  %v5156_v44 = vadd.f32 %v9925_v33, %v11022_v13  ;;  %v4690_v4 = vadd.f32 %v4619_v26, %v4470_v60 }
 0x70d   : > { %v4407_v16 = vmul.f32 %v10013_v15, %v9681_v23  ;;  %v5177_v52 = vpack.c.bf16 %v5154_v49, %v5153_v10  ;;  %v4322_v3 = vrot.slane %v6432_v47, 4  ;;  %v4371_v7 = vsel %vm1346_vm1, 0.0, %v4317_v39 }
 0x70e   : > { %11020 = vst [vmem:[#allocation21_spill] sm:$0xff] %v10084_v32  ;;  %v5178_v9 = vpack.c.bf16 %v5156_v44, %v5155_v25  ;;  %v10101_v14 = vadd.f32 %v4621_v5, %v4471_v8  ;;  %v11023_v51 = vrot.slane %v10060_v18, 2  ;;  %v4441_v33 = vmul.f32 %v9672_v12, %v4371_v7 }
 0x70f   : > { %6465 = vmatprep.mubr.bf16.mxu1 %v5177_v52  ;;  %v4318_v10 = vrot.slane %v4224_v17, 4  ;;  %v10110_v38 = vmul.f32 %v9675_v11, %v4371_v7  ;;  %v10113_v26 = vmul.f32 %v9678_v36, %v4371_v7  ;;  %v11025_v8 = vrot.slane %v10013_v15, 4 }
 0x710   : > { %v4839_v60 = vsel %vm1861_vm3, %v11023_v51, %v10584_v42  ;;  %6466 = vmatmul.mubr.bf16.gmra.mxu1 %v5178_v9  ;;  %v4520_v5 = vmul.f32 %v9675_v11, %v4322_v3  ;;  %v4405_v13 = vmul.f32 %v9681_v23, %v10046_v2  ;;  %v10124_v44 = vmul.f32 %v9686_v56, %v4371_v7 }
 0x711   : > { %11024 = vst [vmem:[#allocation59_spill] sm:$0xff] %v10113_v26  ;;  %v4323_v49 = vsel %vm1346_vm1, %v11025_v8, %v4322_v3  ;;  %v10119_v25 = vadd.f32 %v4839_v60, %v4690_v4  ;;  %v4408_v52 = vmul.f32 %v6432_v47, %v9681_v23  ;;  %v10129_v9 = vmul.f32 %v9678_v36, %v4322_v3 }
 0x712   : > { %11026 = vst [vmem:[#allocation56_spill] sm:$0xff] %v10124_v44  ;;  %v4519_v51 = vmul.f32 %v9675_v11, %v4323_v49  ;;  %v10132_v42 = vmul.f32 %v9686_v56, %v4322_v3  ;;  %v4406_v8 = vmul.f32 %v9681_v23, %v4224_v17  ;;  %v10135_v4 = vadd.f32 %v4441_v33, %v4405_v13 }
 0x713   : > { %v4444_v60 = vmul.f32 %v9672_v12, %v4323_v49  ;;  %v4631_v2 = vrot.slane %v4520_v5, 1  ;;  %v4319_v7 = vsel %vm1346_vm1, %v4317_v39, %v4318_v10  ;;  %v11028_v32 = vrot.slane %v10013_v15, 4 }
 0x714   : > { %11027 = vst [vmem:[#allocation57_spill] sm:$0xff] %v10135_v4  ;;  %v4629_v63 = vrot.slane %v4519_v51, 1  ;;  %v4442_v23 = vmul.f32 %v9672_v12, %v4319_v7  ;;  %v4517_v33 = vmul.f32 %v9675_v11, %v4319_v7  ;;  %v10149_v5 = vmul.f32 %v9678_v36, %v4323_v49 }
 0x715   : > { %v4321_v55 = vsel %vm1346_vm1, %v4318_v10, %v11028_v32  ;;  %v4851_v39 = vrot.slane %v10129_v9, 2  ;;  %v4737_v51 = vmul.f32 %v9678_v36, %v4319_v7  ;;  %v4476_v15 = vadd.f32 %v4444_v60, %v4408_v52 }
 0x716   : > { %v4443_v17 = vmul.f32 %v9672_v12, %v4321_v55  ;;  %v4518_v13 = vmul.f32 %v9675_v11, %v4321_v55  ;;  %v4632_v32 = vsel %vm1640_vm2, %v4629_v63, %v4631_v2  ;;  %v4474_v10 = vadd.f32 %v4442_v23, %v4406_v8 }
 0x717   : > { %v4625_v47 = vrot.slane %v4517_v33, 1  ;;  %v4738_v12 = vmul.f32 %v9678_v36, %v4321_v55  ;;  %v4845_v44 = vrot.slane %v4737_v51, 2  ;;  %v10157_v26 = vmul.f32 %v9686_v56, %v4323_v49 }
 0x718   : > { %v4475_v3 = vadd.f32 %v4443_v17, %v4407_v16  ;;  %v4627_v59 = vrot.slane %v4518_v13, 1  ;;  %v4957_v4 = vmul.f32 %v9686_v56, %v4319_v7  ;;  %v10161_v9 = vmul.f32 %v9686_v56, %v4321_v55 }
 0x719   : > { %v11029_v11 = vrot.slane %v9963_v58, 1  ;;  %v11030_v52 = vrot.slane %v9940_v43, 1  ;;  %v4847_v36 = vrot.slane %v4738_v12, 2  ;;  %v4696_v49 = vadd.f32 %v4632_v32, %v4476_v15 }
 0x71a   : > { %v4628_v16 = vsel %vm1640_vm2, %v4625_v47, %v4627_v59  ;;  %v4630_v60 = vsel %vm1640_vm2, %v4627_v59, %v4629_v63  ;;  %v4849_v23 = vrot.slane %v10149_v5, 2  ;;  %v5071_v7 = vrot.slane %v10132_v42, 3 }
 0x71b   : > { %v4608_v8 = vsel %vm1640_vm2, %v11030_v52, %v11029_v11  ;;  %v4694_v55 = vadd.f32 %v4628_v16, %v4474_v10  ;;  %v4695_v56 = vadd.f32 %v4630_v60, %v4475_v3  ;;  %v4848_v58 = vsel %vm1861_vm3, %v4845_v44, %v4847_v36 }
 0x71c   : > { %v4685_v2 = vadd.f32 %v4608_v8, %v9951_v30  ;;  %v5065_v17 = vrot.slane %v4957_v4, 3  ;;  %v11031_v43 = vrot.slane %v9971_v40, 2  ;;  %v11032_v33 = vrot.slane %v9943_v35, 2 }
 0x71d   : > { %v5067_v59 = vrot.slane %v10161_v9, 3  ;;  %v11033_v30 = vrot.slane %v9993_v0, 3  ;;  %v11034_v5 = vrot.slane %v9980_v46, 3  ;;  %v11035_v3 = vrot.slane %v9937_v6, 2 }
 0x71e   : > { %v4828_v13 = vsel %vm1861_vm3, %v11032_v33, %v11031_v43  ;;  %v11036_v51 = vrot.slane %v9974_v27, 2  ;;  %v4914_v40 = vadd.f32 %v4848_v58, %v4694_v55  ;;  %v11038_v15 = vrot.slane %v9954_v24, 3 }
 0x71f   : > { %v4905_v63 = vadd.f32 %v4828_v13, %v4685_v2  ;;  %v5050_v42 = vsel %vm2082_vm4, %v11034_v5, %v11033_v30  ;;  %v11037_v35 = vmov %v11034_v5  ;;  %v11039_v11 = vrot.slane %v9949_v54, 3 }
 0x720   : > { %v4832_v4 = vsel %vm1861_vm3, %v11036_v51, %v11035_v3  ;;  %v5048_v32 = vsel %vm2082_vm4, %v11038_v15, %v11037_v35  ;;  %v5126_v10 = vadd.f32 %v5050_v42, %v10024_v61  ;;  %v11040_v6 = vmov %v11033_v30  ;;  %v11054_v42 = vld [vmem:[#allocation57_spill] sm:$0xff]  ;;  %v11055_v51 = vld [vmem:[#allocation59_spill] sm:$0xff] }
 0x721   : > { %v4907_v12 = vadd.f32 %v4832_v4, %v10001_v1  ;;  %v5125_v9 = vadd.f32 %v5048_v32, %v4905_v63  ;;  %v5052_v27 = vsel %vm2082_vm4, %v11040_v6, %v11039_v11  ;;  %v5160_v52 = vadd.f32 %v9996_v53, %v9543_v28 }
 0x722   : > { %v11041_v46 = vrot.slane %v10051_v20, 1  ;;  %v11042_v24 = vrot.slane %v10037_v19, 1  ;;  %v5158_v61 = vadd.f32 %v5126_v10, %v9501_v22  ;;  %v11043_v54 = vrot.slane %v10082_v57, 3 }
 0x723   : > { %v5127_v16 = vadd.f32 %v5052_v27, %v4907_v12  ;;  %v11044_v0 = vrot.slane %v10079_v41, 3  ;;  %v5157_v2 = vadd.f32 %v5125_v9, %v9510_v48  ;;  %v11045_v28 = vrot.slane %v10060_v18, 2 }
 0x724   : > { %v4617_v8 = vsel %vm1640_vm2, %v11042_v24, %v11041_v46  ;;  %v11046_v53 = vrot.slane %v10040_v21, 2  ;;  %v11047_v22 = vrot.slane %v10022_v37, 2  ;;  %v11050_v48 = vrot.slane %v10043_v45, 3  ;;  %v11062_v46 = vld [vmem:[#allocation21_spill] sm:$0xff] }
 0x725   : > { %v4689_v1 = vadd.f32 %v4617_v8, %v10065_v62  ;;  %v5059_v60 = vsel %vm2082_vm4, %v11044_v0, %v11043_v54  ;;  %v11048_v62 = vrot.slane %v10063_v31, 2  ;;  %v5159_v58 = vadd.f32 %v5127_v16, %v9557_v29 }
 0x726   : > { %v4837_v19 = vsel %vm1861_vm3, %v11046_v53, %v11045_v28  ;;  %v5130_v20 = vadd.f32 %v5059_v60, %v10119_v25  ;;  %v11049_v33 = vmov %v11044_v0  ;;  %v5179_v13 = vpack.c.bf16 %v5158_v61, %v5157_v2  ;;  %v11066_v60 = vld [vmem:[#allocation24_spill] sm:$0xff] }
 0x727   : > { %v4841_v55 = vsel %vm1861_vm3, %v11048_v62, %v11047_v22  ;;  %v4909_v43 = vadd.f32 %v4837_v19, %v4689_v1  ;;  %v5057_v18 = vsel %vm2082_vm4, %v11050_v48, %v11049_v33  ;;  %v11051_v37 = vrot.slane %v10031_v34, 3 }
 0x728   : > { %v4911_v21 = vadd.f32 %v4841_v55, %v10101_v14  ;;  %v5162_v25 = vadd.f32 %v5130_v20, %v9560_v50  ;;  %v11052_v31 = vmov %v11043_v54  ;;  %v11053_v29 = vrot.slane %v10110_v38, 1  ;;  %6469 = vmatprep.mubr.bf16.mxu1 %v5179_v13  ;;  %v11057_v38 = vld [vmem:[#allocation49_spill] sm:$0xff] }
 0x729   : > { %v5061_v63 = vsel %vm2082_vm4, %v11052_v31, %v11051_v37  ;;  %v5180_v41 = vpack.c.bf16 %v5160_v52, %v5159_v58  ;;  %v5129_v5 = vadd.f32 %v5057_v18, %v4909_v43  ;;  %v4852_v14 = vsel %vm1861_vm3, %v4849_v23, %v4851_v39  ;;  %v11059_v39 = vld [vmem:[#allocation56_spill] sm:$0xff]  ;;  %v11061_v52 = vld [vmem:[#allocation17_spill] sm:$0xff] }
 0x72a   : > { %v4626_v30 = vsel %vm1640_vm2, %v11053_v29, %v4625_v47  ;;  %v5131_v45 = vadd.f32 %v5061_v63, %v4911_v21  ;;  %v11056_v50 = vrot.slane %v11055_v51, 2  ;;  %v5068_v57 = vsel %vm2082_vm4, %v5065_v17, %v5067_v59  ;;  %v11058_v47 = vld [vmem:[#allocation55_spill] sm:$0xff] }
 0x72b   : > { %v4693_v3 = vadd.f32 %v4626_v30, %v11054_v42  ;;  %v4850_v4 = vsel %vm1861_vm3, %v4847_v36, %v4849_v23  ;;  %6470 = vmatmul.mubr.bf16.gmra.mxu1 %v5180_v41  ;;  %v5161_v35 = vadd.f32 %v5129_v5, %v11057_v38  ;;  %v5134_v10 = vadd.f32 %v5068_v57, %v4914_v40  ;;  %v11063_v23 = vld [vmem:[#allocation54_spill] sm:$0xff]  ;;  %v11064_v40 = vld [vmem:[#allocation52_spill] sm:$0xff] }
 0x72c   : > { %v4846_v34 = vsel %vm1861_vm3, %v11056_v50, %v4845_v44  ;;  %v5163_v15 = vadd.f32 %v5131_v45, %v11058_v47  ;;  %v4916_v12 = vadd.f32 %v4852_v14, %v4696_v49  ;;  %v5069_v9 = vrot.slane %v10157_v26, 3 }
 0x72d   : > { %v4913_v32 = vadd.f32 %v4846_v34, %v4693_v3  ;;  %v11060_v11 = vrot.slane %v11059_v39, 3  ;;  %v4915_v27 = vadd.f32 %v4850_v4, %v4695_v56  ;;  %v5181_v44 = vpack.c.bf16 %v5162_v25, %v5161_v35  ;;  %v11065_v56 = vld [vmem:[#allocation19_spill] sm:$0xff] }
 0x72e   : > { %v5164_v24 = vadd.f32 %v11062_v46, %v11061_v52  ;;  %v5166_v8 = vadd.f32 %v5134_v10, %v11063_v23  ;;  %v5070_v61 = vsel %vm2082_vm4, %v5067_v59, %v5069_v9  ;;  %v5072_v26 = vsel %vm2082_vm4, %v5069_v9, %v5071_v7  ;;  %v10268_v59 = vld [vmem:[%s10395_s8] ss:$0 sm:$0xff] }
 0x72f   : > { %v5066_v6 = vsel %vm2082_vm4, %v11060_v11, %v5065_v17  ;;  %6473 = vmatprep.mubr.bf16.mxu1 %v5181_v44  ;;  %v5135_v1 = vadd.f32 %v5070_v61, %v4915_v27  ;;  %v5136_v54 = vadd.f32 %v5072_v26, %v4916_v12 }
 0x730   : > { %v5133_v36 = vadd.f32 %v5066_v6, %v4913_v32  ;;  %v5182_v16 = vpack.c.bf16 %v5164_v24, %v5163_v15 }
 0x731   : > { %v5167_v17 = vadd.f32 %v5135_v1, %v11065_v56  ;;  %v5168_v2 = vadd.f32 %v5136_v54, %v11066_v60 }
 0x732   : > { %v5165_v49 = vadd.f32 %v5133_v36, %v11064_v40 }
 0x733   : > { %6474 = vmatmul.mubr.bf16.gmra.mxu1 %v5182_v16  ;;  %v5184_v28 = vpack.c.bf16 %v5168_v2, %v5167_v17 }
 0x734   : > { %v5183_v0 = vpack.c.bf16 %v5166_v8, %v5165_v49 }
 0x736   : > { %6477 = vmatprep.mubr.bf16.mxu1 %v5183_v0 }
 0x73b   : > { %6478 = vmatmul.mubr.bf16.gmra.mxu1 %v5184_v28  ;;  %v6451_v53 = vpop.f32.mrf.mxu0 }
 0x73c   : > { %v5299_v19 = vadd.f32 %v6451_v53, %v10268_v59 }
 0x73d   : > { %v5290_v20 = vpop.f32.mrf.mxu0 }
 0x73e   : > { %v5877_v7 = vmul.f32 -1.442695, %v5299_v19  ;;  %v5291_v22 = vadd.f32 %v10268_v59, %v5290_v20 }
 0x73f   : > { %v6452_v62 = vpop.f32.mrf.mxu0 }
 0x740   : > { %6654 = vpow2.f32 %v5877_v7  ;;  %v5875_v55 = vmul.f32 -1.442695, %v5291_v22  ;;  %v5302_v58 = vadd.f32 %v6452_v62, %v10268_v59 }
 0x741   : > { %v5293_v43 = vpop.f32.mrf.mxu0 }
 0x742   : > { %6656 = vpow2.f32 %v5875_v55  ;;  %v5878_v33 = vmul.f32 -1.442695, %v5302_v58  ;;  %v5294_v48 = vadd.f32 %v10268_v59, %v5293_v43 }
 0x744   : > { %6658 = vpow2.f32 %v5878_v33  ;;  %v5876_v18 = vmul.f32 -1.442695, %v5294_v48 }
 0x746   : > { %6660 = vpow2.f32 %v5876_v18 }
 0x74d   : > { %v6655_v21 = vpop.eup %6654 }
 0x74e   : > { %v5515_v13 = vadd.f32 1.0, %v6655_v21 }
 0x74f   : > { %v6657_v25 = vpop.eup %6656 }
 0x750   : > { %6662 = vrcp.f32 %v5515_v13  ;;  %v5513_v37 = vadd.f32 1.0, %v6657_v25 }
 0x751   : > { %v6659_v31 = vpop.eup %6658 }
 0x752   : > { %6664 = vrcp.f32 %v5513_v37  ;;  %v5516_v63 = vadd.f32 1.0, %v6659_v31 }
 0x753   : > { %v6661_v29 = vpop.eup %6660 }
 0x754   : > { %6666 = vrcp.f32 %v5516_v63  ;;  %v5514_v30 = vadd.f32 1.0, %v6661_v29 }
 0x756   : > { %6668 = vrcp.f32 %v5514_v30 }
 0x75d   : > { %v6663_v5 = vpop.eup %6662 }
 0x75e   : > { %5611 = vst [vmem:[%s10276_s7 + $0x10] sm:$0xff] %v6663_v5 }
 0x75f   : > { %v6665_v3 = vpop.eup %6664 }
 0x760   : > { %5609 = vst [vmem:[%s10276_s7] sm:$0xff] %v6665_v3 }
 0x761   : > { %v6667_v34 = vpop.eup %6666 }
 0x762   : > { %5612 = vst [vmem:[%s10276_s7 + $0x18] sm:$0xff] %v6667_v34 }
 0x763   : > { %v6669_v35 = vpop.eup %6668 }
 0x764   : > { %v6455_v41 = vpop.f32.mrf.mxu1  ;;  %5610 = vst [vmem:[%s10276_s7 + $0x8] sm:$0xff] %v6669_v35 }
 0x765   : > { %v5315_v45 = vadd.f32 %v6455_v41, %v10268_v59 }
 0x766   : > { %v5306_v42 = vpop.f32.mrf.mxu1 }
 0x767   : > { %v5881_v14 = vmul.f32 -1.442695, %v5315_v45  ;;  %v5307_v51 = vadd.f32 %v10268_v59, %v5306_v42 }
 0x768   : > { %v6456_v50 = vpop.f32.mrf.mxu1 }
 0x769   : > { %6670 = vpow2.f32 %v5881_v14  ;;  %v5879_v57 = vmul.f32 -1.442695, %v5307_v51  ;;  %v5318_v4 = vadd.f32 %v6456_v50, %v10268_v59 }
 0x76a   : > { %v5309_v38 = vpop.f32.mrf.mxu1 }
 0x76b   : > { %6672 = vpow2.f32 %v5879_v57  ;;  %v5882_v47 = vmul.f32 -1.442695, %v5318_v4  ;;  %v5310_v15 = vadd.f32 %v10268_v59, %v5309_v38 }
 0x76d   : > { %6674 = vpow2.f32 %v5882_v47  ;;  %v5880_v32 = vmul.f32 -1.442695, %v5310_v15 }
 0x76f   : > { %6676 = vpow2.f32 %v5880_v32 }
 0x776   : > { %v6671_v10 = vpop.eup %6670 }
 0x777   : > { %v5519_v12 = vadd.f32 1.0, %v6671_v10 }
 0x778   : > { %v6673_v9 = vpop.eup %6672 }
 0x779   : > { %6678 = vrcp.f32 %v5519_v12  ;;  %v5517_v39 = vadd.f32 1.0, %v6673_v9 }
 0x77a   : > { %v6675_v11 = vpop.eup %6674 }
 0x77b   : > { %6680 = vrcp.f32 %v5517_v39  ;;  %v5520_v27 = vadd.f32 1.0, %v6675_v11 }
 0x77c   : > { %v6677_v52 = vpop.eup %6676 }
 0x77d   : > { %6682 = vrcp.f32 %v5520_v27  ;;  %v5518_v24 = vadd.f32 1.0, %v6677_v52 }
 0x77f   : > { %6684 = vrcp.f32 %v5518_v24 }
 0x780   : > { %v6459_v6 = vpop.f32.mrf.mxu1 }
 0x781   : > { %v5331_v44 = vadd.f32 %v6459_v6, %v10268_v59 }
 0x782   : > { %v5322_v46 = vpop.f32.mrf.mxu1 }
 0x783   : > { %v5885_v36 = vmul.f32 -1.442695, %v5331_v44  ;;  %v5323_v23 = vadd.f32 %v10268_v59, %v5322_v46 }
 0x784   : > { %v6460_v8 = vpop.f32.mrf.mxu1 }
 0x785   : > { %v5883_v61 = vmul.f32 -1.442695, %v5323_v23  ;;  %v5334_v16 = vadd.f32 %v6460_v8, %v10268_v59  ;;  %6686 = vpow2.f32 %v5885_v36 }
 0x786   : > { %v5325_v40 = vpop.f32.mrf.mxu1  ;;  %v6679_v17 = vpop.eup %6678 }
 0x787   : > { %6688 = vpow2.f32 %v5883_v61  ;;  %v5886_v49 = vmul.f32 -1.442695, %v5334_v16  ;;  %v5326_v1 = vadd.f32 %v10268_v59, %v5325_v40  ;;  %5615 = vst [vmem:[%s10276_s7 + $0x30] sm:$0xff] %v6679_v17 }
 0x788   : > { %v6681_v53 = vpop.eup %6680 }
 0x789   : > { %6690 = vpow2.f32 %v5886_v49  ;;  %v5884_v26 = vmul.f32 -1.442695, %v5326_v1  ;;  %5613 = vst [vmem:[%s10276_s7 + $0x20] sm:$0xff] %v6681_v53 }
 0x78a   : > { %v6463_v54 = vpop.f32.mrf.mxu1  ;;  %v6683_v22 = vpop.eup %6682 }
 0x78b   : > { %v5347_v0 = vadd.f32 %v6463_v54, %v10268_v59  ;;  %6692 = vpow2.f32 %v5884_v26  ;;  %5616 = vst [vmem:[%s10276_s7 + $0x38] sm:$0xff] %v6683_v22 }
 0x78c   : > { %v5338_v56 = vpop.f32.mrf.mxu1  ;;  %v6685_v58 = vpop.eup %6684 }
 0x78d   : > { %v5889_v60 = vmul.f32 -1.442695, %v5347_v0  ;;  %v5339_v2 = vadd.f32 %v10268_v59, %v5338_v56  ;;  %5614 = vst [vmem:[%s10276_s7 + $0x28] sm:$0xff] %v6685_v58 }
 0x78e   : > { %v6464_v28 = vpop.f32.mrf.mxu1 }
 0x78f   : > { %6694 = vpow2.f32 %v5889_v60  ;;  %v5887_v19 = vmul.f32 -1.442695, %v5339_v2  ;;  %v5350_v20 = vadd.f32 %v6464_v28, %v10268_v59 }
 0x790   : > { %v5341_v7 = vpop.f32.mrf.mxu1 }
 0x791   : > { %6696 = vpow2.f32 %v5887_v19  ;;  %v5890_v62 = vmul.f32 -1.442695, %v5350_v20  ;;  %v5342_v55 = vadd.f32 %v10268_v59, %v5341_v7 }
 0x792   : > { %v6687_v33 = vpop.eup %6686 }
 0x793   : > { %6698 = vpow2.f32 %v5890_v62  ;;  %v5888_v43 = vmul.f32 -1.442695, %v5342_v55  ;;  %v5523_v18 = vadd.f32 1.0, %v6687_v33 }
 0x794   : > { %v6689_v48 = vpop.eup %6688 }
 0x795   : > { %6700 = vpow2.f32 %v5888_v43  ;;  %v5521_v21 = vadd.f32 1.0, %v6689_v48 }
 0x796   : > { %v6691_v13 = vpop.eup %6690  ;;  %6702 = vrcp.f32 %v5523_v18 }
 0x797   : > { %6704 = vrcp.f32 %v5521_v21  ;;  %v5524_v25 = vadd.f32 1.0, %v6691_v13 }
 0x798   : > { %v6693_v37 = vpop.eup %6692 }
 0x799   : > { %6706 = vrcp.f32 %v5524_v25  ;;  %v5522_v31 = vadd.f32 1.0, %v6693_v37 }
 0x79b   : > { %6708 = vrcp.f32 %v5522_v31 }
 0x79c   : > { %v6695_v63 = vpop.eup %6694 }
 0x79d   : > { %v5527_v29 = vadd.f32 1.0, %v6695_v63 }
 0x79e   : > { %v6697_v30 = vpop.eup %6696 }
 0x79f   : > { %6710 = vrcp.f32 %v5527_v29  ;;  %v5525_v41 = vadd.f32 1.0, %v6697_v30 }
 0x7a0   : > { %v6699_v5 = vpop.eup %6698 }
 0x7a1   : > { %6712 = vrcp.f32 %v5525_v41  ;;  %v5528_v45 = vadd.f32 1.0, %v6699_v5 }
 0x7a2   : > { %v6701_v42 = vpop.eup %6700 }
 0x7a3   : > { %6714 = vrcp.f32 %v5528_v45  ;;  %v5526_v3 = vadd.f32 1.0, %v6701_v42  ;;  %v6703_v14 = vpop.eup %6702 }
 0x7a4   : > { %v6705_v51 = vpop.eup %6704  ;;  %5619 = vst [vmem:[%s10276_s7 + $0x50] sm:$0xff] %v6703_v14 }
 0x7a5   : > { %6716 = vrcp.f32 %v5526_v3  ;;  %5617 = vst [vmem:[%s10276_s7 + $0x40] sm:$0xff] %v6705_v51 }
 0x7a6   : > { %v6707_v50 = vpop.eup %6706 }
 0x7a7   : > { %5620 = vst [vmem:[%s10276_s7 + $0x58] sm:$0xff] %v6707_v50 }
 0x7a8   : > { %v6709_v34 = vpop.eup %6708 }
 0x7a9   : > { %5618 = vst [vmem:[%s10276_s7 + $0x48] sm:$0xff] %v6709_v34 }
 0x7ac   : > { %v6711_v57 = vpop.eup %6710 }
 0x7ad   : > { %5623 = vst [vmem:[%s10276_s7 + $0x70] sm:$0xff] %v6711_v57 }
 0x7ae   : > { %v6713_v4 = vpop.eup %6712 }
 0x7af   : > { %5621 = vst [vmem:[%s10276_s7 + $0x60] sm:$0xff] %v6713_v4 }
 0x7b0   : > { %v6715_v38 = vpop.eup %6714 }
 0x7b1   : > { %5624 = vst [vmem:[%s10276_s7 + $0x78] sm:$0xff] %v6715_v38 }
 0x7b2   : > { %v6717_v35 = vpop.eup %6716 }
 0x7b3   : > { %5622 = vst [vmem:[%s10276_s7 + $0x68] sm:$0xff] %v6717_v35 }
 0x7d0   : > { %v6467_v47 = vpop.f32.mrf.mxu1 }
 0x7d1   : > { %v5363_v15 = vadd.f32 %v6467_v47, %v10268_v59 }
 0x7d2   : > { %v5354_v32 = vpop.f32.mrf.mxu1 }
 0x7d3   : > { %v5893_v10 = vmul.f32 -1.442695, %v5363_v15  ;;  %v5355_v12 = vadd.f32 %v10268_v59, %v5354_v32 }
 0x7d4   : > { %v6468_v9 = vpop.f32.mrf.mxu1 }
 0x7d5   : > { %6718 = vpow2.f32 %v5893_v10  ;;  %v5891_v39 = vmul.f32 -1.442695, %v5355_v12  ;;  %v5366_v11 = vadd.f32 %v6468_v9, %v10268_v59 }
 0x7d6   : > { %v5357_v6 = vpop.f32.mrf.mxu1 }
 0x7d7   : > { %6720 = vpow2.f32 %v5891_v39  ;;  %v5894_v27 = vmul.f32 -1.442695, %v5366_v11  ;;  %v5358_v44 = vadd.f32 %v10268_v59, %v5357_v6 }
 0x7d9   : > { %6722 = vpow2.f32 %v5894_v27  ;;  %v5892_v52 = vmul.f32 -1.442695, %v5358_v44 }
 0x7db   : > { %6724 = vpow2.f32 %v5892_v52 }
 0x7e2   : > { %v6719_v46 = vpop.eup %6718 }
 0x7e3   : > { %v5531_v24 = vadd.f32 1.0, %v6719_v46 }
 0x7e4   : > { %v6721_v36 = vpop.eup %6720 }
 0x7e5   : > { %6726 = vrcp.f32 %v5531_v24  ;;  %v5529_v23 = vadd.f32 1.0, %v6721_v36 }
 0x7e6   : > { %v6723_v8 = vpop.eup %6722 }
 0x7e7   : > { %6728 = vrcp.f32 %v5529_v23  ;;  %v5532_v16 = vadd.f32 1.0, %v6723_v8 }
 0x7e8   : > { %v6725_v49 = vpop.eup %6724 }
 0x7e9   : > { %6730 = vrcp.f32 %v5532_v16  ;;  %v5530_v26 = vadd.f32 1.0, %v6725_v49 }
 0x7eb   : > { %v6471_v61 = vpop.f32.mrf.mxu1  ;;  %6732 = vrcp.f32 %v5530_v26 }
 0x7ec   : > { %v5379_v40 = vadd.f32 %v6471_v61, %v10268_v59 }
 0x7ed   : > { %v5370_v1 = vpop.f32.mrf.mxu1 }
 0x7ee   : > { %v5897_v54 = vmul.f32 -1.442695, %v5379_v40  ;;  %v5371_v0 = vadd.f32 %v10268_v59, %v5370_v1 }
 0x7ef   : > { %v6472_v56 = vpop.f32.mrf.mxu1 }
 0x7f0   : > { %v5895_v17 = vmul.f32 -1.442695, %v5371_v0  ;;  %v5382_v60 = vadd.f32 %v6472_v56, %v10268_v59  ;;  %6734 = vpow2.f32 %v5897_v54 }
 0x7f1   : > { %v5373_v2 = vpop.f32.mrf.mxu1 }
 0x7f2   : > { %6736 = vpow2.f32 %v5895_v17  ;;  %v5898_v28 = vmul.f32 -1.442695, %v5382_v60  ;;  %v5374_v53 = vadd.f32 %v10268_v59, %v5373_v2  ;;  %v6727_v58 = vpop.eup %6726 }
 0x7f3   : > { %v6475_v19 = vpop.f32.mrf.mxu1  ;;  %5627 = vst [vmem:[%s10276_s7 + $0x90] sm:$0xff] %v6727_v58 }
 0x7f4   : > { %6738 = vpow2.f32 %v5898_v28  ;;  %v5896_v20 = vmul.f32 -1.442695, %v5374_v53  ;;  %v5395_v7 = vadd.f32 %v6475_v19, %v10268_v59  ;;  %v6729_v18 = vpop.eup %6728 }
 0x7f5   : > { %v5386_v22 = vpop.f32.mrf.mxu1  ;;  %5625 = vst [vmem:[%s10276_s7 + $0x80] sm:$0xff] %v6729_v18 }
 0x7f6   : > { %6740 = vpow2.f32 %v5896_v20  ;;  %v5901_v62 = vmul.f32 -1.442695, %v5395_v7  ;;  %v5387_v55 = vadd.f32 %v10268_v59, %v5386_v22  ;;  %v6731_v37 = vpop.eup %6730 }
 0x7f7   : > { %v6476_v43 = vpop.f32.mrf.mxu1  ;;  %5628 = vst [vmem:[%s10276_s7 + $0x98] sm:$0xff] %v6731_v37 }
 0x7f8   : > { %6742 = vpow2.f32 %v5901_v62  ;;  %v5899_v33 = vmul.f32 -1.442695, %v5387_v55  ;;  %v5398_v48 = vadd.f32 %v6476_v43, %v10268_v59  ;;  %v6733_v30 = vpop.eup %6732 }
 0x7f9   : > { %v5389_v21 = vpop.f32.mrf.mxu1  ;;  %5626 = vst [vmem:[%s10276_s7 + $0x88] sm:$0xff] %v6733_v30 }
 0x7fa   : > { %6744 = vpow2.f32 %v5899_v33  ;;  %v5902_v13 = vmul.f32 -1.442695, %v5398_v48  ;;  %v5390_v25 = vadd.f32 %v10268_v59, %v5389_v21 }
 0x7fb   : > { %v6479_v31 = vpop.f32.mrf.mxu1 }
 0x7fc   : > { %6746 = vpow2.f32 %v5902_v13  ;;  %v5900_v63 = vmul.f32 -1.442695, %v5390_v25  ;;  %v5411_v29 = vadd.f32 %v6479_v31, %v10268_v59 }
 0x7fd   : > { %v5402_v41 = vpop.f32.mrf.mxu1  ;;  %v6735_v5 = vpop.eup %6734 }
 0x7fe   : > { %6748 = vpow2.f32 %v5900_v63  ;;  %v5905_v45 = vmul.f32 -1.442695, %v5411_v29  ;;  %v5403_v42 = vadd.f32 %v10268_v59, %v5402_v41  ;;  %v5535_v14 = vadd.f32 1.0, %v6735_v5 }
 0x7ff   : > { %v6737_v3 = vpop.eup %6736  ;;  %v6480_v51 = vpop.f32.mrf.mxu1 }
 0x800   : > { %v5533_v50 = vadd.f32 1.0, %v6737_v3  ;;  %6750 = vpow2.f32 %v5905_v45  ;;  %v5903_v34 = vmul.f32 -1.442695, %v5403_v42  ;;  %v5414_v57 = vadd.f32 %v6480_v51, %v10268_v59 }
 0x801   : > { %v6739_v4 = vpop.eup %6738  ;;  %6752 = vrcp.f32 %v5535_v14  ;;  %v5405_v38 = vpop.f32.mrf.mxu1 }
 0x802   : > { %6754 = vrcp.f32 %v5533_v50  ;;  %v5536_v35 = vadd.f32 1.0, %v6739_v4  ;;  %v5906_v47 = vmul.f32 -1.442695, %v5414_v57  ;;  %v5406_v15 = vadd.f32 %v10268_v59, %v5405_v38 }
 0x803   : > { %v6741_v32 = vpop.eup %6740  ;;  %6756 = vpow2.f32 %v5903_v34 }
 0x804   : > { %6758 = vrcp.f32 %v5536_v35  ;;  %v5534_v10 = vadd.f32 1.0, %v6741_v32  ;;  %v5904_v12 = vmul.f32 -1.442695, %v5406_v15 }
 0x805   : > { %v6743_v9 = vpop.eup %6742  ;;  %6760 = vpow2.f32 %v5906_v47 }
 0x806   : > { %6762 = vrcp.f32 %v5534_v10  ;;  %v5539_v39 = vadd.f32 1.0, %v6743_v9 }
 0x807   : > { %v6745_v11 = vpop.eup %6744  ;;  %6764 = vpow2.f32 %v5904_v12 }
 0x808   : > { %6766 = vrcp.f32 %v5539_v39  ;;  %v5537_v6 = vadd.f32 1.0, %v6745_v11 }
 0x809   : > { %v6747_v27 = vpop.eup %6746 }
 0x80a   : > { %6768 = vrcp.f32 %v5537_v6  ;;  %v5540_v44 = vadd.f32 1.0, %v6747_v27 }
 0x80b   : > { %v6749_v59 = vpop.eup %6748 }
 0x80c   : > { %6770 = vrcp.f32 %v5540_v44  ;;  %v5538_v52 = vadd.f32 1.0, %v6749_v59 }
 0x80d   : > { %v6751_v46 = vpop.eup %6750 }
 0x80e   : > { %v6753_v24 = vpop.eup %6752  ;;  %6772 = vrcp.f32 %v5538_v52  ;;  %v5543_v36 = vadd.f32 1.0, %v6751_v46 }
 0x80f   : > { %v6755_v23 = vpop.eup %6754  ;;  %5631 = vst [vmem:[%s10276_s7 + $0xb0] sm:$0xff] %v6753_v24 }
 0x810   : > { %v6757_v8 = vpop.eup %6756  ;;  %5629 = vst [vmem:[%s10276_s7 + $0xa0] sm:$0xff] %v6755_v23  ;;  %6774 = vrcp.f32 %v5543_v36 }
 0x811   : > { %v6759_v61 = vpop.eup %6758  ;;  %v5541_v16 = vadd.f32 1.0, %v6757_v8 }
 0x812   : > { %v6761_v40 = vpop.eup %6760  ;;  %5632 = vst [vmem:[%s10276_s7 + $0xb8] sm:$0xff] %v6759_v61 }
 0x813   : > { %v6763_v49 = vpop.eup %6762  ;;  %6776 = vrcp.f32 %v5541_v16  ;;  %v5544_v1 = vadd.f32 1.0, %v6761_v40 }
 0x814   : > { %v6765_v26 = vpop.eup %6764  ;;  %5630 = vst [vmem:[%s10276_s7 + $0xa8] sm:$0xff] %v6763_v49 }
 0x815   : > { %v6767_v54 = vpop.eup %6766  ;;  %6778 = vrcp.f32 %v5544_v1  ;;  %v5542_v0 = vadd.f32 1.0, %v6765_v26 }
 0x816   : > { %5635 = vst [vmem:[%s10276_s7 + $0xd0] sm:$0xff] %v6767_v54 }
 0x817   : > { %v6769_v56 = vpop.eup %6768  ;;  %6780 = vrcp.f32 %v5542_v0 }
 0x818   : > { %5633 = vst [vmem:[%s10276_s7 + $0xc0] sm:$0xff] %v6769_v56 }
 0x819   : > { %v6771_v17 = vpop.eup %6770 }
 0x81a   : > { %5636 = vst [vmem:[%s10276_s7 + $0xd8] sm:$0xff] %v6771_v17 }
 0x81b   : > { %v6773_v60 = vpop.eup %6772 }
 0x81c   : > { %5634 = vst [vmem:[%s10276_s7 + $0xc8] sm:$0xff] %v6773_v60 }
 0x81d   : > { %v6775_v2 = vpop.eup %6774 }
 0x81e   : > { %5639 = vst [vmem:[%s10276_s7 + $0xf0] sm:$0xff] %v6775_v2 }
 0x820   : > { %v6777_v28 = vpop.eup %6776 }
 0x821   : > { %5637 = vst [vmem:[%s10276_s7 + $0xe0] sm:$0xff] %v6777_v28 }
 0x822   : > { %v6779_v53 = vpop.eup %6778 }
 0x823   : > { %5640 = vst [vmem:[%s10276_s7 + $0xf8] sm:$0xff] %v6779_v53 }
 0x824   : > { %v6781_v19 = vpop.eup %6780 }
 0x825   : > { %5638 = vst [vmem:[%s10276_s7 + $0xe8] sm:$0xff] %v6781_v19 }
 0x826   : > { %6901 = shalt.err (!%p6898_p10)
}
 0x827   : > { %s6902_s18 = scalar_lea.hbm %s10340_s15, 4096  ;;  %s6906_s19 = scalar_lea.hbm %s10396_s9, 8192 }
 0x828   : > { %p6903_p6 = scmp.ne.s32.totalorder %s10340_s15, %s6902_s18  ;;  %p6907_p3 = scmp.lt.s32.totalorder %s10340_s15, %s10396_s9 }
 0x829   : > { %p6908_p11 = scmp.lt.s32.totalorder %s6906_s19, %s6902_s18 }
 0x82a   : > { %p6904_p4 = pnand %p6903_p6, %p11067_p1 }
 0x82b   : > { %p6909_p5 = por %p6908_p11, %p6907_p3 }
 0x82c   : > { %p6905_p8 = pneg %p6904_p4 }
 0x82e   : > { %p6910_p7 = pnand %p6909_p5, %p6905_p8 }
 0x830   : > { %6913 = shalt.err (!%p6910_p7)
}
 0x831   : > { %s6969_s17 = smov 128   ;;  %s6970_s26 = smov 8  }
 0x832   : > { %6511 = dma.vmem_to_hbm [thread:$0]  (%p11067_p1), %s10342_s23, 4096, %s10340_s15, %s5642_s27, %s6969_s17, %s6969_s17, %s6970_s26  }
 0x833 PF: > { %s5671_s25 = sand.u32 1, %s6948_s30   ;;  %p11068_p12 = scmp.ne.s32.totalorder %s10592_s16, 0 }
 0x834   : > { %p11069_p9 = scmp.ge.s32.totalorder %s6960_s12, 2  ;;  %s5672_s13 = scalar_lea.sflag [#allocation4], %s5671_s25 }
 0x836   : > { %p6528_p13 = pnand %p11069_p9, %p11068_p12 }
 0x838   : > { %p6529_p0 = pneg %p6528_p13 }
 0x83a   : > { %6943 = dma.done.wait (%p6529_p0), %s5672_s13, 4096  }
 0x83b   : > { %6945 = vsyncadd (%p6529_p0), %s5672_s13, 4294963200  ;;  %p24_p2 = scmp.ge.s32.totalorder %s7110_s22, 4   ;;  %s11070_s30 = smov %s6952_s10 }
 0x83c   : > { %s11071_s10 = smov %s6956_s11  ;;  %s11072_s11 = smov %s7120_s29 }
 0x83d   : > { %s11073_s12 = smov %s7110_s22  ;;  %26 = sbr.rel (!%p24_p2) target bundleno = 11 (0xb), region = 121 }
 0x842   :  { %5677 = vsyncpa [#allocation3], 1 }
 0x843   :  { %5679 = vsyncpa [#allocation3 + $0x1], 1 }
 0x844   :  { %5680 = vsyncpa [#allocation6], 1 }
 0x845   :  { %5681 = vsyncpa [#allocation9], 1 }
 0x846   :  { %5682 = vsyncpa [#allocation4], 1 }
 0x847   :  { %5684 = vsyncpa [#allocation4 + $0x1], 1 }

</bundles_post_ra>
